<compile_context>
chip_gen: v5e
topology: v5e:2x2
jax: 0.10.0
libtpu: 0.0.40
codegen_flags: <defaults>
</compile_context>

<pallas_src>
import math
from functools import partial

import jax
import jax.numpy as jnp
from jax import lax
from jax.experimental import pallas as pl
from jax.experimental.pallas import tpu as pltpu


# ---------------------------------------------------------------------------
# BlockSpec helpers (grid over the batch axis; everything else whole-in-VMEM)
# ---------------------------------------------------------------------------

def _full_spec(shape):
    nd = len(shape)
    return pl.BlockSpec(tuple(shape), lambda b: (0,) * nd)


def _batch_spec(shape):
    rest = tuple(shape[1:])
    nrest = len(rest)
    return pl.BlockSpec((None,) + rest, lambda b: (b,) + (0,) * nrest)


def _cparams():
    return pltpu.CompilerParams(dimension_semantics=("parallel",))


# ---------------------------------------------------------------------------
# In-kernel math helpers (traced inside the fused kernels; no extra launches)
# ---------------------------------------------------------------------------

def _ln(x, g, b, eps):
    mu = jnp.mean(x, axis=-1, keepdims=True)
    var = jnp.mean((x - mu) ** 2, axis=-1, keepdims=True)
    return (x - mu) * lax.rsqrt(var + eps) * g + b


def _gelu(y):
    # TODO(synk): tanh-approx GELU; PyTorch nn.GELU / HF "gelu" use exact erf
    # (difference is ~1e-3-scale).
    c = math.sqrt(2.0 / math.pi)
    return 0.5 * y * (1.0 + jnp.tanh(c * (y + 0.044715 * y * y * y)))


def _bf16(x):
    return x.astype(jnp.bfloat16)


def _mm(a, w_ref, b_ref=None):
    """bf16 x bf16 MXU matmul with f32 accumulation (+ optional f32 bias)."""
    out = jnp.dot(_bf16(a), w_ref[...], preferred_element_type=jnp.float32)
    if b_ref is not None:
        out = out + b_ref[...]
    return out


def _mha(q, k, v, wo_ref, bo_ref, add_mask, num_heads, scale):
    """Batched multi-head attention for one batch element, fully in-kernel.

    q: (Sq, D) f32; k, v: (Sk, D) f32; wo_ref: (D, D) bf16; bo_ref: (1, D) f32;
    add_mask: (1, Sk) f32 additive mask or None.

    Heads are split with static lane slices and stacked ONCE onto a leading
    batch axis; scores and context are two batched einsums (2 consolidated MXU
    pushes instead of 2*H tiny ones), the head merge is one lane concat and the
    output projection is a single (Sq, D) @ (D, D) matmul.  Scale is applied
    once to q; the mask is added once to the full (H, Sq, Sk) score tensor.
    """
    D = q.shape[-1]
    dh = D // num_heads
    qc = _bf16(q * scale)
    kc = _bf16(k)
    vc = _bf16(v)

    def split(t):
        return jnp.stack([t[:, h * dh:(h + 1) * dh] for h in range(num_heads)], axis=0)

    qh, kh, vh = split(qc), split(kc), split(vc)                      # (H, S, dh)
    s = jnp.einsum("hqd,hkd->hqk", qh, kh,
                   preferred_element_type=jnp.float32)                # (H, Sq, Sk)
    if add_mask is not None:
        s = s + add_mask[None, :, :]                                  # one broadcast+add
    m = jnp.max(s, axis=-1, keepdims=True)
    p = jnp.exp(s - m)
    # NOTE: approx reciprocal (EUP slot); probabilities sum to 1 +/- ~1e-3.
    p = p * pl.reciprocal(jnp.sum(p, axis=-1, keepdims=True), approx=True)
    ctx = jnp.einsum("hqk,hkd->hqd", _bf16(p), vh,
                     preferred_element_type=jnp.float32)              # (H, Sq, dh)
    ctx2 = jnp.concatenate([ctx[h] for h in range(num_heads)], axis=-1)  # (Sq, D)
    return _mm(ctx2, wo_ref, bo_ref)


# ---------------------------------------------------------------------------
# Fused Pallas kernels
# ---------------------------------------------------------------------------

def _vit_embed_kernel(patch_ref, pw_ref, pb_ref, cls_ref, pos_ref, o_ref):
    # patch-embed matmul + [CLS] concat + positional-embedding add, fused;
    # single full-tile (unmasked) store.
    pe = _mm(patch_ref[...], pw_ref, pb_ref)                          # (Np, D)
    x = jnp.concatenate([cls_ref[0], pe], axis=0)                     # (S, D)
    o_ref[...] = x + pos_ref[0]


def _vit_block_kernel(x_ref, g1_ref, b1_ref, wqkv_ref, bqkv_ref, wo_ref, bo_ref,
                      g2_ref, b2_ref, w1_ref, fb1_ref, w2_ref, fb2_ref,
                      *rest, num_heads, final_ln):
    # Pre-LN ViT block: x + MHA(LN1(x)); x + MLP(LN2(x)); optional fused
    # trailing encoder LayerNorm (last block only).
    if final_ln:
        lnf_g_ref, lnf_b_ref, o_ref = rest
    else:
        (o_ref,) = rest

    x = x_ref[...]                                                    # (S, D) f32
    D = x.shape[-1]
    scale = 1.0 / math.sqrt(D // num_heads)

    h = _ln(x, g1_ref[...], b1_ref[...], 1e-6)
    qkv = _mm(h, wqkv_ref, bqkv_ref)                                  # (S, 3D)
    x = x + _mha(qkv[:, :D], qkv[:, D:2 * D], qkv[:, 2 * D:],
                 wo_ref, bo_ref, None, num_heads, scale)

    h = _ln(x, g2_ref[...], b2_ref[...], 1e-6)
    h = _gelu(_mm(h, w1_ref, fb1_ref))
    x = x + _mm(h, w2_ref, fb2_ref)

    if final_ln:
        x = _ln(x, lnf_g_ref[...], lnf_b_ref[...], 1e-6)
    o_ref[...] = x


def _bert_layer_kernel(x_ref, img_ref, smask_ref,
                       s_wqkv_ref, s_bqkv_ref, s_wo_ref, s_bo_ref, ln1_g_ref, ln1_b_ref,
                       c_wq_ref, c_bq_ref, c_wkv_ref, c_bkv_ref, c_wo_ref, c_bo_ref,
                       lnx_g_ref, lnx_b_ref,
                       wi_ref, bi_ref, wo2_ref, bo2_ref, ln2_g_ref, ln2_b_ref,
                       o_ref, *, num_heads):
    # Post-LN BERT fusion layer: self-attn -> LN -> cross-attn(image) -> LN -> FFN -> LN.
    x = x_ref[...]                                                    # (S, D)
    img = img_ref[...]                                                # (Sv, Dv)
    D = x.shape[-1]
    scale = 1.0 / math.sqrt(D // num_heads)

    # self-attention (fused QKV)
    qkv = _mm(x, s_wqkv_ref, s_bqkv_ref)
    sa = _mha(qkv[:, :D], qkv[:, D:2 * D], qkv[:, 2 * D:],
              s_wo_ref, s_bo_ref, smask_ref[...], num_heads, scale)
    x = _ln(x + sa, ln1_g_ref[...], ln1_b_ref[...], 1e-12)

    # cross-attention to image tokens (fused KV). encoder_attention_mask is
    # all-ones in VL_Transformer_ITM.forward -> additive mask is identically
    # zero and is dropped.
    q = _mm(x, c_wq_ref, c_bq_ref)
    kv = _mm(img, c_wkv_ref, c_bkv_ref)
    ca = _mha(q, kv[:, :D], kv[:, D:], c_wo_ref, c_bo_ref, None, num_heads, scale)
    x = _ln(x + ca, lnx_g_ref[...], lnx_b_ref[...], 1e-12)

    # feed-forward
    h = _gelu(_mm(x, wi_ref, bi_ref))
    h = _mm(h, wo2_ref, bo2_ref)
    o_ref[...] = _ln(x + h, ln2_g_ref[...], ln2_b_ref[...], 1e-12)


# ---------------------------------------------------------------------------
# pallas_call wrappers
# ---------------------------------------------------------------------------

def vit_embed_call(patches, pw, pb, cls_tok, pos):
    B, n_patches, _ = patches.shape
    D = pw.shape[1]
    S = n_patches + 1
    return pl.pallas_call(
        _vit_embed_kernel,
        grid=(B,),
        out_shape=jax.ShapeDtypeStruct((B, S, D), jnp.float32),
        in_specs=[_batch_spec(patches.shape), _full_spec(pw.shape), _full_spec(pb.shape),
                  _full_spec(cls_tok.shape), _full_spec(pos.shape)],
        out_specs=_batch_spec((B, S, D)),
        compiler_params=_cparams(),
    )(patches, pw, pb, cls_tok, pos)


def vit_block_call(x, blk, num_heads, final_ln_params=None):
    B, S, D = x.shape
    a = blk["attn"]
    args = [x, blk["ln1_g"], blk["ln1_b"], a["wqkv"], a["bqkv"], a["wo"], a["bo"],
            blk["ln2_g"], blk["ln2_b"], blk["fc1_w"], blk["fc1_b"],
            blk["fc2_w"], blk["fc2_b"]]
    final_ln = final_ln_params is not None
    if final_ln:
        args += [final_ln_params[0], final_ln_params[1]]
    in_specs = [_batch_spec(x.shape)] + [_full_spec(t.shape) for t in args[1:]]
    return pl.pallas_call(
        partial(_vit_block_kernel, num_heads=num_heads, final_ln=final_ln),
        grid=(B,),
        out_shape=jax.ShapeDtypeStruct((B, S, D), jnp.float32),
        in_specs=in_specs,
        out_specs=_batch_spec((B, S, D)),
        compiler_params=_cparams(),
    )(*args)


def bert_layer_call(x, img, smask, layer, num_heads):
    B, S, D = x.shape
    sa, ca = layer["self_attn"], layer["cross_attn"]
    batched = (x, img, smask)
    weights = (sa["wqkv"], sa["bqkv"], sa["wo"], sa["bo"], layer["ln1_g"], layer["ln1_b"],
               ca["wq"], ca["bq"], ca["wkv"], ca["bkv"], ca["wo"], ca["bo"],
               layer["lnx_g"], layer["lnx_b"],
               layer["inter_w"], layer["inter_b"], layer["out_w"], layer["out_b"],
               layer["ln2_g"], layer["ln2_b"])
    in_specs = ([_batch_spec(t.shape) for t in batched]
                + [_full_spec(t.shape) for t in weights])
    return pl.pallas_call(
        partial(_bert_layer_kernel, num_heads=num_heads),
        grid=(B,),
        out_shape=jax.ShapeDtypeStruct((B, S, D), jnp.float32),
        in_specs=in_specs,
        out_specs=_batch_spec((B, S, D)),
        compiler_params=_cparams(),
    )(*batched, *weights)


# ---------------------------------------------------------------------------
# Model forward (glue in plain JAX, compute in fused Pallas kernels)
# ---------------------------------------------------------------------------

def vit_forward(image, p, cfg):
    """VisionTransformer: patch-embed -> [CLS]+pos -> pre-LN blocks -> LN (fused)."""
    B, C, H, W = image.shape
    ps = cfg["patch_size"]
    nh, nw = H // ps, W // ps
    # (B, C, H, W) -> (B, Np, C*ps*ps) with (C, ph, pw) flattening (== Conv2d weight layout).
    patches = image.reshape(B, C, nh, ps, nw, ps).transpose(0, 2, 4, 1, 3, 5)
    patches = patches.reshape(B, nh * nw, C * ps * ps)
    x = vit_embed_call(patches, p["patch_w"], p["patch_b"], p["cls_token"], p["pos_embed"])
    n_blocks = len(p["blocks"])
    for i, blk in enumerate(p["blocks"]):
        final = (p["ln_g"], p["ln_b"]) if i == n_blocks - 1 else None
        x = vit_block_call(x, blk, cfg["vit_heads"], final_ln_params=final)
    return x


def bert_forward(input_ids, attention_mask, image_embeds, p, cfg):
    """BERT fusion encoder: self-attn + cross-attn (to image) + FFN, post-LN."""
    B, S = input_ids.shape
    pos_ids = jnp.arange(S)
    # Embedding gathers + embedding LayerNorm stay in plain JAX (table lookup;
    # folding the LN here removes a standalone pallas launch).
    emb = (p["word_emb"][input_ids] + p["pos_emb"][pos_ids][None, :, :]
           + p["type_emb"][0][None, None, :])
    x = _ln(emb, p["emb_ln_g"], p["emb_ln_b"], 1e-12)
    self_mask = ((1.0 - attention_mask.astype(jnp.float32)) * -10000.0)[:, None, :]  # (B,1,S)
    for layer in p["layers"]:
        x = bert_layer_call(x, image_embeds, self_mask, layer, cfg["text_heads"])
    return x


def vl_transformer_itm_forward(image, input_ids, attention_mask, params, cfg):
    image_embeds = vit_forward(image, params["visual_encoder"], cfg)          # (B, 1+Np, Dv)
    # image_atts = ones(...) in the reference forward -> cross-attn mask is
    # identically zero and handled by dropping it inside the fusion kernel.
    last_hidden = bert_forward(input_ids, attention_mask, image_embeds,
                               params["text_encoder"], cfg)                   # (B, S, Dt)
    vl_embeddings = last_hidden[:, 0, :]                                      # [:, 0, :]
    # itm_head in plain jnp: a (B,2) output is a 2-lane masked store and the
    # kernel-launch overhead would dwarf the 2x32x2 matmul.
    vl_output = vl_embeddings @ params["itm_w"] + params["itm_b"]
    return vl_output


# ---------------------------------------------------------------------------
# Deterministic parameter init (synthetic; no checkpoint loading)
# ---------------------------------------------------------------------------

def init_params(key, cfg):
    keys = iter(jax.random.split(key, 256))

    def nrm(shape, dtype=jnp.float32, scale=0.02):
        return (jax.random.normal(next(keys), shape, jnp.float32) * scale).astype(dtype)

    def w(shape):
        # MXU matmul weights stored in bf16: halves HBM weight streaming and
        # VMEM footprint; accumulation is still f32 inside the kernels.
        return nrm(shape, jnp.bfloat16)

    def zeros(shape):
        return jnp.zeros(shape, jnp.float32)

    def ones(shape):
        return jnp.ones(shape, jnp.float32)

    def self_attn(d):
        # fused QKV: equivalent to separate wq/wk/wv stacked on the output axis
        return dict(wqkv=w((d, 3 * d)), bqkv=zeros((1, 3 * d)),
                    wo=w((d, d)), bo=zeros((1, d)))

    def cross_attn(dq, dkv):
        return dict(wq=w((dq, dq)), bq=zeros((1, dq)),
                    wkv=w((dkv, 2 * dq)), bkv=zeros((1, 2 * dq)),
                    wo=w((dq, dq)), bo=zeros((1, dq)))

    Dv, Dt = cfg["vision_width"], cfg["text_width"]
    C, ps = cfg["in_chans"], cfg["patch_size"]
    n_patches = (cfg["image_res"] // ps) ** 2

    vit = dict(
        patch_w=w((C * ps * ps, Dv)), patch_b=zeros((1, Dv)),
        cls_token=nrm((1, 1, Dv)), pos_embed=nrm((1, n_patches + 1, Dv)),
        blocks=[dict(ln1_g=ones((1, Dv)), ln1_b=zeros((1, Dv)),
                     attn=self_attn(Dv),
                     ln2_g=ones((1, Dv)), ln2_b=zeros((1, Dv)),
                     fc1_w=w((Dv, cfg["mlp_dim"])), fc1_b=zeros((1, cfg["mlp_dim"])),
                     fc2_w=w((cfg["mlp_dim"], Dv)), fc2_b=zeros((1, Dv)))
                for _ in range(cfg["vit_depth"])],
        ln_g=ones((1, Dv)), ln_b=zeros((1, Dv)),
    )

    bert = dict(
        word_emb=nrm((cfg["vocab_size"], Dt)),
        pos_emb=nrm((cfg["max_pos"], Dt)),
        type_emb=nrm((2, Dt)),
        emb_ln_g=ones((1, Dt)), emb_ln_b=zeros((1, Dt)),
        layers=[dict(self_attn=self_attn(Dt),
                     ln1_g=ones((1, Dt)), ln1_b=zeros((1, Dt)),
                     cross_attn=cross_attn(Dt, Dv),
                     lnx_g=ones((1, Dt)), lnx_b=zeros((1, Dt)),
                     inter_w=w((Dt, cfg["intermediate"])), inter_b=zeros((1, cfg["intermediate"])),
                     out_w=w((cfg["intermediate"], Dt)), out_b=zeros((1, Dt)),
                     ln2_g=ones((1, Dt)), ln2_b=zeros((1, Dt)))
                for _ in range(cfg["text_layers"])],
    )

    return dict(visual_encoder=vit, text_encoder=bert,
                itm_w=nrm((Dt, 2)), itm_b=zeros((1, 2)))


# ---------------------------------------------------------------------------

if __name__ == "__main__":
    cfg = dict(image_res=32, patch_size=16, in_chans=3,
               vision_width=32, vit_depth=2, vit_heads=4, mlp_dim=128,
               text_width=32, text_layers=2, text_heads=4, intermediate=128,
               vocab_size=64, max_pos=16)

    key = jax.random.PRNGKey(0)
    k_param, k_img, k_txt = jax.random.split(key, 3)

    params = init_params(k_param, cfg)

    B, S_txt = 2, 8
    image = jax.random.normal(k_img, (B, 3, cfg["image_res"], cfg["image_res"]), jnp.float32)
    input_ids = jax.random.randint(k_txt, (B, S_txt), 0, cfg["vocab_size"], dtype=jnp.int32)
    attention_mask = jnp.ones((B, S_txt), jnp.int32)

    fwd = jax.jit(lambda im, ids, am, p: vl_transformer_itm_forward(im, ids, am, p, cfg))
    out = fwd(image, input_ids, attention_mask, params)
    jax.block_until_ready(out)

    assert out.shape == (B, 2) and out.dtype == jnp.float32
    print("KERNEL_OK")
</pallas_src>

<mosaic_0001>
module attributes {stable_mosaic.version = 11 : i64} {
  func.func @_vit_embed_kernel(%arg0: i32, %arg1: memref<1x4x768xf32, #tpu.memory_space<vmem>>, %arg2: memref<768x32xbf16, #tpu.memory_space<vmem>>, %arg3: memref<1x32xf32, #tpu.memory_space<vmem>>, %arg4: memref<1x1x32xf32, #tpu.memory_space<vmem>>, %arg5: memref<1x5x32xf32, #tpu.memory_space<vmem>>, %arg6: memref<1x5x32xf32, #tpu.memory_space<vmem>>) attributes {dimension_semantics = [#tpu.dimension_semantics<parallel>], iteration_bounds = array<i64: 2>, scalar_prefetch = 0 : i64, scratch_operands = 0 : i64, tpu.core_type = #tpu.core_type<tc>, window_params = [{transform_indices = @transform_0, window_bounds = array<i64: 1, 4, 768>}, {pipeline_mode = #tpu.pipeline_mode<synchronous>, transform_indices = @transform_1, window_bounds = array<i64: 768, 32>}, {pipeline_mode = #tpu.pipeline_mode<synchronous>, transform_indices = @transform_2, window_bounds = array<i64: 1, 32>}, {pipeline_mode = #tpu.pipeline_mode<synchronous>, transform_indices = @transform_3, window_bounds = array<i64: 1, 1, 32>}, {pipeline_mode = #tpu.pipeline_mode<synchronous>, transform_indices = @transform_4, window_bounds = array<i64: 1, 5, 32>}, {transform_indices = @transform_5, window_bounds = array<i64: 1, 5, 32>}]} {
    %c0 = arith.constant 0 : index
    %c0_0 = arith.constant 0 : index
    %c0_1 = arith.constant 0 : index
    %0 = vector.load %arg1[%c0, %c0_0, %c0_1] : memref<1x4x768xf32, #tpu.memory_space<vmem>>, vector<1x4x768xf32>
    %1 = vector.shape_cast %0 : vector<1x4x768xf32> to vector<4x768xf32>
    %2 = arith.truncf %1 : vector<4x768xf32> to vector<4x768xbf16>
    %c0_2 = arith.constant 0 : index
    %c0_3 = arith.constant 0 : index
    %3 = vector.load %arg2[%c0_2, %c0_3] : memref<768x32xbf16, #tpu.memory_space<vmem>>, vector<768x32xbf16>
    %cst = arith.constant dense<0.000000e+00> : vector<4x32xf32>
    %4 = tpu.matmul %2, %3, %cst {dimension_numbers = #tpu.dot_dimension_numbers<[1], [0], [0], [1], [0, 0, 1, 1], [], []>} : vector<4x768xbf16>, vector<768x32xbf16>, vector<4x32xf32> -> vector<4x32xf32>
    %c0_4 = arith.constant 0 : index
    %c0_5 = arith.constant 0 : index
    %5 = vector.load %arg3[%c0_4, %c0_5] : memref<1x32xf32, #tpu.memory_space<vmem>>, vector<1x32xf32>
    %6 = vector.broadcast %5 : vector<1x32xf32> to vector<4x32xf32>
    %7 = arith.addf %4, %6 : vector<4x32xf32>
    %c0_6 = arith.constant 0 : index
    %c0_7 = arith.constant 0 : index
    %c0_8 = arith.constant 0 : index
    %8 = vector.load %arg4[%c0_6, %c0_7, %c0_8] : memref<1x1x32xf32, #tpu.memory_space<vmem>>, vector<1x1x32xf32>
    %9 = vector.shape_cast %8 : vector<1x1x32xf32> to vector<1x32xf32>
    %10 = tpu.concatenate %9, %7 in 0 : vector<1x32xf32>, vector<4x32xf32> -> vector<5x32xf32>
    %c0_9 = arith.constant 0 : index
    %c0_10 = arith.constant 0 : index
    %c0_11 = arith.constant 0 : index
    %11 = vector.load %arg5[%c0_9, %c0_10, %c0_11] : memref<1x5x32xf32, #tpu.memory_space<vmem>>, vector<1x5x32xf32>
    %12 = vector.shape_cast %11 : vector<1x5x32xf32> to vector<5x32xf32>
    %13 = arith.addf %10, %12 : vector<5x32xf32>
    %c0_12 = arith.constant 0 : index
    %c0_13 = arith.constant 0 : index
    %c0_14 = arith.constant 0 : index
    %14 = vector.load %arg6[%c0_12, %c0_13, %c0_14] : memref<1x5x32xf32, #tpu.memory_space<vmem>>, vector<1x5x32xf32>
    %15 = vector.shape_cast %14 : vector<1x5x32xf32> to vector<5x32xf32>
    %16 = vector.shape_cast %13 : vector<5x32xf32> to vector<1x5x32xf32>
    tpu.vector_store %arg6[%c0_12, %c0_13, %c0_14], %16 {strides = array<i32>} : memref<1x5x32xf32, #tpu.memory_space<vmem>>, vector<1x5x32xf32>,
    return
  }
  func.func @transform_0(%arg0: i32) -> (i32, i32, i32) {
    %c0_i32 = arith.constant 0 : i32
    %c0_i32_0 = arith.constant 0 : i32
    %c0_i32_1 = arith.constant 0 : i32
    return %arg0, %c0_i32, %c0_i32_0 : i32, i32, i32
  }
  func.func @transform_1(%arg0: i32) -> (i32, i32) {
    %c0_i32 = arith.constant 0 : i32
    %c0_i32_0 = arith.constant 0 : i32
    %c0_i32_1 = arith.constant 0 : i32
    return %c0_i32, %c0_i32_0 : i32, i32
  }
  func.func @transform_2(%arg0: i32) -> (i32, i32) {
    %c0_i32 = arith.constant 0 : i32
    %c0_i32_0 = arith.constant 0 : i32
    %c0_i32_1 = arith.constant 0 : i32
    return %c0_i32, %c0_i32_0 : i32, i32
  }
  func.func @transform_3(%arg0: i32) -> (i32, i32, i32) {
    %c0_i32 = arith.constant 0 : i32
    %c0_i32_0 = arith.constant 0 : i32
    %c0_i32_1 = arith.constant 0 : i32
    %c0_i32_2 = arith.constant 0 : i32
    return %c0_i32, %c0_i32_0, %c0_i32_1 : i32, i32, i32
  }
  func.func @transform_4(%arg0: i32) -> (i32, i32, i32) {
    %c0_i32 = arith.constant 0 : i32
    %c0_i32_0 = arith.constant 0 : i32
    %c0_i32_1 = arith.constant 0 : i32
    %c0_i32_2 = arith.constant 0 : i32
    return %c0_i32, %c0_i32_0, %c0_i32_1 : i32, i32, i32
  }
  func.func @transform_5(%arg0: i32) -> (i32, i32, i32) {
    %c0_i32 = arith.constant 0 : i32
    %c0_i32_0 = arith.constant 0 : i32
    %c0_i32_1 = arith.constant 0 : i32
    return %arg0, %c0_i32, %c0_i32_0 : i32, i32, i32
  }
}

module attributes {stable_mosaic.version = 11 : i64} {
  func.func @_vit_block_kernel(%arg0: i32, %arg1: memref<1x5x32xf32, #tpu.memory_space<vmem>>, %arg2: memref<1x32xf32, #tpu.memory_space<vmem>>, %arg3: memref<1x32xf32, #tpu.memory_space<vmem>>, %arg4: memref<32x96xbf16, #tpu.memory_space<vmem>>, %arg5: memref<1x96xf32, #tpu.memory_space<vmem>>, %arg6: memref<32x32xbf16, #tpu.memory_space<vmem>>, %arg7: memref<1x32xf32, #tpu.memory_space<vmem>>, %arg8: memref<1x32xf32, #tpu.memory_space<vmem>>, %arg9: memref<1x32xf32, #tpu.memory_space<vmem>>, %arg10: memref<32x128xbf16, #tpu.memory_space<vmem>>, %arg11: memref<1x128xf32, #tpu.memory_space<vmem>>, %arg12: memref<128x32xbf16, #tpu.memory_space<vmem>>, %arg13: memref<1x32xf32, #tpu.memory_space<vmem>>, %arg14: memref<1x5x32xf32, #tpu.memory_space<vmem>>) attributes {dimension_semantics = [#tpu.dimension_semantics<parallel>], iteration_bounds = array<i64: 2>, scalar_prefetch = 0 : i64, scratch_operands = 0 : i64, tpu.core_type = #tpu.core_type<tc>, window_params = [{transform_indices = @transform_0, window_bounds = array<i64: 1, 5, 32>}, {pipeline_mode = #tpu.pipeline_mode<synchronous>, transform_indices = @transform_1, window_bounds = array<i64: 1, 32>}, {pipeline_mode = #tpu.pipeline_mode<synchronous>, transform_indices = @transform_2, window_bounds = array<i64: 1, 32>}, {pipeline_mode = #tpu.pipeline_mode<synchronous>, transform_indices = @transform_3, window_bounds = array<i64: 32, 96>}, {pipeline_mode = #tpu.pipeline_mode<synchronous>, transform_indices = @transform_4, window_bounds = array<i64: 1, 96>}, {pipeline_mode = #tpu.pipeline_mode<synchronous>, transform_indices = @transform_5, window_bounds = array<i64: 32, 32>}, {pipeline_mode = #tpu.pipeline_mode<synchronous>, transform_indices = @transform_6, window_bounds = array<i64: 1, 32>}, {pipeline_mode = #tpu.pipeline_mode<synchronous>, transform_indices = @transform_7, window_bounds = array<i64: 1, 32>}, {pipeline_mode = #tpu.pipeline_mode<synchronous>, transform_indices = @transform_8, window_bounds = array<i64: 1, 32>}, {pipeline_mode = #tpu.pipeline_mode<synchronous>, transform_indices = @transform_9, window_bounds = array<i64: 32, 128>}, {pipeline_mode = #tpu.pipeline_mode<synchronous>, transform_indices = @transform_10, window_bounds = array<i64: 1, 128>}, {pipeline_mode = #tpu.pipeline_mode<synchronous>, transform_indices = @transform_11, window_bounds = array<i64: 128, 32>}, {pipeline_mode = #tpu.pipeline_mode<synchronous>, transform_indices = @transform_12, window_bounds = array<i64: 1, 32>}, {transform_indices = @transform_13, window_bounds = array<i64: 1, 5, 32>}]} {
    %c0 = arith.constant 0 : index
    %c0_0 = arith.constant 0 : index
    %c0_1 = arith.constant 0 : index
    %0 = vector.load %arg1[%c0, %c0_0, %c0_1] : memref<1x5x32xf32, #tpu.memory_space<vmem>>, vector<1x5x32xf32>
    %1 = vector.shape_cast %0 : vector<1x5x32xf32> to vector<5x32xf32>
    %c0_2 = arith.constant 0 : index
    %c0_3 = arith.constant 0 : index
    %2 = vector.load %arg2[%c0_2, %c0_3] : memref<1x32xf32, #tpu.memory_space<vmem>>, vector<1x32xf32>
    %c0_4 = arith.constant 0 : index
    %c0_5 = arith.constant 0 : index
    %3 = vector.load %arg3[%c0_4, %c0_5] : memref<1x32xf32, #tpu.memory_space<vmem>>, vector<1x32xf32>
    %cst = arith.constant dense<0.000000e+00> : vector<5xf32>
    %4 = vector.multi_reduction <add>, %1, %cst [1] : vector<5x32xf32> to vector<5xf32>
    %5 = vector.shape_cast %4 : vector<5xf32> to vector<5x1xf32>
    %cst_6 = arith.constant 3.200000e+01 : f32
    %6 = vector.broadcast %cst_6 : f32 to vector<5x1xf32>
    %7 = arith.divf %5, %6 : vector<5x1xf32>
    %8 = vector.broadcast %7 : vector<5x1xf32> to vector<5x32xf32>
    %9 = arith.subf %1, %8 : vector<5x32xf32>
    %10 = arith.mulf %9, %9 : vector<5x32xf32>
    %cst_7 = arith.constant dense<0.000000e+00> : vector<5xf32>
    %11 = vector.multi_reduction <add>, %10, %cst_7 [1] : vector<5x32xf32> to vector<5xf32>
    %12 = vector.shape_cast %11 : vector<5xf32> to vector<5x1xf32>
    %cst_8 = arith.constant 3.200000e+01 : f32
    %13 = vector.broadcast %cst_8 : f32 to vector<5x1xf32>
    %14 = arith.divf %12, %13 : vector<5x1xf32>
    %15 = vector.broadcast %7 : vector<5x1xf32> to vector<5x32xf32>
    %16 = arith.subf %1, %15 : vector<5x32xf32>
    %cst_9 = arith.constant 9.99999997E-7 : f32
    %17 = vector.broadcast %cst_9 : f32 to vector<5x1xf32>
    %18 = arith.addf %14, %17 : vector<5x1xf32>
    %19 = math.rsqrt %18 : vector<5x1xf32>
    %20 = vector.broadcast %19 : vector<5x1xf32> to vector<5x32xf32>
    %21 = arith.mulf %16, %20 : vector<5x32xf32>
    %22 = vector.broadcast %2 : vector<1x32xf32> to vector<5x32xf32>
    %23 = arith.mulf %21, %22 : vector<5x32xf32>
    %24 = vector.broadcast %3 : vector<1x32xf32> to vector<5x32xf32>
    %25 = arith.addf %23, %24 : vector<5x32xf32>
    %26 = arith.truncf %25 : vector<5x32xf32> to vector<5x32xbf16>
    %c0_10 = arith.constant 0 : index
    %c0_11 = arith.constant 0 : index
    %27 = vector.load %arg4[%c0_10, %c0_11] : memref<32x96xbf16, #tpu.memory_space<vmem>>, vector<32x96xbf16>
    %cst_12 = arith.constant dense<0.000000e+00> : vector<5x96xf32>
    %28 = tpu.matmul %26, %27, %cst_12 {dimension_numbers = #tpu.dot_dimension_numbers<[1], [0], [0], [1], [0, 0, 1, 1], [], []>} : vector<5x32xbf16>, vector<32x96xbf16>, vector<5x96xf32> -> vector<5x96xf32>
    %c0_13 = arith.constant 0 : index
    %c0_14 = arith.constant 0 : index
    %29 = vector.load %arg5[%c0_13, %c0_14] : memref<1x96xf32, #tpu.memory_space<vmem>>, vector<1x96xf32>
    %30 = vector.broadcast %29 : vector<1x96xf32> to vector<5x96xf32>
    %31 = arith.addf %28, %30 : vector<5x96xf32>
    %32 = vector.extract_strided_slice %31 {offsets = [0, 0], sizes = [5, 32], strides = [1, 1]} : vector<5x96xf32> to vector<5x32xf32>
    %33 = vector.extract_strided_slice %31 {offsets = [0, 32], sizes = [5, 32], strides = [1, 1]} : vector<5x96xf32> to vector<5x32xf32>
    %34 = vector.extract_strided_slice %31 {offsets = [0, 64], sizes = [5, 32], strides = [1, 1]} : vector<5x96xf32> to vector<5x32xf32>
    %cst_15 = arith.constant 0.353553385 : f32
    %35 = vector.broadcast %cst_15 : f32 to vector<5x32xf32>
    %36 = arith.mulf %32, %35 : vector<5x32xf32>
    %37 = arith.truncf %36 : vector<5x32xf32> to vector<5x32xbf16>
    %38 = arith.truncf %33 : vector<5x32xf32> to vector<5x32xbf16>
    %39 = arith.truncf %34 : vector<5x32xf32> to vector<5x32xbf16>
    %40 = vector.extract_strided_slice %37 {offsets = [0, 0], sizes = [5, 8], strides = [1, 1]} : vector<5x32xbf16> to vector<5x8xbf16>
    %41 = vector.extract_strided_slice %37 {offsets = [0, 8], sizes = [5, 8], strides = [1, 1]} : vector<5x32xbf16> to vector<5x8xbf16>
    %42 = vector.extract_strided_slice %37 {offsets = [0, 16], sizes = [5, 8], strides = [1, 1]} : vector<5x32xbf16> to vector<5x8xbf16>
    %43 = vector.extract_strided_slice %37 {offsets = [0, 24], sizes = [5, 8], strides = [1, 1]} : vector<5x32xbf16> to vector<5x8xbf16>
    %44 = vector.shape_cast %40 : vector<5x8xbf16> to vector<1x5x8xbf16>
    %45 = vector.shape_cast %41 : vector<5x8xbf16> to vector<1x5x8xbf16>
    %46 = vector.shape_cast %42 : vector<5x8xbf16> to vector<1x5x8xbf16>
    %47 = vector.shape_cast %43 : vector<5x8xbf16> to vector<1x5x8xbf16>
    %48 = tpu.concatenate %44, %45, %46, %47 in 0 : vector<1x5x8xbf16>, vector<1x5x8xbf16>, vector<1x5x8xbf16>, vector<1x5x8xbf16> -> vector<4x5x8xbf16>
    %49 = vector.extract_strided_slice %38 {offsets = [0, 0], sizes = [5, 8], strides = [1, 1]} : vector<5x32xbf16> to vector<5x8xbf16>
    %50 = vector.extract_strided_slice %38 {offsets = [0, 8], sizes = [5, 8], strides = [1, 1]} : vector<5x32xbf16> to vector<5x8xbf16>
    %51 = vector.extract_strided_slice %38 {offsets = [0, 16], sizes = [5, 8], strides = [1, 1]} : vector<5x32xbf16> to vector<5x8xbf16>
    %52 = vector.extract_strided_slice %38 {offsets = [0, 24], sizes = [5, 8], strides = [1, 1]} : vector<5x32xbf16> to vector<5x8xbf16>
    %53 = vector.shape_cast %49 : vector<5x8xbf16> to vector<1x5x8xbf16>
    %54 = vector.shape_cast %50 : vector<5x8xbf16> to vector<1x5x8xbf16>
    %55 = vector.shape_cast %51 : vector<5x8xbf16> to vector<1x5x8xbf16>
    %56 = vector.shape_cast %52 : vector<5x8xbf16> to vector<1x5x8xbf16>
    %57 = tpu.concatenate %53, %54, %55, %56 in 0 : vector<1x5x8xbf16>, vector<1x5x8xbf16>, vector<1x5x8xbf16>, vector<1x5x8xbf16> -> vector<4x5x8xbf16>
    %58 = vector.extract_strided_slice %39 {offsets = [0, 0], sizes = [5, 8], strides = [1, 1]} : vector<5x32xbf16> to vector<5x8xbf16>
    %59 = vector.extract_strided_slice %39 {offsets = [0, 8], sizes = [5, 8], strides = [1, 1]} : vector<5x32xbf16> to vector<5x8xbf16>
    %60 = vector.extract_strided_slice %39 {offsets = [0, 16], sizes = [5, 8], strides = [1, 1]} : vector<5x32xbf16> to vector<5x8xbf16>
    %61 = vector.extract_strided_slice %39 {offsets = [0, 24], sizes = [5, 8], strides = [1, 1]} : vector<5x32xbf16> to vector<5x8xbf16>
    %62 = vector.shape_cast %58 : vector<5x8xbf16> to vector<1x5x8xbf16>
    %63 = vector.shape_cast %59 : vector<5x8xbf16> to vector<1x5x8xbf16>
    %64 = vector.shape_cast %60 : vector<5x8xbf16> to vector<1x5x8xbf16>
    %65 = vector.shape_cast %61 : vector<5x8xbf16> to vector<1x5x8xbf16>
    %66 = tpu.concatenate %62, %63, %64, %65 in 0 : vector<1x5x8xbf16>, vector<1x5x8xbf16>, vector<1x5x8xbf16>, vector<1x5x8xbf16> -> vector<4x5x8xbf16>
    "tpu.trace_start"() <{level = 10 : i32, message = "hqd,hkd->hqk"}> : () -> ()
    %cst_16 = arith.constant dense<0.000000e+00> : vector<4x5x5xf32>
    %67 = tpu.matmul %48, %57, %cst_16 {dimension_numbers = #tpu.dot_dimension_numbers<[2], [2], [1], [1], [0, 0, 0, 1, 1, 1], [0], [0]>} : vector<4x5x8xbf16>, vector<4x5x8xbf16>, vector<4x5x5xf32> -> vector<4x5x5xf32>
    "tpu.trace_stop"() : () -> ()
    %cst_17 = arith.constant dense<0xFF800000> : vector<4x5xf32>
    %68 = vector.multi_reduction <maximumf>, %67, %cst_17 [2] : vector<4x5x5xf32> to vector<4x5xf32>
    %69 = vector.shape_cast %68 : vector<4x5xf32> to vector<4x5x1xf32>
    %70 = vector.broadcast %69 : vector<4x5x1xf32> to vector<4x5x5xf32>
    %71 = arith.subf %67, %70 : vector<4x5x5xf32>
    %72 = math.exp %71 : vector<4x5x5xf32>
    %cst_18 = arith.constant dense<0.000000e+00> : vector<4x5xf32>
    %73 = vector.multi_reduction <add>, %72, %cst_18 [2] : vector<4x5x5xf32> to vector<4x5xf32>
    %74 = vector.shape_cast %73 : vector<4x5xf32> to vector<4x5x1xf32>
    %75 = tpu.reciprocal %74 {approx = true} : vector<4x5x1xf32> -> vector<4x5x1xf32>
    %76 = vector.broadcast %75 : vector<4x5x1xf32> to vector<4x5x5xf32>
    %77 = arith.mulf %72, %76 : vector<4x5x5xf32>
    %78 = arith.truncf %77 : vector<4x5x5xf32> to vector<4x5x5xbf16>
    "tpu.trace_start"() <{level = 10 : i32, message = "hqk,hkd->hqd"}> : () -> ()
    %cst_19 = arith.constant dense<0.000000e+00> : vector<4x5x8xf32>
    %79 = tpu.matmul %78, %66, %cst_19 {dimension_numbers = #tpu.dot_dimension_numbers<[2], [1], [1], [2], [0, 0, 0, 1, 1, 2], [0], [0]>} : vector<4x5x5xbf16>, vector<4x5x8xbf16>, vector<4x5x8xf32> -> vector<4x5x8xf32>
    "tpu.trace_stop"() : () -> ()
    %80 = vector.extract_strided_slice %79 {offsets = [0, 0, 0], sizes = [1, 5, 8], strides = [1, 1, 1]} : vector<4x5x8xf32> to vector<1x5x8xf32>
    %81 = vector.shape_cast %80 : vector<1x5x8xf32> to vector<5x8xf32>
    %82 = vector.extract_strided_slice %79 {offsets = [1, 0, 0], sizes = [1, 5, 8], strides = [1, 1, 1]} : vector<4x5x8xf32> to vector<1x5x8xf32>
    %83 = vector.shape_cast %82 : vector<1x5x8xf32> to vector<5x8xf32>
    %84 = vector.extract_strided_slice %79 {offsets = [2, 0, 0], sizes = [1, 5, 8], strides = [1, 1, 1]} : vector<4x5x8xf32> to vector<1x5x8xf32>
    %85 = vector.shape_cast %84 : vector<1x5x8xf32> to vector<5x8xf32>
    %86 = vector.extract_strided_slice %79 {offsets = [3, 0, 0], sizes = [1, 5, 8], strides = [1, 1, 1]} : vector<4x5x8xf32> to vector<1x5x8xf32>
    %87 = vector.shape_cast %86 : vector<1x5x8xf32> to vector<5x8xf32>
    %88 = tpu.concatenate %81, %83, %85, %87 in 1 : vector<5x8xf32>, vector<5x8xf32>, vector<5x8xf32>, vector<5x8xf32> -> vector<5x32xf32>
    %89 = arith.truncf %88 : vector<5x32xf32> to vector<5x32xbf16>
    %c0_20 = arith.constant 0 : index
    %c0_21 = arith.constant 0 : index
    %90 = vector.load %arg6[%c0_20, %c0_21] : memref<32x32xbf16, #tpu.memory_space<vmem>>, vector<32x32xbf16>
    %cst_22 = arith.constant dense<0.000000e+00> : vector<5x32xf32>
    %91 = tpu.matmul %89, %90, %cst_22 {dimension_numbers = #tpu.dot_dimension_numbers<[1], [0], [0], [1], [0, 0, 1, 1], [], []>} : vector<5x32xbf16>, vector<32x32xbf16>, vector<5x32xf32> -> vector<5x32xf32>
    %c0_23 = arith.constant 0 : index
    %c0_24 = arith.constant 0 : index
    %92 = vector.load %arg7[%c0_23, %c0_24] : memref<1x32xf32, #tpu.memory_space<vmem>>, vector<1x32xf32>
    %93 = vector.broadcast %92 : vector<1x32xf32> to vector<5x32xf32>
    %94 = arith.addf %91, %93 : vector<5x32xf32>
    %95 = arith.addf %1, %94 : vector<5x32xf32>
    %c0_25 = arith.constant 0 : index
    %c0_26 = arith.constant 0 : index
    %96 = vector.load %arg8[%c0_25, %c0_26] : memref<1x32xf32, #tpu.memory_space<vmem>>, vector<1x32xf32>
    %c0_27 = arith.constant 0 : index
    %c0_28 = arith.constant 0 : index
    %97 = vector.load %arg9[%c0_27, %c0_28] : memref<1x32xf32, #tpu.memory_space<vmem>>, vector<1x32xf32>
    %cst_29 = arith.constant dense<0.000000e+00> : vector<5xf32>
    %98 = vector.multi_reduction <add>, %95, %cst_29 [1] : vector<5x32xf32> to vector<5xf32>
    %99 = vector.shape_cast %98 : vector<5xf32> to vector<5x1xf32>
    %cst_30 = arith.constant 3.200000e+01 : f32
    %100 = vector.broadcast %cst_30 : f32 to vector<5x1xf32>
    %101 = arith.divf %99, %100 : vector<5x1xf32>
    %102 = vector.broadcast %101 : vector<5x1xf32> to vector<5x32xf32>
    %103 = arith.subf %95, %102 : vector<5x32xf32>
    %104 = arith.mulf %103, %103 : vector<5x32xf32>
    %cst_31 = arith.constant dense<0.000000e+00> : vector<5xf32>
    %105 = vector.multi_reduction <add>, %104, %cst_31 [1] : vector<5x32xf32> to vector<5xf32>
    %106 = vector.shape_cast %105 : vector<5xf32> to vector<5x1xf32>
    %cst_32 = arith.constant 3.200000e+01 : f32
    %107 = vector.broadcast %cst_32 : f32 to vector<5x1xf32>
    %108 = arith.divf %106, %107 : vector<5x1xf32>
    %109 = vector.broadcast %101 : vector<5x1xf32> to vector<5x32xf32>
    %110 = arith.subf %95, %109 : vector<5x32xf32>
    %cst_33 = arith.constant 9.99999997E-7 : f32
    %111 = vector.broadcast %cst_33 : f32 to vector<5x1xf32>
    %112 = arith.addf %108, %111 : vector<5x1xf32>
    %113 = math.rsqrt %112 : vector<5x1xf32>
    %114 = vector.broadcast %113 : vector<5x1xf32> to vector<5x32xf32>
    %115 = arith.mulf %110, %114 : vector<5x32xf32>
    %116 = vector.broadcast %96 : vector<1x32xf32> to vector<5x32xf32>
    %117 = arith.mulf %115, %116 : vector<5x32xf32>
    %118 = vector.broadcast %97 : vector<1x32xf32> to vector<5x32xf32>
    %119 = arith.addf %117, %118 : vector<5x32xf32>
    %120 = arith.truncf %119 : vector<5x32xf32> to vector<5x32xbf16>
    %c0_34 = arith.constant 0 : index
    %c0_35 = arith.constant 0 : index
    %121 = vector.load %arg10[%c0_34, %c0_35] : memref<32x128xbf16, #tpu.memory_space<vmem>>, vector<32x128xbf16>
    %cst_36 = arith.constant dense<0.000000e+00> : vector<5x128xf32>
    %122 = tpu.matmul %120, %121, %cst_36 {dimension_numbers = #tpu.dot_dimension_numbers<[1], [0], [0], [1], [0, 0, 1, 1], [], []>} : vector<5x32xbf16>, vector<32x128xbf16>, vector<5x128xf32> -> vector<5x128xf32>
    %c0_37 = arith.constant 0 : index
    %c0_38 = arith.constant 0 : index
    %123 = vector.load %arg11[%c0_37, %c0_38] : memref<1x128xf32, #tpu.memory_space<vmem>>, vector<1x128xf32>
    %124 = vector.broadcast %123 : vector<1x128xf32> to vector<5x128xf32>
    %125 = arith.addf %122, %124 : vector<5x128xf32>
    %cst_39 = arith.constant 5.000000e-01 : f32
    %126 = vector.broadcast %cst_39 : f32 to vector<5x128xf32>
    %127 = arith.mulf %126, %125 : vector<5x128xf32>
    %cst_40 = arith.constant 4.471500e-02 : f32
    %128 = vector.broadcast %cst_40 : f32 to vector<5x128xf32>
    %129 = arith.mulf %128, %125 : vector<5x128xf32>
    %130 = arith.mulf %129, %125 : vector<5x128xf32>
    %131 = arith.mulf %130, %125 : vector<5x128xf32>
    %132 = arith.addf %125, %131 : vector<5x128xf32>
    %cst_41 = arith.constant 0.797884583 : f32
    %133 = vector.broadcast %cst_41 : f32 to vector<5x128xf32>
    %134 = arith.mulf %133, %132 : vector<5x128xf32>
    %135 = math.tanh %134 : vector<5x128xf32>
    %cst_42 = arith.constant 1.000000e+00 : f32
    %136 = vector.broadcast %cst_42 : f32 to vector<5x128xf32>
    %137 = arith.addf %136, %135 : vector<5x128xf32>
    %138 = arith.mulf %127, %137 : vector<5x128xf32>
    %139 = arith.truncf %138 : vector<5x128xf32> to vector<5x128xbf16>
    %c0_43 = arith.constant 0 : index
    %c0_44 = arith.constant 0 : index
    %140 = vector.load %arg12[%c0_43, %c0_44] : memref<128x32xbf16, #tpu.memory_space<vmem>>, vector<128x32xbf16>
    %cst_45 = arith.constant dense<0.000000e+00> : vector<5x32xf32>
    %141 = tpu.matmul %139, %140, %cst_45 {dimension_numbers = #tpu.dot_dimension_numbers<[1], [0], [0], [1], [0, 0, 1, 1], [], []>} : vector<5x128xbf16>, vector<128x32xbf16>, vector<5x32xf32> -> vector<5x32xf32>
    %c0_46 = arith.constant 0 : index
    %c0_47 = arith.constant 0 : index
    %142 = vector.load %arg13[%c0_46, %c0_47] : memref<1x32xf32, #tpu.memory_space<vmem>>, vector<1x32xf32>
    %143 = vector.broadcast %142 : vector<1x32xf32> to vector<5x32xf32>
    %144 = arith.addf %141, %143 : vector<5x32xf32>
    %145 = arith.addf %95, %144 : vector<5x32xf32>
    %c0_48 = arith.constant 0 : index
    %c0_49 = arith.constant 0 : index
    %c0_50 = arith.constant 0 : index
    %146 = vector.load %arg14[%c0_48, %c0_49, %c0_50] : memref<1x5x32xf32, #tpu.memory_space<vmem>>, vector<1x5x32xf32>
    %147 = vector.shape_cast %146 : vector<1x5x32xf32> to vector<5x32xf32>
    %148 = vector.shape_cast %145 : vector<5x32xf32> to vector<1x5x32xf32>
    tpu.vector_store %arg14[%c0_48, %c0_49, %c0_50], %148 {strides = array<i32>} : memref<1x5x32xf32, #tpu.memory_space<vmem>>, vector<1x5x32xf32>,
    return
  }
  func.func @transform_0(%arg0: i32) -> (i32, i32, i32) {
    %c0_i32 = arith.constant 0 : i32
    %c0_i32_0 = arith.constant 0 : i32
    %c0_i32_1 = arith.constant 0 : i32
    return %arg0, %c0_i32, %c0_i32_0 : i32, i32, i32
  }
  func.func @transform_1(%arg0: i32) -> (i32, i32) {
    %c0_i32 = arith.constant 0 : i32
    %c0_i32_0 = arith.constant 0 : i32
    %c0_i32_1 = arith.constant 0 : i32
    return %c0_i32, %c0_i32_0 : i32, i32
  }
  func.func @transform_2(%arg0: i32) -> (i32, i32) {
    %c0_i32 = arith.constant 0 : i32
    %c0_i32_0 = arith.constant 0 : i32
    %c0_i32_1 = arith.constant 0 : i32
    return %c0_i32, %c0_i32_0 : i32, i32
  }
  func.func @transform_3(%arg0: i32) -> (i32, i32) {
    %c0_i32 = arith.constant 0 : i32
    %c0_i32_0 = arith.constant 0 : i32
    %c0_i32_1 = arith.constant 0 : i32
    return %c0_i32, %c0_i32_0 : i32, i32
  }
  func.func @transform_4(%arg0: i32) -> (i32, i32) {
    %c0_i32 = arith.constant 0 : i32
    %c0_i32_0 = arith.constant 0 : i32
    %c0_i32_1 = arith.constant 0 : i32
    return %c0_i32, %c0_i32_0 : i32, i32
  }
  func.func @transform_5(%arg0: i32) -> (i32, i32) {
    %c0_i32 = arith.constant 0 : i32
    %c0_i32_0 = arith.constant 0 : i32
    %c0_i32_1 = arith.constant 0 : i32
    return %c0_i32, %c0_i32_0 : i32, i32
  }
  func.func @transform_6(%arg0: i32) -> (i32, i32) {
    %c0_i32 = arith.constant 0 : i32
    %c0_i32_0 = arith.constant 0 : i32
    %c0_i32_1 = arith.constant 0 : i32
    return %c0_i32, %c0_i32_0 : i32, i32
  }
  func.func @transform_7(%arg0: i32) -> (i32, i32) {
    %c0_i32 = arith.constant 0 : i32
    %c0_i32_0 = arith.constant 0 : i32
    %c0_i32_1 = arith.constant 0 : i32
    return %c0_i32, %c0_i32_0 : i32, i32
  }
  func.func @transform_8(%arg0: i32) -> (i32, i32) {
    %c0_i32 = arith.constant 0 : i32
    %c0_i32_0 = arith.constant 0 : i32
    %c0_i32_1 = arith.constant 0 : i32
    return %c0_i32, %c0_i32_0 : i32, i32
  }
  func.func @transform_9(%arg0: i32) -> (i32, i32) {
    %c0_i32 = arith.constant 0 : i32
    %c0_i32_0 = arith.constant 0 : i32
    %c0_i32_1 = arith.constant 0 : i32
    return %c0_i32, %c0_i32_0 : i32, i32
  }
  func.func @transform_10(%arg0: i32) -> (i32, i32) {
    %c0_i32 = arith.constant 0 : i32
    %c0_i32_0 = arith.constant 0 : i32
    %c0_i32_1 = arith.constant 0 : i32
    return %c0_i32, %c0_i32_0 : i32, i32
  }
  func.func @transform_11(%arg0: i32) -> (i32, i32) {
    %c0_i32 = arith.constant 0 : i32
    %c0_i32_0 = arith.constant 0 : i32
    %c0_i32_1 = arith.constant 0 : i32
    return %c0_i32, %c0_i32_0 : i32, i32
  }
  func.func @transform_12(%arg0: i32) -> (i32, i32) {
    %c0_i32 = arith.constant 0 : i32
    %c0_i32_0 = arith.constant 0 : i32
    %c0_i32_1 = arith.constant 0 : i32
    return %c0_i32, %c0_i32_0 : i32, i32
  }
  func.func @transform_13(%arg0: i32) -> (i32, i32, i32) {
    %c0_i32 = arith.constant 0 : i32
    %c0_i32_0 = arith.constant 0 : i32
    %c0_i32_1 = arith.constant 0 : i32
    return %arg0, %c0_i32, %c0_i32_0 : i32, i32, i32
  }
}

module attributes {stable_mosaic.version = 11 : i64} {
  func.func @_vit_block_kernel(%arg0: i32, %arg1: memref<1x5x32xf32, #tpu.memory_space<vmem>>, %arg2: memref<1x32xf32, #tpu.memory_space<vmem>>, %arg3: memref<1x32xf32, #tpu.memory_space<vmem>>, %arg4: memref<32x96xbf16, #tpu.memory_space<vmem>>, %arg5: memref<1x96xf32, #tpu.memory_space<vmem>>, %arg6: memref<32x32xbf16, #tpu.memory_space<vmem>>, %arg7: memref<1x32xf32, #tpu.memory_space<vmem>>, %arg8: memref<1x32xf32, #tpu.memory_space<vmem>>, %arg9: memref<1x32xf32, #tpu.memory_space<vmem>>, %arg10: memref<32x128xbf16, #tpu.memory_space<vmem>>, %arg11: memref<1x128xf32, #tpu.memory_space<vmem>>, %arg12: memref<128x32xbf16, #tpu.memory_space<vmem>>, %arg13: memref<1x32xf32, #tpu.memory_space<vmem>>, %arg14: memref<1x32xf32, #tpu.memory_space<vmem>>, %arg15: memref<1x32xf32, #tpu.memory_space<vmem>>, %arg16: memref<1x5x32xf32, #tpu.memory_space<vmem>>) attributes {dimension_semantics = [#tpu.dimension_semantics<parallel>], iteration_bounds = array<i64: 2>, scalar_prefetch = 0 : i64, scratch_operands = 0 : i64, tpu.core_type = #tpu.core_type<tc>, window_params = [{transform_indices = @transform_0, window_bounds = array<i64: 1, 5, 32>}, {pipeline_mode = #tpu.pipeline_mode<synchronous>, transform_indices = @transform_1, window_bounds = array<i64: 1, 32>}, {pipeline_mode = #tpu.pipeline_mode<synchronous>, transform_indices = @transform_2, window_bounds = array<i64: 1, 32>}, {pipeline_mode = #tpu.pipeline_mode<synchronous>, transform_indices = @transform_3, window_bounds = array<i64: 32, 96>}, {pipeline_mode = #tpu.pipeline_mode<synchronous>, transform_indices = @transform_4, window_bounds = array<i64: 1, 96>}, {pipeline_mode = #tpu.pipeline_mode<synchronous>, transform_indices = @transform_5, window_bounds = array<i64: 32, 32>}, {pipeline_mode = #tpu.pipeline_mode<synchronous>, transform_indices = @transform_6, window_bounds = array<i64: 1, 32>}, {pipeline_mode = #tpu.pipeline_mode<synchronous>, transform_indices = @transform_7, window_bounds = array<i64: 1, 32>}, {pipeline_mode = #tpu.pipeline_mode<synchronous>, transform_indices = @transform_8, window_bounds = array<i64: 1, 32>}, {pipeline_mode = #tpu.pipeline_mode<synchronous>, transform_indices = @transform_9, window_bounds = array<i64: 32, 128>}, {pipeline_mode = #tpu.pipeline_mode<synchronous>, transform_indices = @transform_10, window_bounds = array<i64: 1, 128>}, {pipeline_mode = #tpu.pipeline_mode<synchronous>, transform_indices = @transform_11, window_bounds = array<i64: 128, 32>}, {pipeline_mode = #tpu.pipeline_mode<synchronous>, transform_indices = @transform_12, window_bounds = array<i64: 1, 32>}, {pipeline_mode = #tpu.pipeline_mode<synchronous>, transform_indices = @transform_13, window_bounds = array<i64: 1, 32>}, {pipeline_mode = #tpu.pipeline_mode<synchronous>, transform_indices = @transform_14, window_bounds = array<i64: 1, 32>}, {transform_indices = @transform_15, window_bounds = array<i64: 1, 5, 32>}]} {
    %c0 = arith.constant 0 : index
    %c0_0 = arith.constant 0 : index
    %c0_1 = arith.constant 0 : index
    %0 = vector.load %arg1[%c0, %c0_0, %c0_1] : memref<1x5x32xf32, #tpu.memory_space<vmem>>, vector<1x5x32xf32>
    %1 = vector.shape_cast %0 : vector<1x5x32xf32> to vector<5x32xf32>
    %c0_2 = arith.constant 0 : index
    %c0_3 = arith.constant 0 : index
    %2 = vector.load %arg2[%c0_2, %c0_3] : memref<1x32xf32, #tpu.memory_space<vmem>>, vector<1x32xf32>
    %c0_4 = arith.constant 0 : index
    %c0_5 = arith.constant 0 : index
    %3 = vector.load %arg3[%c0_4, %c0_5] : memref<1x32xf32, #tpu.memory_space<vmem>>, vector<1x32xf32>
    %cst = arith.constant dense<0.000000e+00> : vector<5xf32>
    %4 = vector.multi_reduction <add>, %1, %cst [1] : vector<5x32xf32> to vector<5xf32>
    %5 = vector.shape_cast %4 : vector<5xf32> to vector<5x1xf32>
    %cst_6 = arith.constant 3.200000e+01 : f32
    %6 = vector.broadcast %cst_6 : f32 to vector<5x1xf32>
    %7 = arith.divf %5, %6 : vector<5x1xf32>
    %8 = vector.broadcast %7 : vector<5x1xf32> to vector<5x32xf32>
    %9 = arith.subf %1, %8 : vector<5x32xf32>
    %10 = arith.mulf %9, %9 : vector<5x32xf32>
    %cst_7 = arith.constant dense<0.000000e+00> : vector<5xf32>
    %11 = vector.multi_reduction <add>, %10, %cst_7 [1] : vector<5x32xf32> to vector<5xf32>
    %12 = vector.shape_cast %11 : vector<5xf32> to vector<5x1xf32>
    %cst_8 = arith.constant 3.200000e+01 : f32
    %13 = vector.broadcast %cst_8 : f32 to vector<5x1xf32>
    %14 = arith.divf %12, %13 : vector<5x1xf32>
    %15 = vector.broadcast %7 : vector<5x1xf32> to vector<5x32xf32>
    %16 = arith.subf %1, %15 : vector<5x32xf32>
    %cst_9 = arith.constant 9.99999997E-7 : f32
    %17 = vector.broadcast %cst_9 : f32 to vector<5x1xf32>
    %18 = arith.addf %14, %17 : vector<5x1xf32>
    %19 = math.rsqrt %18 : vector<5x1xf32>
    %20 = vector.broadcast %19 : vector<5x1xf32> to vector<5x32xf32>
    %21 = arith.mulf %16, %20 : vector<5x32xf32>
    %22 = vector.broadcast %2 : vector<1x32xf32> to vector<5x32xf32>
    %23 = arith.mulf %21, %22 : vector<5x32xf32>
    %24 = vector.broadcast %3 : vector<1x32xf32> to vector<5x32xf32>
    %25 = arith.addf %23, %24 : vector<5x32xf32>
    %26 = arith.truncf %25 : vector<5x32xf32> to vector<5x32xbf16>
    %c0_10 = arith.constant 0 : index
    %c0_11 = arith.constant 0 : index
    %27 = vector.load %arg4[%c0_10, %c0_11] : memref<32x96xbf16, #tpu.memory_space<vmem>>, vector<32x96xbf16>
    %cst_12 = arith.constant dense<0.000000e+00> : vector<5x96xf32>
    %28 = tpu.matmul %26, %27, %cst_12 {dimension_numbers = #tpu.dot_dimension_numbers<[1], [0], [0], [1], [0, 0, 1, 1], [], []>} : vector<5x32xbf16>, vector<32x96xbf16>, vector<5x96xf32> -> vector<5x96xf32>
    %c0_13 = arith.constant 0 : index
    %c0_14 = arith.constant 0 : index
    %29 = vector.load %arg5[%c0_13, %c0_14] : memref<1x96xf32, #tpu.memory_space<vmem>>, vector<1x96xf32>
    %30 = vector.broadcast %29 : vector<1x96xf32> to vector<5x96xf32>
    %31 = arith.addf %28, %30 : vector<5x96xf32>
    %32 = vector.extract_strided_slice %31 {offsets = [0, 0], sizes = [5, 32], strides = [1, 1]} : vector<5x96xf32> to vector<5x32xf32>
    %33 = vector.extract_strided_slice %31 {offsets = [0, 32], sizes = [5, 32], strides = [1, 1]} : vector<5x96xf32> to vector<5x32xf32>
    %34 = vector.extract_strided_slice %31 {offsets = [0, 64], sizes = [5, 32], strides = [1, 1]} : vector<5x96xf32> to vector<5x32xf32>
    %cst_15 = arith.constant 0.353553385 : f32
    %35 = vector.broadcast %cst_15 : f32 to vector<5x32xf32>
    %36 = arith.mulf %32, %35 : vector<5x32xf32>
    %37 = arith.truncf %36 : vector<5x32xf32> to vector<5x32xbf16>
    %38 = arith.truncf %33 : vector<5x32xf32> to vector<5x32xbf16>
    %39 = arith.truncf %34 : vector<5x32xf32> to vector<5x32xbf16>
    %40 = vector.extract_strided_slice %37 {offsets = [0, 0], sizes = [5, 8], strides = [1, 1]} : vector<5x32xbf16> to vector<5x8xbf16>
    %41 = vector.extract_strided_slice %37 {offsets = [0, 8], sizes = [5, 8], strides = [1, 1]} : vector<5x32xbf16> to vector<5x8xbf16>
    %42 = vector.extract_strided_slice %37 {offsets = [0, 16], sizes = [5, 8], strides = [1, 1]} : vector<5x32xbf16> to vector<5x8xbf16>
    %43 = vector.extract_strided_slice %37 {offsets = [0, 24], sizes = [5, 8], strides = [1, 1]} : vector<5x32xbf16> to vector<5x8xbf16>
    %44 = vector.shape_cast %40 : vector<5x8xbf16> to vector<1x5x8xbf16>
    %45 = vector.shape_cast %41 : vector<5x8xbf16> to vector<1x5x8xbf16>
    %46 = vector.shape_cast %42 : vector<5x8xbf16> to vector<1x5x8xbf16>
    %47 = vector.shape_cast %43 : vector<5x8xbf16> to vector<1x5x8xbf16>
    %48 = tpu.concatenate %44, %45, %46, %47 in 0 : vector<1x5x8xbf16>, vector<1x5x8xbf16>, vector<1x5x8xbf16>, vector<1x5x8xbf16> -> vector<4x5x8xbf16>
    %49 = vector.extract_strided_slice %38 {offsets = [0, 0], sizes = [5, 8], strides = [1, 1]} : vector<5x32xbf16> to vector<5x8xbf16>
    %50 = vector.extract_strided_slice %38 {offsets = [0, 8], sizes = [5, 8], strides = [1, 1]} : vector<5x32xbf16> to vector<5x8xbf16>
    %51 = vector.extract_strided_slice %38 {offsets = [0, 16], sizes = [5, 8], strides = [1, 1]} : vector<5x32xbf16> to vector<5x8xbf16>
    %52 = vector.extract_strided_slice %38 {offsets = [0, 24], sizes = [5, 8], strides = [1, 1]} : vector<5x32xbf16> to vector<5x8xbf16>
    %53 = vector.shape_cast %49 : vector<5x8xbf16> to vector<1x5x8xbf16>
    %54 = vector.shape_cast %50 : vector<5x8xbf16> to vector<1x5x8xbf16>
    %55 = vector.shape_cast %51 : vector<5x8xbf16> to vector<1x5x8xbf16>
    %56 = vector.shape_cast %52 : vector<5x8xbf16> to vector<1x5x8xbf16>
    %57 = tpu.concatenate %53, %54, %55, %56 in 0 : vector<1x5x8xbf16>, vector<1x5x8xbf16>, vector<1x5x8xbf16>, vector<1x5x8xbf16> -> vector<4x5x8xbf16>
    %58 = vector.extract_strided_slice %39 {offsets = [0, 0], sizes = [5, 8], strides = [1, 1]} : vector<5x32xbf16> to vector<5x8xbf16>
    %59 = vector.extract_strided_slice %39 {offsets = [0, 8], sizes = [5, 8], strides = [1, 1]} : vector<5x32xbf16> to vector<5x8xbf16>
    %60 = vector.extract_strided_slice %39 {offsets = [0, 16], sizes = [5, 8], strides = [1, 1]} : vector<5x32xbf16> to vector<5x8xbf16>
    %61 = vector.extract_strided_slice %39 {offsets = [0, 24], sizes = [5, 8], strides = [1, 1]} : vector<5x32xbf16> to vector<5x8xbf16>
    %62 = vector.shape_cast %58 : vector<5x8xbf16> to vector<1x5x8xbf16>
    %63 = vector.shape_cast %59 : vector<5x8xbf16> to vector<1x5x8xbf16>
    %64 = vector.shape_cast %60 : vector<5x8xbf16> to vector<1x5x8xbf16>
    %65 = vector.shape_cast %61 : vector<5x8xbf16> to vector<1x5x8xbf16>
    %66 = tpu.concatenate %62, %63, %64, %65 in 0 : vector<1x5x8xbf16>, vector<1x5x8xbf16>, vector<1x5x8xbf16>, vector<1x5x8xbf16> -> vector<4x5x8xbf16>
    "tpu.trace_start"() <{level = 10 : i32, message = "hqd,hkd->hqk"}> : () -> ()
    %cst_16 = arith.constant dense<0.000000e+00> : vector<4x5x5xf32>
    %67 = tpu.matmul %48, %57, %cst_16 {dimension_numbers = #tpu.dot_dimension_numbers<[2], [2], [1], [1], [0, 0, 0, 1, 1, 1], [0], [0]>} : vector<4x5x8xbf16>, vector<4x5x8xbf16>, vector<4x5x5xf32> -> vector<4x5x5xf32>
    "tpu.trace_stop"() : () -> ()
    %cst_17 = arith.constant dense<0xFF800000> : vector<4x5xf32>
    %68 = vector.multi_reduction <maximumf>, %67, %cst_17 [2] : vector<4x5x5xf32> to vector<4x5xf32>
    %69 = vector.shape_cast %68 : vector<4x5xf32> to vector<4x5x1xf32>
    %70 = vector.broadcast %69 : vector<4x5x1xf32> to vector<4x5x5xf32>
    %71 = arith.subf %67, %70 : vector<4x5x5xf32>
    %72 = math.exp %71 : vector<4x5x5xf32>
    %cst_18 = arith.constant dense<0.000000e+00> : vector<4x5xf32>
    %73 = vector.multi_reduction <add>, %72, %cst_18 [2] : vector<4x5x5xf32> to vector<4x5xf32>
    %74 = vector.shape_cast %73 : vector<4x5xf32> to vector<4x5x1xf32>
    %75 = tpu.reciprocal %74 {approx = true} : vector<4x5x1xf32> -> vector<4x5x1xf32>
    %76 = vector.broadcast %75 : vector<4x5x1xf32> to vector<4x5x5xf32>
    %77 = arith.mulf %72, %76 : vector<4x5x5xf32>
    %78 = arith.truncf %77 : vector<4x5x5xf32> to vector<4x5x5xbf16>
    "tpu.trace_start"() <{level = 10 : i32, message = "hqk,hkd->hqd"}> : () -> ()
    %cst_19 = arith.constant dense<0.000000e+00> : vector<4x5x8xf32>
    %79 = tpu.matmul %78, %66, %cst_19 {dimension_numbers = #tpu.dot_dimension_numbers<[2], [1], [1], [2], [0, 0, 0, 1, 1, 2], [0], [0]>} : vector<4x5x5xbf16>, vector<4x5x8xbf16>, vector<4x5x8xf32> -> vector<4x5x8xf32>
    "tpu.trace_stop"() : () -> ()
    %80 = vector.extract_strided_slice %79 {offsets = [0, 0, 0], sizes = [1, 5, 8], strides = [1, 1, 1]} : vector<4x5x8xf32> to vector<1x5x8xf32>
    %81 = vector.shape_cast %80 : vector<1x5x8xf32> to vector<5x8xf32>
    %82 = vector.extract_strided_slice %79 {offsets = [1, 0, 0], sizes = [1, 5, 8], strides = [1, 1, 1]} : vector<4x5x8xf32> to vector<1x5x8xf32>
    %83 = vector.shape_cast %82 : vector<1x5x8xf32> to vector<5x8xf32>
    %84 = vector.extract_strided_slice %79 {offsets = [2, 0, 0], sizes = [1, 5, 8], strides = [1, 1, 1]} : vector<4x5x8xf32> to vector<1x5x8xf32>
    %85 = vector.shape_cast %84 : vector<1x5x8xf32> to vector<5x8xf32>
    %86 = vector.extract_strided_slice %79 {offsets = [3, 0, 0], sizes = [1, 5, 8], strides = [1, 1, 1]} : vector<4x5x8xf32> to vector<1x5x8xf32>
    %87 = vector.shape_cast %86 : vector<1x5x8xf32> to vector<5x8xf32>
    %88 = tpu.concatenate %81, %83, %85, %87 in 1 : vector<5x8xf32>, vector<5x8xf32>, vector<5x8xf32>, vector<5x8xf32> -> vector<5x32xf32>
    %89 = arith.truncf %88 : vector<5x32xf32> to vector<5x32xbf16>
    %c0_20 = arith.constant 0 : index
    %c0_21 = arith.constant 0 : index
    %90 = vector.load %arg6[%c0_20, %c0_21] : memref<32x32xbf16, #tpu.memory_space<vmem>>, vector<32x32xbf16>
    %cst_22 = arith.constant dense<0.000000e+00> : vector<5x32xf32>
    %91 = tpu.matmul %89, %90, %cst_22 {dimension_numbers = #tpu.dot_dimension_numbers<[1], [0], [0], [1], [0, 0, 1, 1], [], []>} : vector<5x32xbf16>, vector<32x32xbf16>, vector<5x32xf32> -> vector<5x32xf32>
    %c0_23 = arith.constant 0 : index
    %c0_24 = arith.constant 0 : index
    %92 = vector.load %arg7[%c0_23, %c0_24] : memref<1x32xf32, #tpu.memory_space<vmem>>, vector<1x32xf32>
    %93 = vector.broadcast %92 : vector<1x32xf32> to vector<5x32xf32>
    %94 = arith.addf %91, %93 : vector<5x32xf32>
    %95 = arith.addf %1, %94 : vector<5x32xf32>
    %c0_25 = arith.constant 0 : index
    %c0_26 = arith.constant 0 : index
    %96 = vector.load %arg8[%c0_25, %c0_26] : memref<1x32xf32, #tpu.memory_space<vmem>>, vector<1x32xf32>
    %c0_27 = arith.constant 0 : index
    %c0_28 = arith.constant 0 : index
    %97 = vector.load %arg9[%c0_27, %c0_28] : memref<1x32xf32, #tpu.memory_space<vmem>>, vector<1x32xf32>
    %cst_29 = arith.constant dense<0.000000e+00> : vector<5xf32>
    %98 = vector.multi_reduction <add>, %95, %cst_29 [1] : vector<5x32xf32> to vector<5xf32>
    %99 = vector.shape_cast %98 : vector<5xf32> to vector<5x1xf32>
    %cst_30 = arith.constant 3.200000e+01 : f32
    %100 = vector.broadcast %cst_30 : f32 to vector<5x1xf32>
    %101 = arith.divf %99, %100 : vector<5x1xf32>
    %102 = vector.broadcast %101 : vector<5x1xf32> to vector<5x32xf32>
    %103 = arith.subf %95, %102 : vector<5x32xf32>
    %104 = arith.mulf %103, %103 : vector<5x32xf32>
    %cst_31 = arith.constant dense<0.000000e+00> : vector<5xf32>
    %105 = vector.multi_reduction <add>, %104, %cst_31 [1] : vector<5x32xf32> to vector<5xf32>
    %106 = vector.shape_cast %105 : vector<5xf32> to vector<5x1xf32>
    %cst_32 = arith.constant 3.200000e+01 : f32
    %107 = vector.broadcast %cst_32 : f32 to vector<5x1xf32>
    %108 = arith.divf %106, %107 : vector<5x1xf32>
    %109 = vector.broadcast %101 : vector<5x1xf32> to vector<5x32xf32>
    %110 = arith.subf %95, %109 : vector<5x32xf32>
    %cst_33 = arith.constant 9.99999997E-7 : f32
    %111 = vector.broadcast %cst_33 : f32 to vector<5x1xf32>
    %112 = arith.addf %108, %111 : vector<5x1xf32>
    %113 = math.rsqrt %112 : vector<5x1xf32>
    %114 = vector.broadcast %113 : vector<5x1xf32> to vector<5x32xf32>
    %115 = arith.mulf %110, %114 : vector<5x32xf32>
    %116 = vector.broadcast %96 : vector<1x32xf32> to vector<5x32xf32>
    %117 = arith.mulf %115, %116 : vector<5x32xf32>
    %118 = vector.broadcast %97 : vector<1x32xf32> to vector<5x32xf32>
    %119 = arith.addf %117, %118 : vector<5x32xf32>
    %120 = arith.truncf %119 : vector<5x32xf32> to vector<5x32xbf16>
    %c0_34 = arith.constant 0 : index
    %c0_35 = arith.constant 0 : index
    %121 = vector.load %arg10[%c0_34, %c0_35] : memref<32x128xbf16, #tpu.memory_space<vmem>>, vector<32x128xbf16>
    %cst_36 = arith.constant dense<0.000000e+00> : vector<5x128xf32>
    %122 = tpu.matmul %120, %121, %cst_36 {dimension_numbers = #tpu.dot_dimension_numbers<[1], [0], [0], [1], [0, 0, 1, 1], [], []>} : vector<5x32xbf16>, vector<32x128xbf16>, vector<5x128xf32> -> vector<5x128xf32>
    %c0_37 = arith.constant 0 : index
    %c0_38 = arith.constant 0 : index
    %123 = vector.load %arg11[%c0_37, %c0_38] : memref<1x128xf32, #tpu.memory_space<vmem>>, vector<1x128xf32>
    %124 = vector.broadcast %123 : vector<1x128xf32> to vector<5x128xf32>
    %125 = arith.addf %122, %124 : vector<5x128xf32>
    %cst_39 = arith.constant 5.000000e-01 : f32
    %126 = vector.broadcast %cst_39 : f32 to vector<5x128xf32>
    %127 = arith.mulf %126, %125 : vector<5x128xf32>
    %cst_40 = arith.constant 4.471500e-02 : f32
    %128 = vector.broadcast %cst_40 : f32 to vector<5x128xf32>
    %129 = arith.mulf %128, %125 : vector<5x128xf32>
    %130 = arith.mulf %129, %125 : vector<5x128xf32>
    %131 = arith.mulf %130, %125 : vector<5x128xf32>
    %132 = arith.addf %125, %131 : vector<5x128xf32>
    %cst_41 = arith.constant 0.797884583 : f32
    %133 = vector.broadcast %cst_41 : f32 to vector<5x128xf32>
    %134 = arith.mulf %133, %132 : vector<5x128xf32>
    %135 = math.tanh %134 : vector<5x128xf32>
    %cst_42 = arith.constant 1.000000e+00 : f32
    %136 = vector.broadcast %cst_42 : f32 to vector<5x128xf32>
    %137 = arith.addf %136, %135 : vector<5x128xf32>
    %138 = arith.mulf %127, %137 : vector<5x128xf32>
    %139 = arith.truncf %138 : vector<5x128xf32> to vector<5x128xbf16>
    %c0_43 = arith.constant 0 : index
    %c0_44 = arith.constant 0 : index
    %140 = vector.load %arg12[%c0_43, %c0_44] : memref<128x32xbf16, #tpu.memory_space<vmem>>, vector<128x32xbf16>
    %cst_45 = arith.constant dense<0.000000e+00> : vector<5x32xf32>
    %141 = tpu.matmul %139, %140, %cst_45 {dimension_numbers = #tpu.dot_dimension_numbers<[1], [0], [0], [1], [0, 0, 1, 1], [], []>} : vector<5x128xbf16>, vector<128x32xbf16>, vector<5x32xf32> -> vector<5x32xf32>
    %c0_46 = arith.constant 0 : index
    %c0_47 = arith.constant 0 : index
    %142 = vector.load %arg13[%c0_46, %c0_47] : memref<1x32xf32, #tpu.memory_space<vmem>>, vector<1x32xf32>
    %143 = vector.broadcast %142 : vector<1x32xf32> to vector<5x32xf32>
    %144 = arith.addf %141, %143 : vector<5x32xf32>
    %145 = arith.addf %95, %144 : vector<5x32xf32>
    %c0_48 = arith.constant 0 : index
    %c0_49 = arith.constant 0 : index
    %146 = vector.load %arg14[%c0_48, %c0_49] : memref<1x32xf32, #tpu.memory_space<vmem>>, vector<1x32xf32>
    %c0_50 = arith.constant 0 : index
    %c0_51 = arith.constant 0 : index
    %147 = vector.load %arg15[%c0_50, %c0_51] : memref<1x32xf32, #tpu.memory_space<vmem>>, vector<1x32xf32>
    %cst_52 = arith.constant dense<0.000000e+00> : vector<5xf32>
    %148 = vector.multi_reduction <add>, %145, %cst_52 [1] : vector<5x32xf32> to vector<5xf32>
    %149 = vector.shape_cast %148 : vector<5xf32> to vector<5x1xf32>
    %cst_53 = arith.constant 3.200000e+01 : f32
    %150 = vector.broadcast %cst_53 : f32 to vector<5x1xf32>
    %151 = arith.divf %149, %150 : vector<5x1xf32>
    %152 = vector.broadcast %151 : vector<5x1xf32> to vector<5x32xf32>
    %153 = arith.subf %145, %152 : vector<5x32xf32>
    %154 = arith.mulf %153, %153 : vector<5x32xf32>
    %cst_54 = arith.constant dense<0.000000e+00> : vector<5xf32>
    %155 = vector.multi_reduction <add>, %154, %cst_54 [1] : vector<5x32xf32> to vector<5xf32>
    %156 = vector.shape_cast %155 : vector<5xf32> to vector<5x1xf32>
    %cst_55 = arith.constant 3.200000e+01 : f32
    %157 = vector.broadcast %cst_55 : f32 to vector<5x1xf32>
    %158 = arith.divf %156, %157 : vector<5x1xf32>
    %159 = vector.broadcast %151 : vector<5x1xf32> to vector<5x32xf32>
    %160 = arith.subf %145, %159 : vector<5x32xf32>
    %cst_56 = arith.constant 9.99999997E-7 : f32
    %161 = vector.broadcast %cst_56 : f32 to vector<5x1xf32>
    %162 = arith.addf %158, %161 : vector<5x1xf32>
    %163 = math.rsqrt %162 : vector<5x1xf32>
    %164 = vector.broadcast %163 : vector<5x1xf32> to vector<5x32xf32>
    %165 = arith.mulf %160, %164 : vector<5x32xf32>
    %166 = vector.broadcast %146 : vector<1x32xf32> to vector<5x32xf32>
    %167 = arith.mulf %165, %166 : vector<5x32xf32>
    %168 = vector.broadcast %147 : vector<1x32xf32> to vector<5x32xf32>
    %169 = arith.addf %167, %168 : vector<5x32xf32>
    %c0_57 = arith.constant 0 : index
    %c0_58 = arith.constant 0 : index
    %c0_59 = arith.constant 0 : index
    %170 = vector.load %arg16[%c0_57, %c0_58, %c0_59] : memref<1x5x32xf32, #tpu.memory_space<vmem>>, vector<1x5x32xf32>
    %171 = vector.shape_cast %170 : vector<1x5x32xf32> to vector<5x32xf32>
    %172 = vector.shape_cast %169 : vector<5x32xf32> to vector<1x5x32xf32>
    tpu.vector_store %arg16[%c0_57, %c0_58, %c0_59], %172 {strides = array<i32>} : memref<1x5x32xf32, #tpu.memory_space<vmem>>, vector<1x5x32xf32>,
    return
  }
  func.func @transform_0(%arg0: i32) -> (i32, i32, i32) {
    %c0_i32 = arith.constant 0 : i32
    %c0_i32_0 = arith.constant 0 : i32
    %c0_i32_1 = arith.constant 0 : i32
    return %arg0, %c0_i32, %c0_i32_0 : i32, i32, i32
  }
  func.func @transform_1(%arg0: i32) -> (i32, i32) {
    %c0_i32 = arith.constant 0 : i32
    %c0_i32_0 = arith.constant 0 : i32
    %c0_i32_1 = arith.constant 0 : i32
    return %c0_i32, %c0_i32_0 : i32, i32
  }
  func.func @transform_2(%arg0: i32) -> (i32, i32) {
    %c0_i32 = arith.constant 0 : i32
    %c0_i32_0 = arith.constant 0 : i32
    %c0_i32_1 = arith.constant 0 : i32
    return %c0_i32, %c0_i32_0 : i32, i32
  }
  func.func @transform_3(%arg0: i32) -> (i32, i32) {
    %c0_i32 = arith.constant 0 : i32
    %c0_i32_0 = arith.constant 0 : i32
    %c0_i32_1 = arith.constant 0 : i32
    return %c0_i32, %c0_i32_0 : i32, i32
  }
  func.func @transform_4(%arg0: i32) -> (i32, i32) {
    %c0_i32 = arith.constant 0 : i32
    %c0_i32_0 = arith.constant 0 : i32
    %c0_i32_1 = arith.constant 0 : i32
    return %c0_i32, %c0_i32_0 : i32, i32
  }
  func.func @transform_5(%arg0: i32) -> (i32, i32) {
    %c0_i32 = arith.constant 0 : i32
    %c0_i32_0 = arith.constant 0 : i32
    %c0_i32_1 = arith.constant 0 : i32
    return %c0_i32, %c0_i32_0 : i32, i32
  }
  func.func @transform_6(%arg0: i32) -> (i32, i32) {
    %c0_i32 = arith.constant 0 : i32
    %c0_i32_0 = arith.constant 0 : i32
    %c0_i32_1 = arith.constant 0 : i32
    return %c0_i32, %c0_i32_0 : i32, i32
  }
  func.func @transform_7(%arg0: i32) -> (i32, i32) {
    %c0_i32 = arith.constant 0 : i32
    %c0_i32_0 = arith.constant 0 : i32
    %c0_i32_1 = arith.constant 0 : i32
    return %c0_i32, %c0_i32_0 : i32, i32
  }
  func.func @transform_8(%arg0: i32) -> (i32, i32) {
    %c0_i32 = arith.constant 0 : i32
    %c0_i32_0 = arith.constant 0 : i32
    %c0_i32_1 = arith.constant 0 : i32
    return %c0_i32, %c0_i32_0 : i32, i32
  }
  func.func @transform_9(%arg0: i32) -> (i32, i32) {
    %c0_i32 = arith.constant 0 : i32
    %c0_i32_0 = arith.constant 0 : i32
    %c0_i32_1 = arith.constant 0 : i32
    return %c0_i32, %c0_i32_0 : i32, i32
  }
  func.func @transform_10(%arg0: i32) -> (i32, i32) {
    %c0_i32 = arith.constant 0 : i32
    %c0_i32_0 = arith.constant 0 : i32
    %c0_i32_1 = arith.constant 0 : i32
    return %c0_i32, %c0_i32_0 : i32, i32
  }
  func.func @transform_11(%arg0: i32) -> (i32, i32) {
    %c0_i32 = arith.constant 0 : i32
    %c0_i32_0 = arith.constant 0 : i32
    %c0_i32_1 = arith.constant 0 : i32
    return %c0_i32, %c0_i32_0 : i32, i32
  }
  func.func @transform_12(%arg0: i32) -> (i32, i32) {
    %c0_i32 = arith.constant 0 : i32
    %c0_i32_0 = arith.constant 0 : i32
    %c0_i32_1 = arith.constant 0 : i32
    return %c0_i32, %c0_i32_0 : i32, i32
  }
  func.func @transform_13(%arg0: i32) -> (i32, i32) {
    %c0_i32 = arith.constant 0 : i32
    %c0_i32_0 = arith.constant 0 : i32
    %c0_i32_1 = arith.constant 0 : i32
    return %c0_i32, %c0_i32_0 : i32, i32
  }
  func.func @transform_14(%arg0: i32) -> (i32, i32) {
    %c0_i32 = arith.constant 0 : i32
    %c0_i32_0 = arith.constant 0 : i32
    %c0_i32_1 = arith.constant 0 : i32
    return %c0_i32, %c0_i32_0 : i32, i32
  }
  func.func @transform_15(%arg0: i32) -> (i32, i32, i32) {
    %c0_i32 = arith.constant 0 : i32
    %c0_i32_0 = arith.constant 0 : i32
    %c0_i32_1 = arith.constant 0 : i32
    return %arg0, %c0_i32, %c0_i32_0 : i32, i32, i32
  }
}

module attributes {stable_mosaic.version = 11 : i64} {
  func.func @_bert_layer_kernel(%arg0: i32, %arg1: memref<1x8x32xf32, #tpu.memory_space<vmem>>, %arg2: memref<1x5x32xf32, #tpu.memory_space<vmem>>, %arg3: memref<1x1x8xf32, #tpu.memory_space<vmem>>, %arg4: memref<32x96xbf16, #tpu.memory_space<vmem>>, %arg5: memref<1x96xf32, #tpu.memory_space<vmem>>, %arg6: memref<32x32xbf16, #tpu.memory_space<vmem>>, %arg7: memref<1x32xf32, #tpu.memory_space<vmem>>, %arg8: memref<1x32xf32, #tpu.memory_space<vmem>>, %arg9: memref<1x32xf32, #tpu.memory_space<vmem>>, %arg10: memref<32x32xbf16, #tpu.memory_space<vmem>>, %arg11: memref<1x32xf32, #tpu.memory_space<vmem>>, %arg12: memref<32x64xbf16, #tpu.memory_space<vmem>>, %arg13: memref<1x64xf32, #tpu.memory_space<vmem>>, %arg14: memref<32x32xbf16, #tpu.memory_space<vmem>>, %arg15: memref<1x32xf32, #tpu.memory_space<vmem>>, %arg16: memref<1x32xf32, #tpu.memory_space<vmem>>, %arg17: memref<1x32xf32, #tpu.memory_space<vmem>>, %arg18: memref<32x128xbf16, #tpu.memory_space<vmem>>, %arg19: memref<1x128xf32, #tpu.memory_space<vmem>>, %arg20: memref<128x32xbf16, #tpu.memory_space<vmem>>, %arg21: memref<1x32xf32, #tpu.memory_space<vmem>>, %arg22: memref<1x32xf32, #tpu.memory_space<vmem>>, %arg23: memref<1x32xf32, #tpu.memory_space<vmem>>, %arg24: memref<1x8x32xf32, #tpu.memory_space<vmem>>) attributes {dimension_semantics = [#tpu.dimension_semantics<parallel>], iteration_bounds = array<i64: 2>, scalar_prefetch = 0 : i64, scratch_operands = 0 : i64, tpu.core_type = #tpu.core_type<tc>, window_params = [{transform_indices = @transform_0, window_bounds = array<i64: 1, 8, 32>}, {transform_indices = @transform_1, window_bounds = array<i64: 1, 5, 32>}, {transform_indices = @transform_2, window_bounds = array<i64: 1, 1, 8>}, {pipeline_mode = #tpu.pipeline_mode<synchronous>, transform_indices = @transform_3, window_bounds = array<i64: 32, 96>}, {pipeline_mode = #tpu.pipeline_mode<synchronous>, transform_indices = @transform_4, window_bounds = array<i64: 1, 96>}, {pipeline_mode = #tpu.pipeline_mode<synchronous>, transform_indices = @transform_5, window_bounds = array<i64: 32, 32>}, {pipeline_mode = #tpu.pipeline_mode<synchronous>, transform_indices = @transform_6, window_bounds = array<i64: 1, 32>}, {pipeline_mode = #tpu.pipeline_mode<synchronous>, transform_indices = @transform_7, window_bounds = array<i64: 1, 32>}, {pipeline_mode = #tpu.pipeline_mode<synchronous>, transform_indices = @transform_8, window_bounds = array<i64: 1, 32>}, {pipeline_mode = #tpu.pipeline_mode<synchronous>, transform_indices = @transform_9, window_bounds = array<i64: 32, 32>}, {pipeline_mode = #tpu.pipeline_mode<synchronous>, transform_indices = @transform_10, window_bounds = array<i64: 1, 32>}, {pipeline_mode = #tpu.pipeline_mode<synchronous>, transform_indices = @transform_11, window_bounds = array<i64: 32, 64>}, {pipeline_mode = #tpu.pipeline_mode<synchronous>, transform_indices = @transform_12, window_bounds = array<i64: 1, 64>}, {pipeline_mode = #tpu.pipeline_mode<synchronous>, transform_indices = @transform_13, window_bounds = array<i64: 32, 32>}, {pipeline_mode = #tpu.pipeline_mode<synchronous>, transform_indices = @transform_14, window_bounds = array<i64: 1, 32>}, {pipeline_mode = #tpu.pipeline_mode<synchronous>, transform_indices = @transform_15, window_bounds = array<i64: 1, 32>}, {pipeline_mode = #tpu.pipeline_mode<synchronous>, transform_indices = @transform_16, window_bounds = array<i64: 1, 32>}, {pipeline_mode = #tpu.pipeline_mode<synchronous>, transform_indices = @transform_17, window_bounds = array<i64: 32, 128>}, {pipeline_mode = #tpu.pipeline_mode<synchronous>, transform_indices = @transform_18, window_bounds = array<i64: 1, 128>}, {pipeline_mode = #tpu.pipeline_mode<synchronous>, transform_indices = @transform_19, window_bounds = array<i64: 128, 32>}, {pipeline_mode = #tpu.pipeline_mode<synchronous>, transform_indices = @transform_20, window_bounds = array<i64: 1, 32>}, {pipeline_mode = #tpu.pipeline_mode<synchronous>, transform_indices = @transform_21, window_bounds = array<i64: 1, 32>}, {pipeline_mode = #tpu.pipeline_mode<synchronous>, transform_indices = @transform_22, window_bounds = array<i64: 1, 32>}, {transform_indices = @transform_23, window_bounds = array<i64: 1, 8, 32>}]} {
    %c0 = arith.constant 0 : index
    %c0_0 = arith.constant 0 : index
    %c0_1 = arith.constant 0 : index
    %0 = vector.load %arg1[%c0, %c0_0, %c0_1] : memref<1x8x32xf32, #tpu.memory_space<vmem>>, vector<1x8x32xf32>
    %1 = vector.shape_cast %0 : vector<1x8x32xf32> to vector<8x32xf32>
    %c0_2 = arith.constant 0 : index
    %c0_3 = arith.constant 0 : index
    %c0_4 = arith.constant 0 : index
    %2 = vector.load %arg2[%c0_2, %c0_3, %c0_4] : memref<1x5x32xf32, #tpu.memory_space<vmem>>, vector<1x5x32xf32>
    %3 = vector.shape_cast %2 : vector<1x5x32xf32> to vector<5x32xf32>
    %4 = arith.truncf %1 : vector<8x32xf32> to vector<8x32xbf16>
    %c0_5 = arith.constant 0 : index
    %c0_6 = arith.constant 0 : index
    %5 = vector.load %arg4[%c0_5, %c0_6] : memref<32x96xbf16, #tpu.memory_space<vmem>>, vector<32x96xbf16>
    %cst = arith.constant dense<0.000000e+00> : vector<8x96xf32>
    %6 = tpu.matmul %4, %5, %cst {dimension_numbers = #tpu.dot_dimension_numbers<[1], [0], [0], [1], [0, 0, 1, 1], [], []>} : vector<8x32xbf16>, vector<32x96xbf16>, vector<8x96xf32> -> vector<8x96xf32>
    %c0_7 = arith.constant 0 : index
    %c0_8 = arith.constant 0 : index
    %7 = vector.load %arg5[%c0_7, %c0_8] : memref<1x96xf32, #tpu.memory_space<vmem>>, vector<1x96xf32>
    %8 = vector.broadcast %7 : vector<1x96xf32> to vector<8x96xf32>
    %9 = arith.addf %6, %8 : vector<8x96xf32>
    %10 = vector.extract_strided_slice %9 {offsets = [0, 0], sizes = [8, 32], strides = [1, 1]} : vector<8x96xf32> to vector<8x32xf32>
    %11 = vector.extract_strided_slice %9 {offsets = [0, 32], sizes = [8, 32], strides = [1, 1]} : vector<8x96xf32> to vector<8x32xf32>
    %12 = vector.extract_strided_slice %9 {offsets = [0, 64], sizes = [8, 32], strides = [1, 1]} : vector<8x96xf32> to vector<8x32xf32>
    %c0_9 = arith.constant 0 : index
    %c0_10 = arith.constant 0 : index
    %c0_11 = arith.constant 0 : index
    %13 = vector.load %arg3[%c0_9, %c0_10, %c0_11] : memref<1x1x8xf32, #tpu.memory_space<vmem>>, vector<1x1x8xf32>
    %14 = vector.shape_cast %13 : vector<1x1x8xf32> to vector<1x8xf32>
    %cst_12 = arith.constant 0.353553385 : f32
    %15 = vector.broadcast %cst_12 : f32 to vector<8x32xf32>
    %16 = arith.mulf %10, %15 : vector<8x32xf32>
    %17 = arith.truncf %16 : vector<8x32xf32> to vector<8x32xbf16>
    %18 = arith.truncf %11 : vector<8x32xf32> to vector<8x32xbf16>
    %19 = arith.truncf %12 : vector<8x32xf32> to vector<8x32xbf16>
    %20 = vector.extract_strided_slice %17 {offsets = [0, 0], sizes = [8, 8], strides = [1, 1]} : vector<8x32xbf16> to vector<8x8xbf16>
    %21 = vector.extract_strided_slice %17 {offsets = [0, 8], sizes = [8, 8], strides = [1, 1]} : vector<8x32xbf16> to vector<8x8xbf16>
    %22 = vector.extract_strided_slice %17 {offsets = [0, 16], sizes = [8, 8], strides = [1, 1]} : vector<8x32xbf16> to vector<8x8xbf16>
    %23 = vector.extract_strided_slice %17 {offsets = [0, 24], sizes = [8, 8], strides = [1, 1]} : vector<8x32xbf16> to vector<8x8xbf16>
    %24 = vector.shape_cast %20 : vector<8x8xbf16> to vector<1x8x8xbf16>
    %25 = vector.shape_cast %21 : vector<8x8xbf16> to vector<1x8x8xbf16>
    %26 = vector.shape_cast %22 : vector<8x8xbf16> to vector<1x8x8xbf16>
    %27 = vector.shape_cast %23 : vector<8x8xbf16> to vector<1x8x8xbf16>
    %28 = tpu.concatenate %24, %25, %26, %27 in 0 : vector<1x8x8xbf16>, vector<1x8x8xbf16>, vector<1x8x8xbf16>, vector<1x8x8xbf16> -> vector<4x8x8xbf16>
    %29 = vector.extract_strided_slice %18 {offsets = [0, 0], sizes = [8, 8], strides = [1, 1]} : vector<8x32xbf16> to vector<8x8xbf16>
    %30 = vector.extract_strided_slice %18 {offsets = [0, 8], sizes = [8, 8], strides = [1, 1]} : vector<8x32xbf16> to vector<8x8xbf16>
    %31 = vector.extract_strided_slice %18 {offsets = [0, 16], sizes = [8, 8], strides = [1, 1]} : vector<8x32xbf16> to vector<8x8xbf16>
    %32 = vector.extract_strided_slice %18 {offsets = [0, 24], sizes = [8, 8], strides = [1, 1]} : vector<8x32xbf16> to vector<8x8xbf16>
    %33 = vector.shape_cast %29 : vector<8x8xbf16> to vector<1x8x8xbf16>
    %34 = vector.shape_cast %30 : vector<8x8xbf16> to vector<1x8x8xbf16>
    %35 = vector.shape_cast %31 : vector<8x8xbf16> to vector<1x8x8xbf16>
    %36 = vector.shape_cast %32 : vector<8x8xbf16> to vector<1x8x8xbf16>
    %37 = tpu.concatenate %33, %34, %35, %36 in 0 : vector<1x8x8xbf16>, vector<1x8x8xbf16>, vector<1x8x8xbf16>, vector<1x8x8xbf16> -> vector<4x8x8xbf16>
    %38 = vector.extract_strided_slice %19 {offsets = [0, 0], sizes = [8, 8], strides = [1, 1]} : vector<8x32xbf16> to vector<8x8xbf16>
    %39 = vector.extract_strided_slice %19 {offsets = [0, 8], sizes = [8, 8], strides = [1, 1]} : vector<8x32xbf16> to vector<8x8xbf16>
    %40 = vector.extract_strided_slice %19 {offsets = [0, 16], sizes = [8, 8], strides = [1, 1]} : vector<8x32xbf16> to vector<8x8xbf16>
    %41 = vector.extract_strided_slice %19 {offsets = [0, 24], sizes = [8, 8], strides = [1, 1]} : vector<8x32xbf16> to vector<8x8xbf16>
    %42 = vector.shape_cast %38 : vector<8x8xbf16> to vector<1x8x8xbf16>
    %43 = vector.shape_cast %39 : vector<8x8xbf16> to vector<1x8x8xbf16>
    %44 = vector.shape_cast %40 : vector<8x8xbf16> to vector<1x8x8xbf16>
    %45 = vector.shape_cast %41 : vector<8x8xbf16> to vector<1x8x8xbf16>
    %46 = tpu.concatenate %42, %43, %44, %45 in 0 : vector<1x8x8xbf16>, vector<1x8x8xbf16>, vector<1x8x8xbf16>, vector<1x8x8xbf16> -> vector<4x8x8xbf16>
    "tpu.trace_start"() <{level = 10 : i32, message = "hqd,hkd->hqk"}> : () -> ()
    %cst_13 = arith.constant dense<0.000000e+00> : vector<4x8x8xf32>
    %47 = tpu.matmul %28, %37, %cst_13 {dimension_numbers = #tpu.dot_dimension_numbers<[2], [2], [1], [1], [0, 0, 0, 1, 1, 1], [0], [0]>} : vector<4x8x8xbf16>, vector<4x8x8xbf16>, vector<4x8x8xf32> -> vector<4x8x8xf32>
    "tpu.trace_stop"() : () -> ()
    %48 = vector.shape_cast %14 : vector<1x8xf32> to vector<1x1x8xf32>
    %49 = vector.broadcast %48 : vector<1x1x8xf32> to vector<4x8x8xf32>
    %50 = arith.addf %47, %49 : vector<4x8x8xf32>
    %cst_14 = arith.constant dense<0xFF800000> : vector<4x8xf32>
    %51 = vector.multi_reduction <maximumf>, %50, %cst_14 [2] : vector<4x8x8xf32> to vector<4x8xf32>
    %52 = vector.shape_cast %51 : vector<4x8xf32> to vector<4x8x1xf32>
    %53 = vector.broadcast %52 : vector<4x8x1xf32> to vector<4x8x8xf32>
    %54 = arith.subf %50, %53 : vector<4x8x8xf32>
    %55 = math.exp %54 : vector<4x8x8xf32>
    %cst_15 = arith.constant dense<0.000000e+00> : vector<4x8xf32>
    %56 = vector.multi_reduction <add>, %55, %cst_15 [2] : vector<4x8x8xf32> to vector<4x8xf32>
    %57 = vector.shape_cast %56 : vector<4x8xf32> to vector<4x8x1xf32>
    %58 = tpu.reciprocal %57 {approx = true} : vector<4x8x1xf32> -> vector<4x8x1xf32>
    %59 = vector.broadcast %58 : vector<4x8x1xf32> to vector<4x8x8xf32>
    %60 = arith.mulf %55, %59 : vector<4x8x8xf32>
    %61 = arith.truncf %60 : vector<4x8x8xf32> to vector<4x8x8xbf16>
    "tpu.trace_start"() <{level = 10 : i32, message = "hqk,hkd->hqd"}> : () -> ()
    %cst_16 = arith.constant dense<0.000000e+00> : vector<4x8x8xf32>
    %62 = tpu.matmul %61, %46, %cst_16 {dimension_numbers = #tpu.dot_dimension_numbers<[2], [1], [1], [2], [0, 0, 0, 1, 1, 2], [0], [0]>} : vector<4x8x8xbf16>, vector<4x8x8xbf16>, vector<4x8x8xf32> -> vector<4x8x8xf32>
    "tpu.trace_stop"() : () -> ()
    %63 = vector.extract_strided_slice %62 {offsets = [0, 0, 0], sizes = [1, 8, 8], strides = [1, 1, 1]} : vector<4x8x8xf32> to vector<1x8x8xf32>
    %64 = vector.shape_cast %63 : vector<1x8x8xf32> to vector<8x8xf32>
    %65 = vector.extract_strided_slice %62 {offsets = [1, 0, 0], sizes = [1, 8, 8], strides = [1, 1, 1]} : vector<4x8x8xf32> to vector<1x8x8xf32>
    %66 = vector.shape_cast %65 : vector<1x8x8xf32> to vector<8x8xf32>
    %67 = vector.extract_strided_slice %62 {offsets = [2, 0, 0], sizes = [1, 8, 8], strides = [1, 1, 1]} : vector<4x8x8xf32> to vector<1x8x8xf32>
    %68 = vector.shape_cast %67 : vector<1x8x8xf32> to vector<8x8xf32>
    %69 = vector.extract_strided_slice %62 {offsets = [3, 0, 0], sizes = [1, 8, 8], strides = [1, 1, 1]} : vector<4x8x8xf32> to vector<1x8x8xf32>
    %70 = vector.shape_cast %69 : vector<1x8x8xf32> to vector<8x8xf32>
    %71 = tpu.concatenate %64, %66, %68, %70 in 1 : vector<8x8xf32>, vector<8x8xf32>, vector<8x8xf32>, vector<8x8xf32> -> vector<8x32xf32>
    %72 = arith.truncf %71 : vector<8x32xf32> to vector<8x32xbf16>
    %c0_17 = arith.constant 0 : index
    %c0_18 = arith.constant 0 : index
    %73 = vector.load %arg6[%c0_17, %c0_18] : memref<32x32xbf16, #tpu.memory_space<vmem>>, vector<32x32xbf16>
    %cst_19 = arith.constant dense<0.000000e+00> : vector<8x32xf32>
    %74 = tpu.matmul %72, %73, %cst_19 {dimension_numbers = #tpu.dot_dimension_numbers<[1], [0], [0], [1], [0, 0, 1, 1], [], []>} : vector<8x32xbf16>, vector<32x32xbf16>, vector<8x32xf32> -> vector<8x32xf32>
    %c0_20 = arith.constant 0 : index
    %c0_21 = arith.constant 0 : index
    %75 = vector.load %arg7[%c0_20, %c0_21] : memref<1x32xf32, #tpu.memory_space<vmem>>, vector<1x32xf32>
    %76 = vector.broadcast %75 : vector<1x32xf32> to vector<8x32xf32>
    %77 = arith.addf %74, %76 : vector<8x32xf32>
    %78 = arith.addf %1, %77 : vector<8x32xf32>
    %c0_22 = arith.constant 0 : index
    %c0_23 = arith.constant 0 : index
    %79 = vector.load %arg8[%c0_22, %c0_23] : memref<1x32xf32, #tpu.memory_space<vmem>>, vector<1x32xf32>
    %c0_24 = arith.constant 0 : index
    %c0_25 = arith.constant 0 : index
    %80 = vector.load %arg9[%c0_24, %c0_25] : memref<1x32xf32, #tpu.memory_space<vmem>>, vector<1x32xf32>
    %cst_26 = arith.constant dense<0.000000e+00> : vector<8xf32>
    %81 = vector.multi_reduction <add>, %78, %cst_26 [1] : vector<8x32xf32> to vector<8xf32>
    %82 = vector.shape_cast %81 : vector<8xf32> to vector<8x1xf32>
    %cst_27 = arith.constant 3.200000e+01 : f32
    %83 = vector.broadcast %cst_27 : f32 to vector<8x1xf32>
    %84 = arith.divf %82, %83 : vector<8x1xf32>
    %85 = vector.broadcast %84 : vector<8x1xf32> to vector<8x32xf32>
    %86 = arith.subf %78, %85 : vector<8x32xf32>
    %87 = arith.mulf %86, %86 : vector<8x32xf32>
    %cst_28 = arith.constant dense<0.000000e+00> : vector<8xf32>
    %88 = vector.multi_reduction <add>, %87, %cst_28 [1] : vector<8x32xf32> to vector<8xf32>
    %89 = vector.shape_cast %88 : vector<8xf32> to vector<8x1xf32>
    %cst_29 = arith.constant 3.200000e+01 : f32
    %90 = vector.broadcast %cst_29 : f32 to vector<8x1xf32>
    %91 = arith.divf %89, %90 : vector<8x1xf32>
    %92 = vector.broadcast %84 : vector<8x1xf32> to vector<8x32xf32>
    %93 = arith.subf %78, %92 : vector<8x32xf32>
    %cst_30 = arith.constant 9.99999996E-13 : f32
    %94 = vector.broadcast %cst_30 : f32 to vector<8x1xf32>
    %95 = arith.addf %91, %94 : vector<8x1xf32>
    %96 = math.rsqrt %95 : vector<8x1xf32>
    %97 = vector.broadcast %96 : vector<8x1xf32> to vector<8x32xf32>
    %98 = arith.mulf %93, %97 : vector<8x32xf32>
    %99 = vector.broadcast %79 : vector<1x32xf32> to vector<8x32xf32>
    %100 = arith.mulf %98, %99 : vector<8x32xf32>
    %101 = vector.broadcast %80 : vector<1x32xf32> to vector<8x32xf32>
    %102 = arith.addf %100, %101 : vector<8x32xf32>
    %103 = arith.truncf %102 : vector<8x32xf32> to vector<8x32xbf16>
    %c0_31 = arith.constant 0 : index
    %c0_32 = arith.constant 0 : index
    %104 = vector.load %arg10[%c0_31, %c0_32] : memref<32x32xbf16, #tpu.memory_space<vmem>>, vector<32x32xbf16>
    %cst_33 = arith.constant dense<0.000000e+00> : vector<8x32xf32>
    %105 = tpu.matmul %103, %104, %cst_33 {dimension_numbers = #tpu.dot_dimension_numbers<[1], [0], [0], [1], [0, 0, 1, 1], [], []>} : vector<8x32xbf16>, vector<32x32xbf16>, vector<8x32xf32> -> vector<8x32xf32>
    %c0_34 = arith.constant 0 : index
    %c0_35 = arith.constant 0 : index
    %106 = vector.load %arg11[%c0_34, %c0_35] : memref<1x32xf32, #tpu.memory_space<vmem>>, vector<1x32xf32>
    %107 = vector.broadcast %106 : vector<1x32xf32> to vector<8x32xf32>
    %108 = arith.addf %105, %107 : vector<8x32xf32>
    %109 = arith.truncf %3 : vector<5x32xf32> to vector<5x32xbf16>
    %c0_36 = arith.constant 0 : index
    %c0_37 = arith.constant 0 : index
    %110 = vector.load %arg12[%c0_36, %c0_37] : memref<32x64xbf16, #tpu.memory_space<vmem>>, vector<32x64xbf16>
    %cst_38 = arith.constant dense<0.000000e+00> : vector<5x64xf32>
    %111 = tpu.matmul %109, %110, %cst_38 {dimension_numbers = #tpu.dot_dimension_numbers<[1], [0], [0], [1], [0, 0, 1, 1], [], []>} : vector<5x32xbf16>, vector<32x64xbf16>, vector<5x64xf32> -> vector<5x64xf32>
    %c0_39 = arith.constant 0 : index
    %c0_40 = arith.constant 0 : index
    %112 = vector.load %arg13[%c0_39, %c0_40] : memref<1x64xf32, #tpu.memory_space<vmem>>, vector<1x64xf32>
    %113 = vector.broadcast %112 : vector<1x64xf32> to vector<5x64xf32>
    %114 = arith.addf %111, %113 : vector<5x64xf32>
    %115 = vector.extract_strided_slice %114 {offsets = [0, 0], sizes = [5, 32], strides = [1, 1]} : vector<5x64xf32> to vector<5x32xf32>
    %116 = vector.extract_strided_slice %114 {offsets = [0, 32], sizes = [5, 32], strides = [1, 1]} : vector<5x64xf32> to vector<5x32xf32>
    %cst_41 = arith.constant 0.353553385 : f32
    %117 = vector.broadcast %cst_41 : f32 to vector<8x32xf32>
    %118 = arith.mulf %108, %117 : vector<8x32xf32>
    %119 = arith.truncf %118 : vector<8x32xf32> to vector<8x32xbf16>
    %120 = arith.truncf %115 : vector<5x32xf32> to vector<5x32xbf16>
    %121 = arith.truncf %116 : vector<5x32xf32> to vector<5x32xbf16>
    %122 = vector.extract_strided_slice %119 {offsets = [0, 0], sizes = [8, 8], strides = [1, 1]} : vector<8x32xbf16> to vector<8x8xbf16>
    %123 = vector.extract_strided_slice %119 {offsets = [0, 8], sizes = [8, 8], strides = [1, 1]} : vector<8x32xbf16> to vector<8x8xbf16>
    %124 = vector.extract_strided_slice %119 {offsets = [0, 16], sizes = [8, 8], strides = [1, 1]} : vector<8x32xbf16> to vector<8x8xbf16>
    %125 = vector.extract_strided_slice %119 {offsets = [0, 24], sizes = [8, 8], strides = [1, 1]} : vector<8x32xbf16> to vector<8x8xbf16>
    %126 = vector.shape_cast %122 : vector<8x8xbf16> to vector<1x8x8xbf16>
    %127 = vector.shape_cast %123 : vector<8x8xbf16> to vector<1x8x8xbf16>
    %128 = vector.shape_cast %124 : vector<8x8xbf16> to vector<1x8x8xbf16>
    %129 = vector.shape_cast %125 : vector<8x8xbf16> to vector<1x8x8xbf16>
    %130 = tpu.concatenate %126, %127, %128, %129 in 0 : vector<1x8x8xbf16>, vector<1x8x8xbf16>, vector<1x8x8xbf16>, vector<1x8x8xbf16> -> vector<4x8x8xbf16>
    %131 = vector.extract_strided_slice %120 {offsets = [0, 0], sizes = [5, 8], strides = [1, 1]} : vector<5x32xbf16> to vector<5x8xbf16>
    %132 = vector.extract_strided_slice %120 {offsets = [0, 8], sizes = [5, 8], strides = [1, 1]} : vector<5x32xbf16> to vector<5x8xbf16>
    %133 = vector.extract_strided_slice %120 {offsets = [0, 16], sizes = [5, 8], strides = [1, 1]} : vector<5x32xbf16> to vector<5x8xbf16>
    %134 = vector.extract_strided_slice %120 {offsets = [0, 24], sizes = [5, 8], strides = [1, 1]} : vector<5x32xbf16> to vector<5x8xbf16>
    %135 = vector.shape_cast %131 : vector<5x8xbf16> to vector<1x5x8xbf16>
    %136 = vector.shape_cast %132 : vector<5x8xbf16> to vector<1x5x8xbf16>
    %137 = vector.shape_cast %133 : vector<5x8xbf16> to vector<1x5x8xbf16>
    %138 = vector.shape_cast %134 : vector<5x8xbf16> to vector<1x5x8xbf16>
    %139 = tpu.concatenate %135, %136, %137, %138 in 0 : vector<1x5x8xbf16>, vector<1x5x8xbf16>, vector<1x5x8xbf16>, vector<1x5x8xbf16> -> vector<4x5x8xbf16>
    %140 = vector.extract_strided_slice %121 {offsets = [0, 0], sizes = [5, 8], strides = [1, 1]} : vector<5x32xbf16> to vector<5x8xbf16>
    %141 = vector.extract_strided_slice %121 {offsets = [0, 8], sizes = [5, 8], strides = [1, 1]} : vector<5x32xbf16> to vector<5x8xbf16>
    %142 = vector.extract_strided_slice %121 {offsets = [0, 16], sizes = [5, 8], strides = [1, 1]} : vector<5x32xbf16> to vector<5x8xbf16>
    %143 = vector.extract_strided_slice %121 {offsets = [0, 24], sizes = [5, 8], strides = [1, 1]} : vector<5x32xbf16> to vector<5x8xbf16>
    %144 = vector.shape_cast %140 : vector<5x8xbf16> to vector<1x5x8xbf16>
    %145 = vector.shape_cast %141 : vector<5x8xbf16> to vector<1x5x8xbf16>
    %146 = vector.shape_cast %142 : vector<5x8xbf16> to vector<1x5x8xbf16>
    %147 = vector.shape_cast %143 : vector<5x8xbf16> to vector<1x5x8xbf16>
    %148 = tpu.concatenate %144, %145, %146, %147 in 0 : vector<1x5x8xbf16>, vector<1x5x8xbf16>, vector<1x5x8xbf16>, vector<1x5x8xbf16> -> vector<4x5x8xbf16>
    "tpu.trace_start"() <{level = 10 : i32, message = "hqd,hkd->hqk"}> : () -> ()
    %cst_42 = arith.constant dense<0.000000e+00> : vector<4x8x5xf32>
    %149 = tpu.matmul %130, %139, %cst_42 {dimension_numbers = #tpu.dot_dimension_numbers<[2], [2], [1], [1], [0, 0, 0, 1, 1, 1], [0], [0]>} : vector<4x8x8xbf16>, vector<4x5x8xbf16>, vector<4x8x5xf32> -> vector<4x8x5xf32>
    "tpu.trace_stop"() : () -> ()
    %cst_43 = arith.constant dense<0xFF800000> : vector<4x8xf32>
    %150 = vector.multi_reduction <maximumf>, %149, %cst_43 [2] : vector<4x8x5xf32> to vector<4x8xf32>
    %151 = vector.shape_cast %150 : vector<4x8xf32> to vector<4x8x1xf32>
    %152 = vector.broadcast %151 : vector<4x8x1xf32> to vector<4x8x5xf32>
    %153 = arith.subf %149, %152 : vector<4x8x5xf32>
    %154 = math.exp %153 : vector<4x8x5xf32>
    %cst_44 = arith.constant dense<0.000000e+00> : vector<4x8xf32>
    %155 = vector.multi_reduction <add>, %154, %cst_44 [2] : vector<4x8x5xf32> to vector<4x8xf32>
    %156 = vector.shape_cast %155 : vector<4x8xf32> to vector<4x8x1xf32>
    %157 = tpu.reciprocal %156 {approx = true} : vector<4x8x1xf32> -> vector<4x8x1xf32>
    %158 = vector.broadcast %157 : vector<4x8x1xf32> to vector<4x8x5xf32>
    %159 = arith.mulf %154, %158 : vector<4x8x5xf32>
    %160 = arith.truncf %159 : vector<4x8x5xf32> to vector<4x8x5xbf16>
    "tpu.trace_start"() <{level = 10 : i32, message = "hqk,hkd->hqd"}> : () -> ()
    %cst_45 = arith.constant dense<0.000000e+00> : vector<4x8x8xf32>
    %161 = tpu.matmul %160, %148, %cst_45 {dimension_numbers = #tpu.dot_dimension_numbers<[2], [1], [1], [2], [0, 0, 0, 1, 1, 2], [0], [0]>} : vector<4x8x5xbf16>, vector<4x5x8xbf16>, vector<4x8x8xf32> -> vector<4x8x8xf32>
    "tpu.trace_stop"() : () -> ()
    %162 = vector.extract_strided_slice %161 {offsets = [0, 0, 0], sizes = [1, 8, 8], strides = [1, 1, 1]} : vector<4x8x8xf32> to vector<1x8x8xf32>
    %163 = vector.shape_cast %162 : vector<1x8x8xf32> to vector<8x8xf32>
    %164 = vector.extract_strided_slice %161 {offsets = [1, 0, 0], sizes = [1, 8, 8], strides = [1, 1, 1]} : vector<4x8x8xf32> to vector<1x8x8xf32>
    %165 = vector.shape_cast %164 : vector<1x8x8xf32> to vector<8x8xf32>
    %166 = vector.extract_strided_slice %161 {offsets = [2, 0, 0], sizes = [1, 8, 8], strides = [1, 1, 1]} : vector<4x8x8xf32> to vector<1x8x8xf32>
    %167 = vector.shape_cast %166 : vector<1x8x8xf32> to vector<8x8xf32>
    %168 = vector.extract_strided_slice %161 {offsets = [3, 0, 0], sizes = [1, 8, 8], strides = [1, 1, 1]} : vector<4x8x8xf32> to vector<1x8x8xf32>
    %169 = vector.shape_cast %168 : vector<1x8x8xf32> to vector<8x8xf32>
    %170 = tpu.concatenate %163, %165, %167, %169 in 1 : vector<8x8xf32>, vector<8x8xf32>, vector<8x8xf32>, vector<8x8xf32> -> vector<8x32xf32>
    %171 = arith.truncf %170 : vector<8x32xf32> to vector<8x32xbf16>
    %c0_46 = arith.constant 0 : index
    %c0_47 = arith.constant 0 : index
    %172 = vector.load %arg14[%c0_46, %c0_47] : memref<32x32xbf16, #tpu.memory_space<vmem>>, vector<32x32xbf16>
    %cst_48 = arith.constant dense<0.000000e+00> : vector<8x32xf32>
    %173 = tpu.matmul %171, %172, %cst_48 {dimension_numbers = #tpu.dot_dimension_numbers<[1], [0], [0], [1], [0, 0, 1, 1], [], []>} : vector<8x32xbf16>, vector<32x32xbf16>, vector<8x32xf32> -> vector<8x32xf32>
    %c0_49 = arith.constant 0 : index
    %c0_50 = arith.constant 0 : index
    %174 = vector.load %arg15[%c0_49, %c0_50] : memref<1x32xf32, #tpu.memory_space<vmem>>, vector<1x32xf32>
    %175 = vector.broadcast %174 : vector<1x32xf32> to vector<8x32xf32>
    %176 = arith.addf %173, %175 : vector<8x32xf32>
    %177 = arith.addf %102, %176 : vector<8x32xf32>
    %c0_51 = arith.constant 0 : index
    %c0_52 = arith.constant 0 : index
    %178 = vector.load %arg16[%c0_51, %c0_52] : memref<1x32xf32, #tpu.memory_space<vmem>>, vector<1x32xf32>
    %c0_53 = arith.constant 0 : index
    %c0_54 = arith.constant 0 : index
    %179 = vector.load %arg17[%c0_53, %c0_54] : memref<1x32xf32, #tpu.memory_space<vmem>>, vector<1x32xf32>
    %cst_55 = arith.constant dense<0.000000e+00> : vector<8xf32>
    %180 = vector.multi_reduction <add>, %177, %cst_55 [1] : vector<8x32xf32> to vector<8xf32>
    %181 = vector.shape_cast %180 : vector<8xf32> to vector<8x1xf32>
    %cst_56 = arith.constant 3.200000e+01 : f32
    %182 = vector.broadcast %cst_56 : f32 to vector<8x1xf32>
    %183 = arith.divf %181, %182 : vector<8x1xf32>
    %184 = vector.broadcast %183 : vector<8x1xf32> to vector<8x32xf32>
    %185 = arith.subf %177, %184 : vector<8x32xf32>
    %186 = arith.mulf %185, %185 : vector<8x32xf32>
    %cst_57 = arith.constant dense<0.000000e+00> : vector<8xf32>
    %187 = vector.multi_reduction <add>, %186, %cst_57 [1] : vector<8x32xf32> to vector<8xf32>
    %188 = vector.shape_cast %187 : vector<8xf32> to vector<8x1xf32>
    %cst_58 = arith.constant 3.200000e+01 : f32
    %189 = vector.broadcast %cst_58 : f32 to vector<8x1xf32>
    %190 = arith.divf %188, %189 : vector<8x1xf32>
    %191 = vector.broadcast %183 : vector<8x1xf32> to vector<8x32xf32>
    %192 = arith.subf %177, %191 : vector<8x32xf32>
    %cst_59 = arith.constant 9.99999996E-13 : f32
    %193 = vector.broadcast %cst_59 : f32 to vector<8x1xf32>
    %194 = arith.addf %190, %193 : vector<8x1xf32>
    %195 = math.rsqrt %194 : vector<8x1xf32>
    %196 = vector.broadcast %195 : vector<8x1xf32> to vector<8x32xf32>
    %197 = arith.mulf %192, %196 : vector<8x32xf32>
    %198 = vector.broadcast %178 : vector<1x32xf32> to vector<8x32xf32>
    %199 = arith.mulf %197, %198 : vector<8x32xf32>
    %200 = vector.broadcast %179 : vector<1x32xf32> to vector<8x32xf32>
    %201 = arith.addf %199, %200 : vector<8x32xf32>
    %202 = arith.truncf %201 : vector<8x32xf32> to vector<8x32xbf16>
    %c0_60 = arith.constant 0 : index
    %c0_61 = arith.constant 0 : index
    %203 = vector.load %arg18[%c0_60, %c0_61] : memref<32x128xbf16, #tpu.memory_space<vmem>>, vector<32x128xbf16>
    %cst_62 = arith.constant dense<0.000000e+00> : vector<8x128xf32>
    %204 = tpu.matmul %202, %203, %cst_62 {dimension_numbers = #tpu.dot_dimension_numbers<[1], [0], [0], [1], [0, 0, 1, 1], [], []>} : vector<8x32xbf16>, vector<32x128xbf16>, vector<8x128xf32> -> vector<8x128xf32>
    %c0_63 = arith.constant 0 : index
    %c0_64 = arith.constant 0 : index
    %205 = vector.load %arg19[%c0_63, %c0_64] : memref<1x128xf32, #tpu.memory_space<vmem>>, vector<1x128xf32>
    %206 = vector.broadcast %205 : vector<1x128xf32> to vector<8x128xf32>
    %207 = arith.addf %204, %206 : vector<8x128xf32>
    %cst_65 = arith.constant 5.000000e-01 : f32
    %208 = vector.broadcast %cst_65 : f32 to vector<8x128xf32>
    %209 = arith.mulf %208, %207 : vector<8x128xf32>
    %cst_66 = arith.constant 4.471500e-02 : f32
    %210 = vector.broadcast %cst_66 : f32 to vector<8x128xf32>
    %211 = arith.mulf %210, %207 : vector<8x128xf32>
    %212 = arith.mulf %211, %207 : vector<8x128xf32>
    %213 = arith.mulf %212, %207 : vector<8x128xf32>
    %214 = arith.addf %207, %213 : vector<8x128xf32>
    %cst_67 = arith.constant 0.797884583 : f32
    %215 = vector.broadcast %cst_67 : f32 to vector<8x128xf32>
    %216 = arith.mulf %215, %214 : vector<8x128xf32>
    %217 = math.tanh %216 : vector<8x128xf32>
    %cst_68 = arith.constant 1.000000e+00 : f32
    %218 = vector.broadcast %cst_68 : f32 to vector<8x128xf32>
    %219 = arith.addf %218, %217 : vector<8x128xf32>
    %220 = arith.mulf %209, %219 : vector<8x128xf32>
    %221 = arith.truncf %220 : vector<8x128xf32> to vector<8x128xbf16>
    %c0_69 = arith.constant 0 : index
    %c0_70 = arith.constant 0 : index
    %222 = vector.load %arg20[%c0_69, %c0_70] : memref<128x32xbf16, #tpu.memory_space<vmem>>, vector<128x32xbf16>
    %cst_71 = arith.constant dense<0.000000e+00> : vector<8x32xf32>
    %223 = tpu.matmul %221, %222, %cst_71 {dimension_numbers = #tpu.dot_dimension_numbers<[1], [0], [0], [1], [0, 0, 1, 1], [], []>} : vector<8x128xbf16>, vector<128x32xbf16>, vector<8x32xf32> -> vector<8x32xf32>
    %c0_72 = arith.constant 0 : index
    %c0_73 = arith.constant 0 : index
    %224 = vector.load %arg21[%c0_72, %c0_73] : memref<1x32xf32, #tpu.memory_space<vmem>>, vector<1x32xf32>
    %225 = vector.broadcast %224 : vector<1x32xf32> to vector<8x32xf32>
    %226 = arith.addf %223, %225 : vector<8x32xf32>
    %227 = arith.addf %201, %226 : vector<8x32xf32>
    %c0_74 = arith.constant 0 : index
    %c0_75 = arith.constant 0 : index
    %228 = vector.load %arg22[%c0_74, %c0_75] : memref<1x32xf32, #tpu.memory_space<vmem>>, vector<1x32xf32>
    %c0_76 = arith.constant 0 : index
    %c0_77 = arith.constant 0 : index
    %229 = vector.load %arg23[%c0_76, %c0_77] : memref<1x32xf32, #tpu.memory_space<vmem>>, vector<1x32xf32>
    %cst_78 = arith.constant dense<0.000000e+00> : vector<8xf32>
    %230 = vector.multi_reduction <add>, %227, %cst_78 [1] : vector<8x32xf32> to vector<8xf32>
    %231 = vector.shape_cast %230 : vector<8xf32> to vector<8x1xf32>
    %cst_79 = arith.constant 3.200000e+01 : f32
    %232 = vector.broadcast %cst_79 : f32 to vector<8x1xf32>
    %233 = arith.divf %231, %232 : vector<8x1xf32>
    %234 = vector.broadcast %233 : vector<8x1xf32> to vector<8x32xf32>
    %235 = arith.subf %227, %234 : vector<8x32xf32>
    %236 = arith.mulf %235, %235 : vector<8x32xf32>
    %cst_80 = arith.constant dense<0.000000e+00> : vector<8xf32>
    %237 = vector.multi_reduction <add>, %236, %cst_80 [1] : vector<8x32xf32> to vector<8xf32>
    %238 = vector.shape_cast %237 : vector<8xf32> to vector<8x1xf32>
    %cst_81 = arith.constant 3.200000e+01 : f32
    %239 = vector.broadcast %cst_81 : f32 to vector<8x1xf32>
    %240 = arith.divf %238, %239 : vector<8x1xf32>
    %241 = vector.broadcast %233 : vector<8x1xf32> to vector<8x32xf32>
    %242 = arith.subf %227, %241 : vector<8x32xf32>
    %cst_82 = arith.constant 9.99999996E-13 : f32
    %243 = vector.broadcast %cst_82 : f32 to vector<8x1xf32>
    %244 = arith.addf %240, %243 : vector<8x1xf32>
    %245 = math.rsqrt %244 : vector<8x1xf32>
    %246 = vector.broadcast %245 : vector<8x1xf32> to vector<8x32xf32>
    %247 = arith.mulf %242, %246 : vector<8x32xf32>
    %248 = vector.broadcast %228 : vector<1x32xf32> to vector<8x32xf32>
    %249 = arith.mulf %247, %248 : vector<8x32xf32>
    %250 = vector.broadcast %229 : vector<1x32xf32> to vector<8x32xf32>
    %251 = arith.addf %249, %250 : vector<8x32xf32>
    %c0_83 = arith.constant 0 : index
    %c0_84 = arith.constant 0 : index
    %c0_85 = arith.constant 0 : index
    %252 = vector.load %arg24[%c0_83, %c0_84, %c0_85] : memref<1x8x32xf32, #tpu.memory_space<vmem>>, vector<1x8x32xf32>
    %253 = vector.shape_cast %252 : vector<1x8x32xf32> to vector<8x32xf32>
    %254 = vector.shape_cast %251 : vector<8x32xf32> to vector<1x8x32xf32>
    tpu.vector_store %arg24[%c0_83, %c0_84, %c0_85], %254 {strides = array<i32>} : memref<1x8x32xf32, #tpu.memory_space<vmem>>, vector<1x8x32xf32>,
    return
  }
  func.func @transform_0(%arg0: i32) -> (i32, i32, i32) {
    %c0_i32 = arith.constant 0 : i32
    %c0_i32_0 = arith.constant 0 : i32
    %c0_i32_1 = arith.constant 0 : i32
    return %arg0, %c0_i32, %c0_i32_0 : i32, i32, i32
  }
  func.func @transform_1(%arg0: i32) -> (i32, i32, i32) {
    %c0_i32 = arith.constant 0 : i32
    %c0_i32_0 = arith.constant 0 : i32
    %c0_i32_1 = arith.constant 0 : i32
    return %arg0, %c0_i32, %c0_i32_0 : i32, i32, i32
  }
  func.func @transform_2(%arg0: i32) -> (i32, i32, i32) {
    %c0_i32 = arith.constant 0 : i32
    %c0_i32_0 = arith.constant 0 : i32
    %c0_i32_1 = arith.constant 0 : i32
    return %arg0, %c0_i32, %c0_i32_0 : i32, i32, i32
  }
  func.func @transform_3(%arg0: i32) -> (i32, i32) {
    %c0_i32 = arith.constant 0 : i32
    %c0_i32_0 = arith.constant 0 : i32
    %c0_i32_1 = arith.constant 0 : i32
    return %c0_i32, %c0_i32_0 : i32, i32
  }
  func.func @transform_4(%arg0: i32) -> (i32, i32) {
    %c0_i32 = arith.constant 0 : i32
    %c0_i32_0 = arith.constant 0 : i32
    %c0_i32_1 = arith.constant 0 : i32
    return %c0_i32, %c0_i32_0 : i32, i32
  }
  func.func @transform_5(%arg0: i32) -> (i32, i32) {
    %c0_i32 = arith.constant 0 : i32
    %c0_i32_0 = arith.constant 0 : i32
    %c0_i32_1 = arith.constant 0 : i32
    return %c0_i32, %c0_i32_0 : i32, i32
  }
  func.func @transform_6(%arg0: i32) -> (i32, i32) {
    %c0_i32 = arith.constant 0 : i32
    %c0_i32_0 = arith.constant 0 : i32
    %c0_i32_1 = arith.constant 0 : i32
    return %c0_i32, %c0_i32_0 : i32, i32
  }
  func.func @transform_7(%arg0: i32) -> (i32, i32) {
    %c0_i32 = arith.constant 0 : i32
    %c0_i32_0 = arith.constant 0 : i32
    %c0_i32_1 = arith.constant 0 : i32
    return %c0_i32, %c0_i32_0 : i32, i32
  }
  func.func @transform_8(%arg0: i32) -> (i32, i32) {
    %c0_i32 = arith.constant 0 : i32
    %c0_i32_0 = arith.constant 0 : i32
    %c0_i32_1 = arith.constant 0 : i32
    return %c0_i32, %c0_i32_0 : i32, i32
  }
  func.func @transform_9(%arg0: i32) -> (i32, i32) {
    %c0_i32 = arith.constant 0 : i32
    %c0_i32_0 = arith.constant 0 : i32
    %c0_i32_1 = arith.constant 0 : i32
    return %c0_i32, %c0_i32_0 : i32, i32
  }
  func.func @transform_10(%arg0: i32) -> (i32, i32) {
    %c0_i32 = arith.constant 0 : i32
    %c0_i32_0 = arith.constant 0 : i32
    %c0_i32_1 = arith.constant 0 : i32
    return %c0_i32, %c0_i32_0 : i32, i32
  }
  func.func @transform_11(%arg0: i32) -> (i32, i32) {
    %c0_i32 = arith.constant 0 : i32
    %c0_i32_0 = arith.constant 0 : i32
    %c0_i32_1 = arith.constant 0 : i32
    return %c0_i32, %c0_i32_0 : i32, i32
  }
  func.func @transform_12(%arg0: i32) -> (i32, i32) {
    %c0_i32 = arith.constant 0 : i32
    %c0_i32_0 = arith.constant 0 : i32
    %c0_i32_1 = arith.constant 0 : i32
    return %c0_i32, %c0_i32_0 : i32, i32
  }
  func.func @transform_13(%arg0: i32) -> (i32, i32) {
    %c0_i32 = arith.constant 0 : i32
    %c0_i32_0 = arith.constant 0 : i32
    %c0_i32_1 = arith.constant 0 : i32
    return %c0_i32, %c0_i32_0 : i32, i32
  }
  func.func @transform_14(%arg0: i32) -> (i32, i32) {
    %c0_i32 = arith.constant 0 : i32
    %c0_i32_0 = arith.constant 0 : i32
    %c0_i32_1 = arith.constant 0 : i32
    return %c0_i32, %c0_i32_0 : i32, i32
  }
  func.func @transform_15(%arg0: i32) -> (i32, i32) {
    %c0_i32 = arith.constant 0 : i32
    %c0_i32_0 = arith.constant 0 : i32
    %c0_i32_1 = arith.constant 0 : i32
    return %c0_i32, %c0_i32_0 : i32, i32
  }
  func.func @transform_16(%arg0: i32) -> (i32, i32) {
    %c0_i32 = arith.constant 0 : i32
    %c0_i32_0 = arith.constant 0 : i32
    %c0_i32_1 = arith.constant 0 : i32
    return %c0_i32, %c0_i32_0 : i32, i32
  }
  func.func @transform_17(%arg0: i32) -> (i32, i32) {
    %c0_i32 = arith.constant 0 : i32
    %c0_i32_0 = arith.constant 0 : i32
    %c0_i32_1 = arith.constant 0 : i32
    return %c0_i32, %c0_i32_0 : i32, i32
  }
  func.func @transform_18(%arg0: i32) -> (i32, i32) {
    %c0_i32 = arith.constant 0 : i32
    %c0_i32_0 = arith.constant 0 : i32
    %c0_i32_1 = arith.constant 0 : i32
    return %c0_i32, %c0_i32_0 : i32, i32
  }
  func.func @transform_19(%arg0: i32) -> (i32, i32) {
    %c0_i32 = arith.constant 0 : i32
    %c0_i32_0 = arith.constant 0 : i32
    %c0_i32_1 = arith.constant 0 : i32
    return %c0_i32, %c0_i32_0 : i32, i32
  }
  func.func @transform_20(%arg0: i32) -> (i32, i32) {
    %c0_i32 = arith.constant 0 : i32
    %c0_i32_0 = arith.constant 0 : i32
    %c0_i32_1 = arith.constant 0 : i32
    return %c0_i32, %c0_i32_0 : i32, i32
  }
  func.func @transform_21(%arg0: i32) -> (i32, i32) {
    %c0_i32 = arith.constant 0 : i32
    %c0_i32_0 = arith.constant 0 : i32
    %c0_i32_1 = arith.constant 0 : i32
    return %c0_i32, %c0_i32_0 : i32, i32
  }
  func.func @transform_22(%arg0: i32) -> (i32, i32) {
    %c0_i32 = arith.constant 0 : i32
    %c0_i32_0 = arith.constant 0 : i32
    %c0_i32_1 = arith.constant 0 : i32
    return %c0_i32, %c0_i32_0 : i32, i32
  }
  func.func @transform_23(%arg0: i32) -> (i32, i32, i32) {
    %c0_i32 = arith.constant 0 : i32
    %c0_i32_0 = arith.constant 0 : i32
    %c0_i32_1 = arith.constant 0 : i32
    return %arg0, %c0_i32, %c0_i32_0 : i32, i32, i32
  }
}

</mosaic_0001>

<bundles_post_ra>
// kernel: _lambda_.5
= control target key start
LH: loop header
LB: loop body
LE: loop exit
PB: predicated region body
PF: predicated region fallthrough
CT: control target
= control target key end

     0   :  { %s1078_s18 = smov 0   ;;  %s1252_s0 = inlined_call_operand.vmem [shape: f32[2,4,768], index: 0, kind: input, shape index: {}]   ;;  %s1253_s1 = inlined_call_operand.vmem [shape: bf16[768,32], index: 1, kind: input, shape index: {}]   ;;  %s1254_s2 = inlined_call_operand.vmem [shape: f32[1,32], index: 2, kind: input, shape index: {}]   ;;  %s1255_s3 = inlined_call_operand.vmem [shape: f32[1,1,32], index: 3, kind: input, shape index: {}]   ;;  %s1256_s4 = inlined_call_operand.vmem [shape: f32[1,5,32], index: 4, kind: input, shape index: {}]   ;;  %s1257_s5 = inlined_call_operand.vmem [shape: f32[2,5,32], index: 5, kind: output, shape index: {}]  }
   0x1 LB: > { %s781_s19 = sadd.s32 4294967295, %s1046_s18   ;;  %p785_p0 = scmp.ge.s32.totalorder %s1046_s18, 1  ;;  %s1046_s18 = sphi %s1078_s18, %s15_s18  }
   0x2   : > { %p187_p1 = scmp.lt.s32.totalorder %s1046_s18, 3 }
   0x4   : > { %p188_p2 = pnand %p785_p0, %p187_p1 }
   0x5   : > { %p214_p3 = scmp.lt.s32.totalorder (!%p188_p2), %s781_s19, 1 }
   0x6   : > { %191 = sbr.rel (%p188_p2) target bundleno = 211 (0xd3), region = 40 }
   0xb   : > { %v989_v0 = vld [vmem:[%s1253_s1 + $0x38] sm:$0xff]  ;;  %v988_v2 = vld [vmem:[%s1253_s1 + $0x30] sm:$0xff]  ;;  %s1259_s19 = smov (!%p214_p3, %s781_s19), 1  ;;  %v987_v8 = vld [vmem:[%s1253_s1 + $0x28] sm:$0xff]  ;;  %vm722_vm0 = vcmask 1040384   ;;  %vm726_vm1 = vcmask 258048  }
   0xc   : > { %v997_v1 = vld [vmem:[%s1253_s1 + $0x78] sm:$0xff]  ;;  %640 = vmatpush.bf16.msra.mxu0 %v989_v0  ;;  %v996_v3 = vld [vmem:[%s1253_s1 + $0x70] sm:$0xff]  ;;  %s1030_s9 = smul.u32 24, %s1259_s19  ;;  %v995_v9 = vld [vmem:[%s1253_s1 + $0x68] sm:$0xff]  ;;  %s787_s6 = sshll.u32 %s1259_s19, 3 }
   0xd   : > { %653 = vmatpush.bf16.msra.mxu1 %v997_v1  ;;  %v1005_v4 = vld [vmem:[%s1253_s1 + $0xb8] sm:$0xff]  ;;  %v1004_v6 = vld [vmem:[%s1253_s1 + $0xb0] sm:$0xff]  ;;  %v1003_v10 = vld [vmem:[%s1253_s1 + $0xa8] sm:$0xff]  ;;  %s222_s12 = scalar_lea.vmem %s1257_s5, %s787_s6 }
   0xe   : > { %v1013_v5 = vld [vmem:[%s1253_s1 + $0xf8] sm:$0xff]  ;;  %666 = vmatpush.bf16.msra.mxu2 %v1005_v4  ;;  %v1012_v7 = vld [vmem:[%s1253_s1 + $0xf0] sm:$0xff]  ;;  %s218_s22 = scalar_lea.vmem %s1252_s0, %s1030_s9  ;;  %v1011_v11 = vld [vmem:[%s1253_s1 + $0xe8] sm:$0xff] }
   0xf   : > { %679 = vmatpush.bf16.msra.mxu3 %v1013_v5  ;;  %v986_v12 = vld [vmem:[%s1253_s1 + $0x20] sm:$0xff]  ;;  %v224_v17 = vld [vmem:[%s218_s22 + $0x8] sm:$0xff]  ;;  %v985_v18 = vld [vmem:[%s1253_s1 + $0x18] sm:$0xff] }
  0x10   : > { %641 = vmatpush.bf16.msra.mxu0 %v988_v2  ;;  %v994_v13 = vld [vmem:[%s1253_s1 + $0x60] sm:$0xff]  ;;  %v993_v19 = vld [vmem:[%s1253_s1 + $0x58] sm:$0xff]  ;;  %231 = vst [vmem:[#allocation1 + $0x10] ss:$2 sm:$0xff] %v224_v17  ;;  %v984_v22 = vld [vmem:[%s1253_s1 + $0x10] sm:$0xff] }
  0x11   : > { %654 = vmatpush.bf16.msra.mxu1 %v996_v3  ;;  %v223_v14 = vld [vmem:[%s218_s22] sm:$0xff]  ;;  %v1001_v20 = vld [vmem:[%s1253_s1 + $0x98] sm:$0xff]  ;;  %v992_v23 = vld [vmem:[%s1253_s1 + $0x50] sm:$0xff] }
  0x12   : > { %667 = vmatpush.bf16.msra.mxu2 %v1004_v6  ;;  %v1002_v15 = vld [vmem:[%s1253_s1 + $0xa0] sm:$0xff]  ;;  %229 = vst [vmem:[#allocation1] ss:$2 sm:$0xff] %v223_v14  ;;  %v1009_v21 = vld [vmem:[%s1253_s1 + $0xd8] sm:$0xff]  ;;  %v1000_v24 = vld [vmem:[%s1253_s1 + $0x90] sm:$0xff] }
  0x13   : > { %680 = vmatpush.bf16.msra.mxu3 %v1012_v7  ;;  %v1010_v16 = vld [vmem:[%s1253_s1 + $0xe0] sm:$0xff]  ;;  %v225_v25 = vld [vmem:[%s218_s22 + $0x10] sm:$0xff]  ;;  %v983_v27 = vld [vmem:[%s1253_s1 + $0x8] sm:$0xff] }
  0x14   : > { %642 = vmatpush.bf16.msra.mxu0 %v987_v8  ;;  %v1008_v26 = vld [vmem:[%s1253_s1 + $0xd0] sm:$0xff]  ;;  %v991_v28 = vld [vmem:[%s1253_s1 + $0x48] sm:$0xff]  ;;  %233 = vst [vmem:[#allocation1 + $0x20] ss:$2 sm:$0xff] %v225_v25  ;;  %v982_v30 = vld [vmem:[%s1253_s1] sm:$0xff] }
  0x15   : > { %655 = vmatpush.bf16.msra.mxu1 %v995_v9  ;;  %v999_v29 = vld [vmem:[%s1253_s1 + $0x88] sm:$0xff]  ;;  %v990_v31 = vld [vmem:[%s1253_s1 + $0x40] sm:$0xff]  ;;  %v1021_v35 = vld [vmem:[%s1253_s1 + $0x138] sm:$0xff] }
  0x16   : > { %668 = vmatpush.bf16.msra.mxu2 %v1003_v10  ;;  %v1007_v32 = vld [vmem:[%s1253_s1 + $0xc8] sm:$0xff]  ;;  %v1029_v36 = vld [vmem:[%s1253_s1 + $0x178] sm:$0xff]  ;;  %v998_v37 = vld [vmem:[%s1253_s1 + $0x80] sm:$0xff] }
  0x17   : > { %681 = vmatpush.bf16.msra.mxu3 %v1011_v11  ;;  %v236_v40 = vld.sshfl [vmem:[#allocation1 + $0x10] sm:$0xff pattern:$0x75316420]  ;;  %v1006_v41 = vld [vmem:[%s1253_s1 + $0xc0] sm:$0xff]  ;;  %v1019_v47 = vld [vmem:[%s1253_s1 + $0x128] sm:$0xff] }
  0x18   : > { %643 = vmatpush.bf16.msra.mxu0 %v986_v12  ;;  %v237_v42 = vld.sshfl [vmem:[#allocation1 + $0x18] sm:$0xff pattern:$0x75316420]  ;;  %v1020_v43 = vld [vmem:[%s1253_s1 + $0x130] sm:$0xff]  ;;  %v248_v45 = vpack.c.bf16 %v236_v40, %v236_v40  ;;  %v1027_v48 = vld [vmem:[%s1253_s1 + $0x168] sm:$0xff] }
  0x19   : > { %656 = vmatpush.bf16.msra.mxu1 %v994_v13  ;;  %v234_v33 = vld.sshfl [vmem:[#allocation1] sm:$0xff pattern:$0x75316420]  ;;  %v235_v34 = vld.sshfl [vmem:[#allocation1 + $0x8] sm:$0xff pattern:$0x75316420]  ;;  %v249_v46 = vpack.c.bf16 %v237_v42, %v237_v42 }
  0x1a   : > { %669 = vmatpush.bf16.msra.mxu2 %v1002_v15  ;;  %v246_v38 = vpack.c.bf16 %v234_v33, %v234_v33  ;;  %v247_v39 = vpack.c.bf16 %v235_v34, %v235_v34  ;;  %v1028_v44 = vld [vmem:[%s1253_s1 + $0x170] sm:$0xff]  ;;  %v1018_v49 = vld [vmem:[%s1253_s1 + $0x120] sm:$0xff]  ;;  %v1017_v51 = vld [vmem:[%s1253_s1 + $0x118] sm:$0xff] }
  0x1b   : > { %682 = vmatpush.bf16.msra.mxu3 %v1010_v16  ;;  %v1026_v50 = vld [vmem:[%s1253_s1 + $0x160] sm:$0xff]  ;;  %v1025_v52 = vld [vmem:[%s1253_s1 + $0x158] sm:$0xff]  ;;  %v1016_v53 = vld [vmem:[%s1253_s1 + $0x110] sm:$0xff] }
  0x1c   : > { %644 = vmatpush.bf16.msra.mxu0 %v985_v18  ;;  %v1024_v54 = vld [vmem:[%s1253_s1 + $0x150] sm:$0xff]  ;;  %v1015_v55 = vld [vmem:[%s1253_s1 + $0x108] sm:$0xff]  ;;  %v1014_v57 = vld [vmem:[%s1253_s1 + $0x100] sm:$0xff] }
  0x1d   : > { %657 = vmatpush.bf16.msra.mxu1 %v993_v19  ;;  %v1023_v56 = vld [vmem:[%s1253_s1 + $0x148] sm:$0xff]  ;;  %v1022_v58 = vld [vmem:[%s1253_s1 + $0x140] sm:$0xff] }
  0x1e   : > { %670 = vmatpush.bf16.msra.mxu2 %v1001_v20  ;;  %v238_v59 = vld.sshfl [vmem:[#allocation1 + $0x20] sm:$0xff pattern:$0x75316420]  ;;  %v239_v60 = vld.sshfl [vmem:[#allocation1 + $0x28] sm:$0xff pattern:$0x75316420] }
  0x1f   : > { %683 = vmatpush.bf16.msra.mxu3 %v1009_v21  ;;  %v250_v61 = vpack.c.bf16 %v238_v59, %v238_v59  ;;  %v251_v62 = vpack.c.bf16 %v239_v60, %v239_v60  ;;  %v1039_v5 = vld [vmem:[%s1254_s2] ss:$0 sm:$0xff] }
  0x20   : > { %645 = vmatpush.bf16.msra.mxu0 %v984_v22  ;;  %v718_v16 = vld [vmem:[%s1255_s3] sm:$0x1] }
  0x21   : > { %658 = vmatpush.bf16.msra.mxu1 %v992_v23  ;;  %v724_v18 = vld [vmem:[%s1256_s4] sm:$0x1f] }
  0x22   : > { %671 = vmatpush.bf16.msra.mxu2 %v1000_v24 }
  0x23   : > { %684 = vmatpush.bf16.msra.mxu3 %v1008_v26 }
  0x24   : > { %646 = vmatpush.bf16.msra.mxu0 %v983_v27 }
  0x25   : > { %659 = vmatpush.bf16.msra.mxu1 %v991_v28 }
  0x26   : > { %672 = vmatpush.bf16.msra.mxu2 %v999_v29 }
  0x27   : > { %685 = vmatpush.bf16.msra.mxu3 %v1007_v32 }
  0x28   : > { %647 = vmatpush.bf16.msra.mxu0 %v982_v30 }
  0x29   : > { %660 = vmatpush.bf16.msra.mxu1 %v990_v31 }
  0x2a   : > { %673 = vmatpush.bf16.msra.mxu2 %v998_v37 }
  0x2b   : > { %648 = vmatmul.bf16.vlgmr.msra.gmra.mxu0 %v246_v38  ;;  %686 = vmatpush.bf16.msra.mxu3 %v1006_v41 }
  0x2c   : > { %692 = vmatpush.bf16.msrb.mxu0 %v1021_v35  ;;  %661 = vmatmul.bf16.vlgmr.msra.gmra.mxu1 %v247_v39 }
  0x2d   : > { %705 = vmatpush.bf16.msrb.mxu1 %v1029_v36  ;;  %674 = vmatmul.bf16.vlgmr.msra.gmra.mxu2 %v248_v45 }
  0x2e   : > { %687 = vmatmul.bf16.vlgmr.msra.gmra.mxu3 %v249_v46 }
  0x30   : > { %693 = vmatpush.bf16.msrb.mxu0 %v1020_v43 }
  0x31   : > { %706 = vmatpush.bf16.msrb.mxu1 %v1028_v44 }
  0x34   : > { %694 = vmatpush.bf16.msrb.mxu0 %v1019_v47 }
  0x35   : > { %707 = vmatpush.bf16.msrb.mxu1 %v1027_v48 }
  0x38   : > { %695 = vmatpush.bf16.msrb.mxu0 %v1018_v49 }
  0x39   : > { %708 = vmatpush.bf16.msrb.mxu1 %v1026_v50 }
  0x3c   : > { %696 = vmatpush.bf16.msrb.mxu0 %v1017_v51 }
  0x3d   : > { %709 = vmatpush.bf16.msrb.mxu1 %v1025_v52 }
  0x40   : > { %697 = vmatpush.bf16.msrb.mxu0 %v1016_v53 }
  0x41   : > { %710 = vmatpush.bf16.msrb.mxu1 %v1024_v54 }
  0x44   : > { %698 = vmatpush.bf16.msrb.mxu0 %v1015_v55 }
  0x45   : > { %711 = vmatpush.bf16.msrb.mxu1 %v1023_v56 }
  0x48   : > { %699 = vmatpush.bf16.msrb.mxu0 %v1014_v57 }
  0x49   : > { %712 = vmatpush.bf16.msrb.mxu1 %v1022_v58 }
  0x4b   : > { %700 = vmatmul.bf16.vlgmr.msrb.gmra.mxu0 %v250_v61 }
  0x4c   : > { %713 = vmatmul.bf16.vlgmr.msrb.gmra.mxu1 %v251_v62 }
  0xa8   : > { %v649_v63 = vpop.f32.mrf.mxu0 }
  0xa9   : > { %v662_v0 = vpop.f32.mrf.mxu1  ;;  %v650_v6 = vadd.f32 %v1039_v5, %v649_v63 }
  0xab   : > { %v663_v9 = vadd.f32 %v662_v0, %v650_v6 }
  0xb0   : > { %v651_v1 = vpop.f32.mrf.mxu0  ;;  %v675_v3 = vpop.f32.mrf.mxu2 }
  0xb1   : > { %v664_v2 = vpop.f32.mrf.mxu1  ;;  %v688_v4 = vpop.f32.mrf.mxu3  ;;  %v676_v10 = vadd.f32 %v675_v3, %v663_v9 }
  0xb3   : > { %v689_v11 = vadd.f32 %v688_v4, %v676_v10 }
  0xb8   : > { %v677_v7 = vpop.f32.mrf.mxu2 }
  0xb9   : > { %v690_v8 = vpop.f32.mrf.mxu3 }
  0xc8   : > { %v701_v12 = vpop.f32.mrf.mxu0 }
  0xc9   : > { %v714_v13 = vpop.f32.mrf.mxu1  ;;  %v702_v14 = vadd.f32 %v701_v12, %v689_v11 }
  0xcb   : > { %v715_v15 = vadd.f32 %v714_v13, %v702_v14 }
  0xcd   : > { %v720_v17 = vrot.slane %v715_v15, 7 }
  0xcf   : > { %v723_v19 = vsel %vm722_vm0, %v718_v16, %v720_v17 }
  0xd0   : > { %v725_v20 = vadd.f32 %v724_v18, %v723_v19  ;;  %v703_v21 = vpop.f32.mrf.mxu0 }
  0xd1   : > { %v716_v22 = vpop.f32.mrf.mxu1 }
  0xd2   : > { %727 = vst.msk [vmem:[%s222_s12] sm:$0x1f] %vm726_vm1, %v725_v20 }
  0xd3 PF: > { %s15_s18 = sadd.s32 1, %s1046_s18  }
  0xd4   : > { %p12_p4 = scmp.ge.s32.totalorder %s15_s18, 4  }
  0xd6   :  { %14 = sbr.rel (!%p12_p4) target bundleno = 1 (0x1), region = 72 }

// kernel: _lambda_.6
= control target key start
LH: loop header
LB: loop body
LE: loop exit
PB: predicated region body
PF: predicated region fallthrough
CT: control target
= control target key end

     0   :  { %s1262_s25 = smov 0   ;;  %s1413_s0 = inlined_call_operand.vmem [shape: f32[2,5,32], index: 0, kind: input, shape index: {}]   ;;  %s1414_s1 = inlined_call_operand.vmem [shape: f32[1,32], index: 1, kind: input, shape index: {}]   ;;  %s1415_s2 = inlined_call_operand.vmem [shape: f32[1,32], index: 2, kind: input, shape index: {}]   ;;  %s1416_s3 = inlined_call_operand.vmem [shape: bf16[32,96], index: 3, kind: input, shape index: {}]   ;;  %s1417_s4 = inlined_call_operand.vmem [shape: f32[1,96], index: 4, kind: input, shape index: {}]   ;;  %s1418_s5 = inlined_call_operand.vmem [shape: bf16[32,32], index: 5, kind: input, shape index: {}]   ;;  %s1419_s6 = inlined_call_operand.vmem [shape: f32[1,32], index: 6, kind: input, shape index: {}]   ;;  %s1420_s7 = inlined_call_operand.vmem [shape: f32[1,32], index: 7, kind: input, shape index: {}]   ;;  %s1421_s8 = inlined_call_operand.vmem [shape: f32[1,32], index: 8, kind: input, shape index: {}]   ;;  %s1422_s9 = inlined_call_operand.vmem [shape: bf16[32,128], index: 9, kind: input, shape index: {}]   ;;  %s1423_s10 = inlined_call_operand.vmem [shape: f32[1,128], index: 10, kind: input, shape index: {}]   ;;  %s1424_s11 = inlined_call_operand.vmem [shape: bf16[128,32], index: 11, kind: input, shape index: {}]   ;;  %s1425_s12 = inlined_call_operand.vmem [shape: f32[1,32], index: 12, kind: input, shape index: {}]   ;;  %s1426_s13 = inlined_call_operand.vmem [shape: f32[2,5,32], index: 13, kind: output, shape index: {}]  }
   0x1 LB: > { %s1034_s26 = sadd.s32 4294967295, %s1180_s25   ;;  %p1038_p0 = scmp.ge.s32.totalorder %s1180_s25, 1  ;;  %s1180_s25 = sphi %s1262_s25, %s23_s25  }
   0x2   : > { %p386_p1 = scmp.lt.s32.totalorder %s1180_s25, 3 }
   0x4   : > { %p387_p2 = pnand %p1038_p0, %p386_p1 }
   0x5   : > { %p428_p3 = scmp.lt.s32.totalorder (!%p387_p2), %s1034_s26, 1  ;;  %s1183_s24 = smov (!%p387_p2), 104  }
   0x6   : > { %390 = sbr.rel (%p387_p2) target bundleno = 1986 (0x7c2), region = 72  ;;  %s1184_s28 = smov (!%p387_p2), 120  }
   0x7   : > { %s1185_s29 = smov (!%p387_p2), 112   ;;  %s1187_s14 = smov (!%p387_p2), 64  }
   0x8   : > { %s1189_s15 = smov (!%p387_p2), 8   ;;  %s1190_s16 = smov (!%p387_p2), 24  }
   0x9   : > { %s1191_s17 = smov (!%p387_p2), 16  }
   0xb   : > { %s1428_s26 = smov (!%p428_p3, %s1034_s26), 1  ;;  %vm440_vm0 = vcmask 258048   ;;  %v1182_v2 = vmov 32.0   ;;  %v1111_v14 = vld [vmem:[%s1416_s3 + $0x8] sm:$0xff]  ;;  %v1110_v15 = vld [vmem:[%s1416_s3] sm:$0xff]  ;;  %vm499_vm5 = vcmask 261120  }
   0xc   : > { %s1039_s27 = sshll.u32 %s1428_s26, 3  ;;  %1150 = vrcp.f32 %v1182_v2  ;;  %509 = vmatpush.bf16.msra.mxu0 %v1111_v14  ;;  %v1142_v25 = vld [vmem:[%s1414_s1] ss:$0 sm:$0xff]  ;;  %vm537_vm6 = vcmask 64512   ;;  %vm626_vm7 = vcmask 36864   ;;  %vm681_vm8 = vcmask 1041408  }
   0xd   : > { %s431_s30 = scalar_lea.vmem %s1413_s0, %s1039_s27  ;;  %v1143_v28 = vld [vmem:[%s1415_s2] ss:$0 sm:$0xff]  ;;  %vm682_vm9 = vcmask 1042432   ;;  %vm677_vm10 = vcmask 39936   ;;  %vm777_vm11 = vcmask 130048   ;;  %vm779_vm12 = vcmask 195584  }
   0xe   : > { %v1278_v0 = vld [vmem:[%s431_s30] sm:$0x1f]  ;;  %s1186_s30 = smov 96  }
   0xf   : > { %v441_v1 = vsel %vm440_vm0, %v1278_v0, 0.0  ;;  %v1144_v32 = vld [vmem:[%s1417_s4] ss:$0 sm:$0xff] }
  0x10   : > { %442 = vadd.xlane.f32.xlu0 %v441_v1  ;;  %510 = vmatpush.bf16.msra.mxu0 %v1110_v15 }
  0x12   : > { %v1151_v3 = vpop.eup %1150 }
  0x13   : > { %v445_v4 = vmul.f32 32.0, %v1151_v3  ;;  %vm449_vm1 = vweird.f32 %v1151_v3 }
  0x15   : > { %v446_v5 = vsub.f32 1.0, %v445_v4 }
  0x17   : > { %v447_v6 = vmul.f32 %v1151_v3, %v446_v5 }
  0x19   : > { %v448_v7 = vadd.f32 %v1151_v3, %v447_v6 }
  0x1b   : > { %v1282_v8 = vsel %vm449_vm1, %v1151_v3, %v448_v7 }
  0x83   : > { %v443_v9 = vpop.xlane.xlu0 %442 }
  0x84   : > { %v451_v10 = vmul.f32 %v1282_v8, %v443_v9 }
  0x86   : > { %v452_v11 = vsub.f32 %v1278_v0, %v451_v10 }
  0x88   : > { %v453_v12 = vmul.f32 %v452_v11, %v452_v11 }
  0x8a   : > { %v454_v13 = vsel %vm440_vm0, %v453_v12, 0.0 }
  0x8b   : > { %455 = vadd.xlane.f32.xlu0 %v454_v13 }
  0xfe   : > { %v456_v16 = vpop.xlane.xlu0 %455 }
  0xff   : > { %v457_v17 = vmul.f32 %v456_v16, %v1282_v8 }
 0x101   : > { %v458_v18 = vadd.f32 1e-06, %v457_v17 }
 0x103   : > { %1152 = vrsqrt.f32 %v458_v18  ;;  %vm465_vm3 = vweird.f32 %v458_v18 }
 0x109   : > { %v1153_v19 = vpop.eup %1152 }
 0x10a   : > { %v460_v20 = vmul.f32 %v1153_v19, %v458_v18  ;;  %vm466_vm2 = vweird.f32 %v1153_v19 }
 0x10b   : > { %vm467_vm4 = vmor %vm465_vm3, %vm466_vm2 }
 0x10c   : > { %v461_v21 = vmul.f32 %v1153_v19, %v460_v20 }
 0x10e   : > { %v462_v22 = vmul.f32 0.5, %v461_v21 }
 0x110   : > { %v463_v23 = vsub.f32 1.5, %v462_v22 }
 0x112   : > { %v464_v24 = vmul.f32 %v1153_v19, %v463_v23 }
 0x114   : > { %v468_v26 = vsel %vm467_vm4, %v1153_v19, %v464_v24 }
 0x115   : > { %v469_v27 = vmul.f32 %v468_v26, %v452_v11 }
 0x117   : > { %v473_v29 = vmul.f32 %v1142_v25, %v469_v27  ;;  %v1188_v25 = vmov 65535  }
 0x118   : > { %v683_v26 = vsel %vm681_vm8, 4294967295, %v1188_v25  ;;  %v1123_v25 = vld [vmem:[%s1424_s11 + $0x38] sm:$0xff] }
 0x119   : > { %v477_v30 = vadd.f32 %v1143_v28, %v473_v29  ;;  %v684_v28 = vsel %vm682_vm9, %v683_v26, 0 }
 0x11b   : > { %v478_v31 = vpack.c.bf16 %v477_v30, %v477_v30 }
 0x11d   : > { %1049 = vmatmul.msk.bf16.vlgmr.msra.gmra.mxu0 %vm499_vm5, %v478_v31 }
 0x19a   : > { %v512_v33 = vpop.f32.mrf.mxu0 }
 0x19b   : > { %v513_v34 = vadd.f32 %v1144_v32, %v512_v33 }
 0x19d   : > { %v518_v35 = vpack.c.bf16 %v513_v34, %v513_v34  ;;  %v516_v37 = vmul.f32 0.35355338, %v513_v34 }
 0x19f   : > { %531 = vrot.lane.b32.xlu2 %v518_v35, %s1183_s24  ;;  %527 = vrot.lane.b32.xlu1 %v518_v35, %s1184_s28  ;;  %v517_v38 = vpack.c.bf16 %v516_v37, %v516_v37  ;;  %v533_v42 = vunpack.c.l.b16 %v518_v35 }
 0x1a1   : > { %v1307_v43 = vpack.c.b16 %v533_v42, %v533_v42 }
 0x1a2   : > { %v514_v36 = vpop.f32.mrf.mxu0 }
 0x1a7   : > { %529 = vrot.lane.b32.xlu1 %v518_v35, %s1185_s29 }
 0x1af   : > { %520 = vrot.lane.b32.xlu1 %v517_v38, %s1184_s28 }
 0x1f9   : > { %v532_v39 = vpop.permute.xlu2 %531 }
 0x1fa   : > { %v603_v40 = vunpack.c.l.b16 %v532_v39 }
 0x1fc   : > { %v1304_v41 = vpack.c.b16 %v603_v40, %v603_v40 }
 0x1fe   : > { %605 = vrot.lane.b32.xlu1 %v1304_v41, %s1186_s30 }
 0x206   : > { %535 = vrot.lane.b32.xlu1 %v1307_v43, %s1186_s30 }
 0x211   : > { %v528_v44 = vpop.permute.xlu1 %527 }
 0x212   : > { %v557_v45 = vunpack.c.l.b16 %v528_v44 }
 0x214   : > { %v558_v46 = vpack.c.b16 %v557_v45, %v557_v45 }
 0x216   : > { %559 = vrot.lane.b32.xlu2 %v558_v46, %s1186_s30 }
 0x219   : > { %v530_v47 = vpop.permute.xlu1 %529 }
 0x21a   : > { %v580_v48 = vunpack.c.l.b16 %v530_v47 }
 0x21c   : > { %v1310_v49 = vpack.c.b16 %v580_v48, %v580_v48 }
 0x21e   : > { %582 = vrot.lane.b32.xlu0 %v1310_v49, %s1186_s30  ;;  %522 = vrot.lane.b32.xlu2 %v517_v38, %s1185_s29  ;;  %s435_s29 = scalar_lea.vmem %s1426_s13, %s1039_s27 }
 0x221   : > { %v521_v50 = vpop.permute.xlu1 %520 }
 0x226   : > { %524 = vrot.lane.b32.xlu2 %v517_v38, %s1183_s24 }
 0x270   : > { %v560_v51 = vpop.permute.xlu2 %559  ;;  %v606_v52 = vpop.permute.xlu1 %605 }
 0x271   : > { %v565_v53 = vsel %vm537_vm6, %v560_v51, 0  ;;  %v611_v54 = vsel %vm537_vm6, %v606_v52, 0 }
 0x272   : > { %574 = vmatpush.bf16.xpose.msra.mxu2 %v565_v53  ;;  %620 = vmatpush.bf16.xpose.msrb.mxu0 %v611_v54 }
 0x278   : > { %v523_v55 = vpop.permute.xlu2 %522  ;;  %v536_v56 = vpop.permute.xlu1 %535 }
 0x279   : > { %1051 = vmatmul.msk.bf16.vlgmr.msra.gmra.mxu2 %vm537_vm6, %v521_v50  ;;  %v542_v57 = vsel %vm537_vm6, %v536_v56, 0 }
 0x27a   : > { %551 = vmatpush.bf16.xpose.msra.mxu1 %v542_v57 }
 0x280   : > { %v525_v58 = vpop.permute.xlu2 %524 }
 0x281   : > { %1050 = vmatmul.msk.bf16.vlgmr.msra.gmra.mxu1 %vm537_vm6, %v517_v38  ;;  %1053 = vmatmul.msk.bf16.vlgmr.msrb.gmra.mxu0 %vm537_vm6, %v525_v58 }
 0x290   : > { %v583_v59 = vpop.permute.xlu0 %582 }
 0x291   : > { %v588_v60 = vsel %vm537_vm6, %v583_v59, 0 }
 0x292   : > { %597 = vmatpush.bf16.xpose.msra.mxu3 %v588_v60 }
 0x299   : > { %1052 = vmatmul.msk.bf16.vlgmr.msra.gmra.mxu3 %vm537_vm6, %v523_v55 }
 0x2fc   : > { %v576_v61 = vpop.f32.mrf.mxu2 }
 0x2fd   : > { %v630_v62 = vsel %vm626_vm7, %v576_v61, -inf }
 0x2fe   : > { %631 = vmax.xlane.f32.xlu2 %v630_v62  ;;  %v553_v63 = vpop.f32.mrf.mxu1  ;;  %v622_v1 = vpop.f32.mrf.mxu0 }
 0x2ff   : > { %v636_v2 = vsel %vm626_vm7, %v622_v1, -inf  ;;  %v627_v4 = vsel %vm626_vm7, %v553_v63, -inf }
 0x300   : > { %637 = vmax.xlane.f32.xlu1 %v636_v2 }
 0x304   : > { %v578_v3 = vpop.f32.mrf.mxu2 }
 0x305   : > { %v1113_v3 = vld [vmem:[%s1418_s5 + $0x8] sm:$0xff] }
 0x306   : > { %v624_v5 = vpop.f32.mrf.mxu0  ;;  %628 = vmax.xlane.f32.xlu2 %v627_v4  ;;  %v555_v6 = vpop.f32.mrf.mxu1  ;;  %v1112_v4 = vld [vmem:[%s1418_s5] sm:$0xff] }
 0x319   : > { %701 = vrot.lane.b32.xlu1 %v558_v46, %s1187_s14 }
 0x31c   : > { %v599_v7 = vpop.f32.mrf.mxu3 }
 0x31d   : > { %v633_v9 = vsel %vm626_vm7, %v599_v7, -inf }
 0x31e   : > { %634 = vmax.xlane.f32.xlu0 %v633_v9 }
 0x324   : > { %v601_v10 = vpop.f32.mrf.mxu3 }
 0x371   : > { %v632_v11 = vpop.xlane.xlu2 %631 }
 0x372   : > { %v640_v14 = vsub.f32 %v576_v61, %v632_v11 }
 0x373   : > { %v638_v12 = vpop.xlane.xlu1 %637 }
 0x374   : > { %v642_v13 = vsub.f32 %v622_v1, %v638_v12  ;;  %v645_v16 = vmul.f32 1.442695, %v640_v14 }
 0x376   : > { %v649_v15 = vmul.f32 1.442695, %v642_v13  ;;  %v1145_v13 = vld [vmem:[%s1419_s6] ss:$0 sm:$0xff] }
 0x378   : > { %1154 = vpow2.f32 %v649_v15 }
 0x379   : > { %v629_v17 = vpop.xlane.xlu2 %628  ;;  %1156 = vpow2.f32 %v645_v16 }
 0x37a   : > { %v639_v18 = vsub.f32 %v553_v63, %v629_v17 }
 0x37c   : > { %v643_v19 = vmul.f32 1.442695, %v639_v18 }
 0x37e   : > { %v1155_v20 = vpop.eup %1154  ;;  %1158 = vpow2.f32 %v643_v19 }
 0x37f   : > { %v660_v21 = vsel %vm626_vm7, %v1155_v20, 0.0  ;;  %v1157_v22 = vpop.eup %1156 }
 0x380   : > { %661 = vadd.xlane.f32.xlu0 %v660_v21  ;;  %v654_v27 = vsel %vm626_vm7, %v1157_v22, 0.0 }
 0x384   : > { %v1159_v23 = vpop.eup %1158 }
 0x385   : > { %v651_v24 = vsel %vm626_vm7, %v1159_v23, 0.0 }
 0x386   : > { %652 = vadd.xlane.f32.xlu1 %v651_v24  ;;  %v1115_v24 = vld [vmem:[%s1422_s9 + $0x8] sm:$0xff] }
 0x388   : > { %655 = vadd.xlane.f32.xlu0 %v654_v27 }
 0x38b   : > { %v702_v29 = vpop.permute.xlu1 %701 }
 0x38c   : > { %v707_v30 = vand.u32 %v702_v29, %v684_v28 }
 0x38e   : > { %716 = vmatpush.bf16.msrb.mxu2 %v707_v30 }
 0x391   : > { %v635_v31 = vpop.xlane.xlu0 %634 }
 0x392   : > { %v641_v32 = vsub.f32 %v599_v7, %v635_v31  ;;  %881 = vmatpush.bf16.msra.mxu2 %v1115_v24 }
 0x394   : > { %v647_v33 = vmul.f32 1.442695, %v641_v32 }
 0x396   : > { %1160 = vpow2.f32 %v647_v33 }
 0x39c   : > { %v1161_v34 = vpop.eup %1160  ;;  %743 = vrot.lane.b32.xlu0 %v1304_v41, %s1187_s14 }
 0x39d   : > { %v657_v35 = vsel %vm626_vm7, %v1161_v34, 0.0 }
 0x39e   : > { %658 = vadd.xlane.f32.xlu2 %v657_v35 }
 0x3b6   : > { %722 = vrot.lane.b32.xlu2 %v1310_v49, %s1187_s14 }
 0x3be   : > { %675 = vrot.lane.b32.xlu2 %v1307_v43, %s1187_s14 }
 0x3f3   : > { %v662_v36 = vpop.xlane.xlu0 %661 }
 0x3f9   : > { %v653_v43 = vpop.xlane.xlu1 %652 }
 0x3fb   : > { %v656_v37 = vpop.xlane.xlu0 %655 }
 0x3fc   : > { %1162 = vrcp.f32 %v656_v37 }
 0x3fd   : > { %1164 = vrcp.f32 %v662_v36 }
 0x402   : > { %v1163_v38 = vpop.eup %1162 }
 0x403   : > { %v668_v39 = vmul.f32 %v1163_v38, %v1157_v22  ;;  %v1165_v41 = vpop.eup %1164  ;;  %v1147_v38 = vld [vmem:[%s1421_s8] ss:$0 sm:$0xff] }
 0x404   : > { %v670_v42 = vmul.f32 %v1165_v41, %v1155_v20 }
 0x405   : > { %v672_v40 = vpack.c.bf16 %v668_v39, %v668_v39 }
 0x406   : > { %v674_v47 = vpack.c.bf16 %v670_v42, %v670_v42  ;;  %v1121_v42 = vld [vmem:[%s1424_s11 + $0x28] sm:$0xff] }
 0x407   : > { %1055 = vmatmul.msk.bf16.vlgmr.msrb.gmra.mxu2 %vm677_vm10, %v672_v40 }
 0x40e   : > { %v744_v44 = vpop.permute.xlu0 %743 }
 0x40f   : > { %v749_v45 = vand.u32 %v744_v44, %v684_v28  ;;  %v1120_v44 = vld [vmem:[%s1424_s11 + $0x20] sm:$0xff] }
 0x411   : > { %v659_v46 = vpop.xlane.xlu2 %658  ;;  %758 = vmatpush.bf16.msra.mxu0 %v749_v45  ;;  %v1119_v45 = vld [vmem:[%s1424_s11 + $0x18] sm:$0xff] }
 0x412   : > { %1166 = vrcp.f32 %v659_v46  ;;  %v1118_v46 = vld [vmem:[%s1424_s11 + $0x10] sm:$0xff] }
 0x413   : > { %1168 = vrcp.f32 %v653_v43  ;;  %v1116_v43 = vld [vmem:[%s1424_s11] sm:$0xff] }
 0x414   : > { %1057 = vmatmul.msk.bf16.vlgmr.msra.gmra.mxu0 %vm677_vm10, %v674_v47  ;;  %v1117_v47 = vld [vmem:[%s1424_s11 + $0x8] sm:$0xff] }
 0x418   : > { %v1167_v48 = vpop.eup %1166 }
 0x419   : > { %v669_v49 = vmul.f32 %v1167_v48, %v1161_v34  ;;  %v723_v50 = vpop.permute.xlu2 %722  ;;  %v1169_v53 = vpop.eup %1168  ;;  %v1148_v48 = vld [vmem:[%s1423_s10] ss:$0 sm:$0xff] }
 0x41a   : > { %v728_v51 = vand.u32 %v723_v50, %v684_v28  ;;  %v667_v54 = vmul.f32 %v1169_v53, %v1159_v23 }
 0x41b   : > { %v673_v52 = vpack.c.bf16 %v669_v49, %v669_v49 }
 0x41c   : > { %737 = vmatpush.bf16.msrb.mxu3 %v728_v51  ;;  %v671_v57 = vpack.c.bf16 %v667_v54, %v667_v54 }
 0x41f   : > { %1056 = vmatmul.msk.bf16.vlgmr.msrb.gmra.mxu3 %vm677_vm10, %v673_v52 }
 0x420   : > { %966 = vmatpush.bf16.msra.mxu3 %v1123_v25 }
 0x421   : > { %v676_v55 = vpop.permute.xlu2 %675 }
 0x422   : > { %v686_v56 = vand.u32 %v684_v28, %v676_v55  ;;  %v1122_v28 = vld [vmem:[%s1424_s11 + $0x30] sm:$0xff] }
 0x424   : > { %695 = vmatpush.bf16.msrb.mxu1 %v686_v56  ;;  %967 = vmatpush.bf16.msra.mxu3 %v1122_v28 }
 0x427   : > { %1054 = vmatmul.msk.bf16.vlgmr.msrb.gmra.mxu1 %vm677_vm10, %v671_v57 }
 0x428   : > { %811 = vmatpush.bf16.msra.mxu1 %v1113_v3  ;;  %968 = vmatpush.bf16.msra.mxu3 %v1121_v42 }
 0x42c   : > { %812 = vmatpush.bf16.msra.mxu1 %v1112_v4  ;;  %969 = vmatpush.bf16.msra.mxu3 %v1120_v44 }
 0x430   : > { %970 = vmatpush.bf16.msra.mxu3 %v1119_v45 }
 0x434   : > { %971 = vmatpush.bf16.msra.mxu3 %v1118_v46 }
 0x438   : > { %972 = vmatpush.bf16.msra.mxu3 %v1117_v47 }
 0x43c   : > { %973 = vmatpush.bf16.msra.mxu3 %v1116_v43 }
 0x48a   : > { %v718_v58 = vpop.f32.mrf.mxu2 }
 0x48b   : > { %765 = vrot.lane.b32.xlu0 %v718_v58, %s1189_s15 }
 0x491   : > { %v760_v59 = vpop.f32.mrf.mxu0 }
 0x492   : > { %v720_v60 = vpop.f32.mrf.mxu2 }
 0x493   : > { %773 = vrot.lane.b32.xlu0 %v760_v59, %s1190_s16 }
 0x499   : > { %v762_v61 = vpop.f32.mrf.mxu0 }
 0x4a2   : > { %v739_v62 = vpop.f32.mrf.mxu3 }
 0x4a3   : > { %769 = vrot.lane.b32.xlu2 %v739_v62, %s1191_s17  ;;  %v1149_v62 = vld [vmem:[%s1425_s12] ss:$0 sm:$0xff] }
 0x4a4   : > { %v697_v63 = vpop.f32.mrf.mxu1 }
 0x4aa   : > { %v741_v1 = vpop.f32.mrf.mxu3 }
 0x4ac   : > { %v699_v2 = vpop.f32.mrf.mxu1 }
 0x4fd   : > { %v766_v5 = vpop.permute.xlu0 %765  ;;  %v770_v6 = vpop.permute.xlu2 %769 }
 0x4fe   : > { %v776_v7 = vsel %vm537_vm6, %v697_v63, %v766_v5 }
 0x4ff   : > { %v778_v10 = vsel %vm777_vm11, %v776_v7, %v770_v6 }
 0x505   : > { %v774_v9 = vpop.permute.xlu0 %773 }
 0x506   : > { %v780_v11 = vsel %vm779_vm12, %v778_v10, %v774_v9 }
 0x507   : > { %v781_v12 = vpack.c.bf16 %v780_v11, %v780_v11 }
 0x509   : > { %1066 = vmatmul.msk.bf16.vlgmr.msra.gmra.mxu1 %vm499_vm5, %v781_v12 }
 0x586   : > { %v814_v14 = vpop.f32.mrf.mxu1 }
 0x587   : > { %v815_v15 = vadd.f32 %v1145_v13, %v814_v14 }
 0x589   : > { %v1352_v16 = vadd.f32 %v815_v15, %v1278_v0  ;;  %v1114_v0 = vld [vmem:[%s1422_s9] sm:$0xff] }
 0x58a   : > { %882 = vmatpush.bf16.msra.mxu2 %v1114_v0 }
 0x58b   : > { %v821_v17 = vsel %vm440_vm0, %v1352_v16, 0.0 }
 0x58c   : > { %822 = vadd.xlane.f32.xlu2 %v821_v17 }
 0x58e   : > { %v816_v18 = vpop.f32.mrf.mxu1 }
 0x5ff   : > { %v823_v19 = vpop.xlane.xlu2 %822 }
 0x600   : > { %v824_v20 = vmul.f32 %v823_v19, %v1282_v8 }
 0x602   : > { %v825_v21 = vsub.f32 %v1352_v16, %v824_v20 }
 0x604   : > { %v826_v22 = vmul.f32 %v825_v21, %v825_v21 }
 0x606   : > { %v827_v23 = vsel %vm440_vm0, %v826_v22, 0.0 }
 0x607   : > { %828 = vadd.xlane.f32.xlu0 %v827_v23 }
 0x67a   : > { %v829_v26 = vpop.xlane.xlu0 %828 }
 0x67b   : > { %v830_v27 = vmul.f32 %v829_v26, %v1282_v8  ;;  %v1146_v8 = vld [vmem:[%s1420_s7] ss:$0 sm:$0xff] }
 0x67d   : > { %v831_v29 = vadd.f32 1e-06, %v830_v27 }
 0x67f   : > { %1170 = vrsqrt.f32 %v831_v29  ;;  %vm838_vm14 = vweird.f32 %v831_v29 }
 0x685   : > { %v1171_v30 = vpop.eup %1170 }
 0x686   : > { %v833_v31 = vmul.f32 %v1171_v30, %v831_v29  ;;  %vm839_vm13 = vweird.f32 %v1171_v30 }
 0x687   : > { %vm840_vm15 = vmor %vm838_vm14, %vm839_vm13 }
 0x688   : > { %v834_v32 = vmul.f32 %v1171_v30, %v833_v31 }
 0x68a   : > { %v835_v33 = vmul.f32 0.5, %v834_v32 }
 0x68c   : > { %v836_v34 = vsub.f32 1.5, %v835_v33 }
 0x68e   : > { %v837_v35 = vmul.f32 %v1171_v30, %v836_v34 }
 0x690   : > { %v841_v36 = vsel %vm840_vm15, %v1171_v30, %v837_v35 }
 0x691   : > { %v842_v37 = vmul.f32 %v841_v36, %v825_v21 }
 0x693   : > { %v846_v39 = vmul.f32 %v1146_v8, %v842_v37 }
 0x695   : > { %v850_v40 = vadd.f32 %v1147_v38, %v846_v39 }
 0x697   : > { %v851_v41 = vpack.c.bf16 %v850_v40, %v850_v40 }
 0x699   : > { %1075 = vmatmul.msk.bf16.vlgmr.msra.gmra.mxu2 %vm499_vm5, %v851_v41 }
 0x71c   : > { %v884_v49 = vpop.f32.mrf.mxu2 }
 0x71d   : > { %v885_v50 = vadd.f32 %v1148_v48, %v884_v49 }
 0x71f   : > { %v889_v51 = vmul.f32 0.044715, %v885_v50  ;;  %v888_v58 = vmul.f32 0.5, %v885_v50 }
 0x721   : > { %v890_v52 = vmul.f32 %v889_v51, %v885_v50 }
 0x723   : > { %v891_v53 = vmul.f32 %v890_v52, %v885_v50 }
 0x724   : > { %v886_v54 = vpop.f32.mrf.mxu2 }
 0x725   : > { %v892_v55 = vadd.f32 %v891_v53, %v885_v50 }
 0x727   : > { %v893_v56 = vmul.f32 0.7978846, %v892_v55 }
 0x729   : > { %1172 = vtanh.f32 %v893_v56 }
 0x72f   : > { %v1173_v57 = vpop.eup %1172 }
 0x730   : > { %v895_v59 = vadd.f32 1.0, %v1173_v57 }
 0x732   : > { %v896_v60 = vmul.f32 %v895_v59, %v888_v58 }
 0x734   : > { %v897_v61 = vpack.c.bf16 %v896_v60, %v896_v60 }
 0x736   : > { %974 = vmatmul.bf16.vlgmr.msra.gmra.mxu3 %v897_v61 }
 0x7b9   : > { %v975_v63 = vpop.f32.mrf.mxu3 }
 0x7ba   : > { %v976_v1 = vadd.f32 %v1149_v62, %v975_v63 }
 0x7bc   : > { %v979_v2 = vadd.f32 %v976_v1, %v1352_v16 }
 0x7be   : > { %980 = vst.msk [vmem:[%s435_s29] sm:$0x1f] %vm440_vm0, %v979_v2 }
 0x7c1   : > { %v977_v3 = vpop.f32.mrf.mxu3 }
 0x7c2 PF: > { %s23_s25 = sadd.s32 1, %s1180_s25  }
 0x7c3   : > { %p20_p4 = scmp.ge.s32.totalorder %s23_s25, 4  }
 0x7c5   :  { %22 = sbr.rel (!%p20_p4) target bundleno = 1 (0x1), region = 102 }

// kernel: _lambda_.7
= control target key start
LH: loop header
LB: loop body
LE: loop exit
PB: predicated region body
PF: predicated region fallthrough
CT: control target
= control target key end

     0   :  { %s1362_s18 = smov 0   ;;  %s1523_s0 = inlined_call_operand.vmem [shape: f32[2,5,32], index: 0, kind: input, shape index: {}]   ;;  %s1524_s1 = inlined_call_operand.vmem [shape: f32[1,32], index: 1, kind: input, shape index: {}]   ;;  %s1525_s2 = inlined_call_operand.vmem [shape: f32[1,32], index: 2, kind: input, shape index: {}]   ;;  %s1526_s3 = inlined_call_operand.vmem [shape: bf16[32,96], index: 3, kind: input, shape index: {}]   ;;  %s1527_s4 = inlined_call_operand.vmem [shape: f32[1,96], index: 4, kind: input, shape index: {}]   ;;  %s1528_s5 = inlined_call_operand.vmem [shape: bf16[32,32], index: 5, kind: input, shape index: {}]   ;;  %s1529_s6 = inlined_call_operand.vmem [shape: f32[1,32], index: 6, kind: input, shape index: {}]   ;;  %s1530_s7 = inlined_call_operand.vmem [shape: f32[1,32], index: 7, kind: input, shape index: {}]   ;;  %s1531_s8 = inlined_call_operand.vmem [shape: f32[1,32], index: 8, kind: input, shape index: {}]   ;;  %s1532_s9 = inlined_call_operand.vmem [shape: bf16[32,128], index: 9, kind: input, shape index: {}]   ;;  %s1533_s10 = inlined_call_operand.vmem [shape: f32[1,128], index: 10, kind: input, shape index: {}]   ;;  %s1534_s11 = inlined_call_operand.vmem [shape: bf16[128,32], index: 11, kind: input, shape index: {}]   ;;  %s1535_s12 = inlined_call_operand.vmem [shape: f32[1,32], index: 12, kind: input, shape index: {}]   ;;  %s1536_s13 = inlined_call_operand.vmem [shape: f32[1,32], index: 13, kind: input, shape index: {}]   ;;  %s1537_s14 = inlined_call_operand.vmem [shape: f32[1,32], index: 14, kind: input, shape index: {}]   ;;  %s1538_s15 = inlined_call_operand.vmem [shape: f32[2,5,32], index: 15, kind: output, shape index: {}]  }
   0x1 LB: > { %s1120_s19 = sadd.s32 4294967295, %s1270_s18   ;;  %p1124_p0 = scmp.ge.s32.totalorder %s1270_s18, 1  ;;  %s1270_s18 = sphi %s1362_s18, %s25_s18  }
   0x2   : > { %p436_p1 = scmp.lt.s32.totalorder %s1270_s18, 3 }
   0x4   : > { %p437_p2 = pnand %p1124_p0, %p436_p1 }
   0x5   : > { %p482_p3 = scmp.lt.s32.totalorder (!%p437_p2), %s1120_s19, 1  ;;  %s1273_s22 = smov (!%p437_p2), 104  }
   0x6   : > { %440 = sbr.rel (%p437_p2) target bundleno = 2251 (0x8cb), region = 80  ;;  %s1275_s24 = smov (!%p437_p2), 112  }
   0x7   : > { %s1276_s25 = smov (!%p437_p2), 96   ;;  %s1277_s26 = smov (!%p437_p2), 64  }
   0x8   : > { %s1279_s27 = smov (!%p437_p2), 8   ;;  %s1280_s28 = smov (!%p437_p2), 24  }
   0x9   : > { %s1281_s29 = smov (!%p437_p2), 16  }
   0xb   : > { %s1540_s19 = smov (!%p482_p3, %s1120_s19), 1  ;;  %vm494_vm0 = vcmask 258048   ;;  %v1272_v2 = vmov 32.0   ;;  %v1197_v14 = vld [vmem:[%s1526_s3 + $0x8] sm:$0xff]  ;;  %v1196_v15 = vld [vmem:[%s1526_s3] sm:$0xff]  ;;  %vm553_vm5 = vcmask 261120  }
   0xc   : > { %s1125_s20 = sshll.u32 %s1540_s19, 3  ;;  %1238 = vrcp.f32 %v1272_v2  ;;  %563 = vmatpush.bf16.msra.mxu0 %v1197_v14  ;;  %v1228_v25 = vld [vmem:[%s1524_s1] ss:$0 sm:$0xff]  ;;  %vm591_vm6 = vcmask 64512   ;;  %vm680_vm7 = vcmask 36864   ;;  %vm735_vm8 = vcmask 1041408  }
   0xd   : > { %s485_s23 = scalar_lea.vmem %s1523_s0, %s1125_s20  ;;  %v1229_v28 = vld [vmem:[%s1525_s2] ss:$0 sm:$0xff]  ;;  %vm736_vm9 = vcmask 1042432   ;;  %vm731_vm10 = vcmask 39936   ;;  %vm831_vm11 = vcmask 130048   ;;  %vm833_vm12 = vcmask 195584  }
   0xe   : > { %v1378_v0 = vld [vmem:[%s485_s23] sm:$0x1f]  ;;  %s1274_s23 = smov 120  }
   0xf   : > { %v495_v1 = vsel %vm494_vm0, %v1378_v0, 0.0  ;;  %v1230_v32 = vld [vmem:[%s1527_s4] ss:$0 sm:$0xff] }
  0x10   : > { %496 = vadd.xlane.f32.xlu0 %v495_v1  ;;  %564 = vmatpush.bf16.msra.mxu0 %v1196_v15 }
  0x12   : > { %v1239_v3 = vpop.eup %1238 }
  0x13   : > { %v499_v4 = vmul.f32 32.0, %v1239_v3  ;;  %vm503_vm1 = vweird.f32 %v1239_v3 }
  0x15   : > { %v500_v5 = vsub.f32 1.0, %v499_v4 }
  0x17   : > { %v501_v6 = vmul.f32 %v1239_v3, %v500_v5 }
  0x19   : > { %v502_v7 = vadd.f32 %v1239_v3, %v501_v6 }
  0x1b   : > { %v1382_v8 = vsel %vm503_vm1, %v1239_v3, %v502_v7 }
  0x83   : > { %v497_v9 = vpop.xlane.xlu0 %496 }
  0x84   : > { %v505_v10 = vmul.f32 %v1382_v8, %v497_v9 }
  0x86   : > { %v506_v11 = vsub.f32 %v1378_v0, %v505_v10 }
  0x88   : > { %v507_v12 = vmul.f32 %v506_v11, %v506_v11 }
  0x8a   : > { %v508_v13 = vsel %vm494_vm0, %v507_v12, 0.0 }
  0x8b   : > { %509 = vadd.xlane.f32.xlu0 %v508_v13 }
  0xfe   : > { %v510_v16 = vpop.xlane.xlu0 %509 }
  0xff   : > { %v511_v17 = vmul.f32 %v510_v16, %v1382_v8 }
 0x101   : > { %v512_v18 = vadd.f32 1e-06, %v511_v17 }
 0x103   : > { %1240 = vrsqrt.f32 %v512_v18  ;;  %vm519_vm3 = vweird.f32 %v512_v18 }
 0x109   : > { %v1241_v19 = vpop.eup %1240 }
 0x10a   : > { %v514_v20 = vmul.f32 %v1241_v19, %v512_v18  ;;  %vm520_vm2 = vweird.f32 %v1241_v19 }
 0x10b   : > { %vm521_vm4 = vmor %vm519_vm3, %vm520_vm2 }
 0x10c   : > { %v515_v21 = vmul.f32 %v1241_v19, %v514_v20 }
 0x10e   : > { %v516_v22 = vmul.f32 0.5, %v515_v21 }
 0x110   : > { %v517_v23 = vsub.f32 1.5, %v516_v22 }
 0x112   : > { %v518_v24 = vmul.f32 %v1241_v19, %v517_v23 }
 0x114   : > { %v522_v26 = vsel %vm521_vm4, %v1241_v19, %v518_v24 }
 0x115   : > { %v523_v27 = vmul.f32 %v522_v26, %v506_v11 }
 0x117   : > { %v527_v29 = vmul.f32 %v1228_v25, %v523_v27  ;;  %v1278_v25 = vmov 65535  }
 0x118   : > { %v737_v26 = vsel %vm735_vm8, 4294967295, %v1278_v25  ;;  %v1209_v25 = vld [vmem:[%s1534_s11 + $0x38] sm:$0xff] }
 0x119   : > { %v531_v30 = vadd.f32 %v1229_v28, %v527_v29  ;;  %v738_v28 = vsel %vm736_vm9, %v737_v26, 0 }
 0x11b   : > { %v532_v31 = vpack.c.bf16 %v531_v30, %v531_v30 }
 0x11d   : > { %1135 = vmatmul.msk.bf16.vlgmr.msra.gmra.mxu0 %vm553_vm5, %v532_v31 }
 0x19a   : > { %v566_v33 = vpop.f32.mrf.mxu0 }
 0x19b   : > { %v567_v34 = vadd.f32 %v1230_v32, %v566_v33 }
 0x19d   : > { %v572_v35 = vpack.c.bf16 %v567_v34, %v567_v34  ;;  %v570_v37 = vmul.f32 0.35355338, %v567_v34 }
 0x19f   : > { %585 = vrot.lane.b32.xlu2 %v572_v35, %s1273_s22  ;;  %581 = vrot.lane.b32.xlu1 %v572_v35, %s1274_s23  ;;  %v571_v38 = vpack.c.bf16 %v570_v37, %v570_v37  ;;  %v587_v42 = vunpack.c.l.b16 %v572_v35 }
 0x1a1   : > { %v1407_v43 = vpack.c.b16 %v587_v42, %v587_v42 }
 0x1a2   : > { %v568_v36 = vpop.f32.mrf.mxu0 }
 0x1a7   : > { %583 = vrot.lane.b32.xlu1 %v572_v35, %s1275_s24 }
 0x1af   : > { %574 = vrot.lane.b32.xlu1 %v571_v38, %s1274_s23 }
 0x1f9   : > { %v586_v39 = vpop.permute.xlu2 %585 }
 0x1fa   : > { %v657_v40 = vunpack.c.l.b16 %v586_v39 }
 0x1fc   : > { %v1404_v41 = vpack.c.b16 %v657_v40, %v657_v40 }
 0x1fe   : > { %659 = vrot.lane.b32.xlu1 %v1404_v41, %s1276_s25 }
 0x206   : > { %589 = vrot.lane.b32.xlu1 %v1407_v43, %s1276_s25 }
 0x211   : > { %v582_v44 = vpop.permute.xlu1 %581 }
 0x212   : > { %v611_v45 = vunpack.c.l.b16 %v582_v44 }
 0x214   : > { %v612_v46 = vpack.c.b16 %v611_v45, %v611_v45 }
 0x216   : > { %613 = vrot.lane.b32.xlu2 %v612_v46, %s1276_s25 }
 0x219   : > { %v584_v47 = vpop.permute.xlu1 %583 }
 0x21a   : > { %v634_v48 = vunpack.c.l.b16 %v584_v47 }
 0x21c   : > { %v1410_v49 = vpack.c.b16 %v634_v48, %v634_v48 }
 0x21e   : > { %636 = vrot.lane.b32.xlu0 %v1410_v49, %s1276_s25  ;;  %576 = vrot.lane.b32.xlu2 %v571_v38, %s1275_s24 }
 0x221   : > { %v575_v50 = vpop.permute.xlu1 %574 }
 0x226   : > { %578 = vrot.lane.b32.xlu2 %v571_v38, %s1273_s22  ;;  %s489_s22 = scalar_lea.vmem %s1538_s15, %s1125_s20 }
 0x270   : > { %v614_v51 = vpop.permute.xlu2 %613  ;;  %v660_v52 = vpop.permute.xlu1 %659 }
 0x271   : > { %v619_v53 = vsel %vm591_vm6, %v614_v51, 0  ;;  %v665_v54 = vsel %vm591_vm6, %v660_v52, 0 }
 0x272   : > { %628 = vmatpush.bf16.xpose.msra.mxu2 %v619_v53  ;;  %674 = vmatpush.bf16.xpose.msrb.mxu0 %v665_v54 }
 0x278   : > { %v577_v55 = vpop.permute.xlu2 %576  ;;  %v590_v56 = vpop.permute.xlu1 %589 }
 0x279   : > { %1137 = vmatmul.msk.bf16.vlgmr.msra.gmra.mxu2 %vm591_vm6, %v575_v50  ;;  %v596_v57 = vsel %vm591_vm6, %v590_v56, 0 }
 0x27a   : > { %605 = vmatpush.bf16.xpose.msra.mxu1 %v596_v57 }
 0x280   : > { %v579_v58 = vpop.permute.xlu2 %578 }
 0x281   : > { %1136 = vmatmul.msk.bf16.vlgmr.msra.gmra.mxu1 %vm591_vm6, %v571_v38  ;;  %1139 = vmatmul.msk.bf16.vlgmr.msrb.gmra.mxu0 %vm591_vm6, %v579_v58 }
 0x290   : > { %v637_v59 = vpop.permute.xlu0 %636 }
 0x291   : > { %v642_v60 = vsel %vm591_vm6, %v637_v59, 0 }
 0x292   : > { %651 = vmatpush.bf16.xpose.msra.mxu3 %v642_v60 }
 0x299   : > { %1138 = vmatmul.msk.bf16.vlgmr.msra.gmra.mxu3 %vm591_vm6, %v577_v55 }
 0x2fc   : > { %v630_v61 = vpop.f32.mrf.mxu2 }
 0x2fd   : > { %v684_v62 = vsel %vm680_vm7, %v630_v61, -inf }
 0x2fe   : > { %685 = vmax.xlane.f32.xlu2 %v684_v62  ;;  %v607_v63 = vpop.f32.mrf.mxu1  ;;  %v676_v1 = vpop.f32.mrf.mxu0 }
 0x2ff   : > { %v690_v2 = vsel %vm680_vm7, %v676_v1, -inf  ;;  %v681_v4 = vsel %vm680_vm7, %v607_v63, -inf }
 0x300   : > { %691 = vmax.xlane.f32.xlu1 %v690_v2 }
 0x304   : > { %v632_v3 = vpop.f32.mrf.mxu2 }
 0x305   : > { %v1199_v3 = vld [vmem:[%s1528_s5 + $0x8] sm:$0xff] }
 0x306   : > { %v678_v5 = vpop.f32.mrf.mxu0  ;;  %682 = vmax.xlane.f32.xlu2 %v681_v4  ;;  %v609_v6 = vpop.f32.mrf.mxu1  ;;  %v1198_v4 = vld [vmem:[%s1528_s5] sm:$0xff] }
 0x319   : > { %755 = vrot.lane.b32.xlu1 %v612_v46, %s1277_s26 }
 0x31c   : > { %v653_v7 = vpop.f32.mrf.mxu3 }
 0x31d   : > { %v687_v9 = vsel %vm680_vm7, %v653_v7, -inf }
 0x31e   : > { %688 = vmax.xlane.f32.xlu0 %v687_v9 }
 0x324   : > { %v655_v10 = vpop.f32.mrf.mxu3 }
 0x371   : > { %v686_v11 = vpop.xlane.xlu2 %685 }
 0x372   : > { %v694_v14 = vsub.f32 %v630_v61, %v686_v11 }
 0x373   : > { %v692_v12 = vpop.xlane.xlu1 %691 }
 0x374   : > { %v696_v13 = vsub.f32 %v676_v1, %v692_v12  ;;  %v699_v16 = vmul.f32 1.442695, %v694_v14 }
 0x376   : > { %v703_v15 = vmul.f32 1.442695, %v696_v13  ;;  %v1231_v13 = vld [vmem:[%s1529_s6] ss:$0 sm:$0xff] }
 0x378   : > { %1242 = vpow2.f32 %v703_v15 }
 0x379   : > { %v683_v17 = vpop.xlane.xlu2 %682  ;;  %1244 = vpow2.f32 %v699_v16 }
 0x37a   : > { %v693_v18 = vsub.f32 %v607_v63, %v683_v17 }
 0x37c   : > { %v697_v19 = vmul.f32 1.442695, %v693_v18 }
 0x37e   : > { %v1243_v20 = vpop.eup %1242  ;;  %1246 = vpow2.f32 %v697_v19 }
 0x37f   : > { %v714_v21 = vsel %vm680_vm7, %v1243_v20, 0.0  ;;  %v1245_v22 = vpop.eup %1244 }
 0x380   : > { %715 = vadd.xlane.f32.xlu0 %v714_v21  ;;  %v708_v27 = vsel %vm680_vm7, %v1245_v22, 0.0 }
 0x384   : > { %v1247_v23 = vpop.eup %1246 }
 0x385   : > { %v705_v24 = vsel %vm680_vm7, %v1247_v23, 0.0 }
 0x386   : > { %706 = vadd.xlane.f32.xlu1 %v705_v24  ;;  %v1201_v24 = vld [vmem:[%s1532_s9 + $0x8] sm:$0xff] }
 0x388   : > { %709 = vadd.xlane.f32.xlu0 %v708_v27 }
 0x38b   : > { %v756_v29 = vpop.permute.xlu1 %755 }
 0x38c   : > { %v761_v30 = vand.u32 %v756_v29, %v738_v28 }
 0x38e   : > { %770 = vmatpush.bf16.msrb.mxu2 %v761_v30 }
 0x391   : > { %v689_v31 = vpop.xlane.xlu0 %688 }
 0x392   : > { %v695_v32 = vsub.f32 %v653_v7, %v689_v31  ;;  %935 = vmatpush.bf16.msra.mxu2 %v1201_v24 }
 0x394   : > { %v701_v33 = vmul.f32 1.442695, %v695_v32 }
 0x396   : > { %1248 = vpow2.f32 %v701_v33 }
 0x39c   : > { %v1249_v34 = vpop.eup %1248  ;;  %797 = vrot.lane.b32.xlu0 %v1404_v41, %s1277_s26 }
 0x39d   : > { %v711_v35 = vsel %vm680_vm7, %v1249_v34, 0.0 }
 0x39e   : > { %712 = vadd.xlane.f32.xlu2 %v711_v35 }
 0x3b6   : > { %776 = vrot.lane.b32.xlu2 %v1410_v49, %s1277_s26 }
 0x3be   : > { %729 = vrot.lane.b32.xlu2 %v1407_v43, %s1277_s26 }
 0x3f3   : > { %v716_v36 = vpop.xlane.xlu0 %715 }
 0x3f9   : > { %v707_v43 = vpop.xlane.xlu1 %706 }
 0x3fb   : > { %v710_v37 = vpop.xlane.xlu0 %709 }
 0x3fc   : > { %1250 = vrcp.f32 %v710_v37 }
 0x3fd   : > { %1252 = vrcp.f32 %v716_v36  ;;  %v1232_v36 = vld [vmem:[%s1530_s7] ss:$0 sm:$0xff] }
 0x402   : > { %v1251_v38 = vpop.eup %1250 }
 0x403   : > { %v722_v39 = vmul.f32 %v1251_v38, %v1245_v22  ;;  %v1253_v41 = vpop.eup %1252 }
 0x404   : > { %v724_v42 = vmul.f32 %v1253_v41, %v1243_v20 }
 0x405   : > { %v726_v40 = vpack.c.bf16 %v722_v39, %v722_v39  ;;  %v1233_v39 = vld [vmem:[%s1531_s8] ss:$0 sm:$0xff] }
 0x406   : > { %v728_v47 = vpack.c.bf16 %v724_v42, %v724_v42 }
 0x407   : > { %1141 = vmatmul.msk.bf16.vlgmr.msrb.gmra.mxu2 %vm731_vm10, %v726_v40 }
 0x40e   : > { %v798_v44 = vpop.permute.xlu0 %797 }
 0x40f   : > { %v803_v45 = vand.u32 %v798_v44, %v738_v28  ;;  %v1207_v44 = vld [vmem:[%s1534_s11 + $0x28] sm:$0xff] }
 0x411   : > { %v713_v46 = vpop.xlane.xlu2 %712  ;;  %812 = vmatpush.bf16.msra.mxu0 %v803_v45  ;;  %v1206_v45 = vld [vmem:[%s1534_s11 + $0x20] sm:$0xff] }
 0x412   : > { %1254 = vrcp.f32 %v713_v46  ;;  %v1205_v46 = vld [vmem:[%s1534_s11 + $0x18] sm:$0xff] }
 0x413   : > { %1256 = vrcp.f32 %v707_v43  ;;  %v1203_v43 = vld [vmem:[%s1534_s11 + $0x8] sm:$0xff] }
 0x414   : > { %1143 = vmatmul.msk.bf16.vlgmr.msra.gmra.mxu0 %vm731_vm10, %v728_v47  ;;  %v1204_v47 = vld [vmem:[%s1534_s11 + $0x10] sm:$0xff] }
 0x418   : > { %v1255_v48 = vpop.eup %1254 }
 0x419   : > { %v723_v49 = vmul.f32 %v1255_v48, %v1249_v34  ;;  %v777_v50 = vpop.permute.xlu2 %776  ;;  %v1257_v53 = vpop.eup %1256  ;;  %v1202_v48 = vld [vmem:[%s1534_s11] sm:$0xff] }
 0x41a   : > { %v782_v51 = vand.u32 %v777_v50, %v738_v28  ;;  %v721_v54 = vmul.f32 %v1257_v53, %v1247_v23 }
 0x41b   : > { %v727_v52 = vpack.c.bf16 %v723_v49, %v723_v49  ;;  %v1234_v49 = vld [vmem:[%s1533_s10] ss:$0 sm:$0xff] }
 0x41c   : > { %791 = vmatpush.bf16.msrb.mxu3 %v782_v51  ;;  %v725_v57 = vpack.c.bf16 %v721_v54, %v721_v54 }
 0x41f   : > { %1142 = vmatmul.msk.bf16.vlgmr.msrb.gmra.mxu3 %vm731_vm10, %v727_v52 }
 0x420   : > { %1020 = vmatpush.bf16.msra.mxu3 %v1209_v25 }
 0x421   : > { %v730_v55 = vpop.permute.xlu2 %729 }
 0x422   : > { %v740_v56 = vand.u32 %v738_v28, %v730_v55  ;;  %v1208_v28 = vld [vmem:[%s1534_s11 + $0x30] sm:$0xff] }
 0x424   : > { %749 = vmatpush.bf16.msrb.mxu1 %v740_v56  ;;  %1021 = vmatpush.bf16.msra.mxu3 %v1208_v28 }
 0x427   : > { %1140 = vmatmul.msk.bf16.vlgmr.msrb.gmra.mxu1 %vm731_vm10, %v725_v57 }
 0x428   : > { %865 = vmatpush.bf16.msra.mxu1 %v1199_v3  ;;  %1022 = vmatpush.bf16.msra.mxu3 %v1207_v44 }
 0x42c   : > { %866 = vmatpush.bf16.msra.mxu1 %v1198_v4  ;;  %1023 = vmatpush.bf16.msra.mxu3 %v1206_v45 }
 0x430   : > { %1024 = vmatpush.bf16.msra.mxu3 %v1205_v46 }
 0x434   : > { %1025 = vmatpush.bf16.msra.mxu3 %v1204_v47 }
 0x438   : > { %1026 = vmatpush.bf16.msra.mxu3 %v1203_v43 }
 0x43c   : > { %1027 = vmatpush.bf16.msra.mxu3 %v1202_v48 }
 0x48a   : > { %v772_v58 = vpop.f32.mrf.mxu2 }
 0x48b   : > { %819 = vrot.lane.b32.xlu0 %v772_v58, %s1279_s27 }
 0x491   : > { %v814_v59 = vpop.f32.mrf.mxu0 }
 0x492   : > { %v774_v60 = vpop.f32.mrf.mxu2 }
 0x493   : > { %827 = vrot.lane.b32.xlu0 %v814_v59, %s1280_s28 }
 0x499   : > { %v816_v61 = vpop.f32.mrf.mxu0 }
 0x4a2   : > { %v793_v62 = vpop.f32.mrf.mxu3 }
 0x4a3   : > { %823 = vrot.lane.b32.xlu2 %v793_v62, %s1281_s29 }
 0x4a4   : > { %v751_v63 = vpop.f32.mrf.mxu1 }
 0x4aa   : > { %v795_v1 = vpop.f32.mrf.mxu3 }
 0x4ac   : > { %v753_v2 = vpop.f32.mrf.mxu1 }
 0x4fd   : > { %v820_v5 = vpop.permute.xlu0 %819  ;;  %v824_v6 = vpop.permute.xlu2 %823 }
 0x4fe   : > { %v830_v7 = vsel %vm591_vm6, %v751_v63, %v820_v5  ;;  %v1235_v63 = vld [vmem:[%s1535_s12] ss:$0 sm:$0xff] }
 0x4ff   : > { %v832_v10 = vsel %vm831_vm11, %v830_v7, %v824_v6 }
 0x505   : > { %v828_v9 = vpop.permute.xlu0 %827 }
 0x506   : > { %v834_v11 = vsel %vm833_vm12, %v832_v10, %v828_v9 }
 0x507   : > { %v835_v12 = vpack.c.bf16 %v834_v11, %v834_v11 }
 0x509   : > { %1152 = vmatmul.msk.bf16.vlgmr.msra.gmra.mxu1 %vm553_vm5, %v835_v12 }
 0x586   : > { %v868_v14 = vpop.f32.mrf.mxu1 }
 0x587   : > { %v869_v15 = vadd.f32 %v1231_v13, %v868_v14 }
 0x589   : > { %v1452_v16 = vadd.f32 %v869_v15, %v1378_v0  ;;  %v1200_v0 = vld [vmem:[%s1532_s9] sm:$0xff] }
 0x58a   : > { %936 = vmatpush.bf16.msra.mxu2 %v1200_v0 }
 0x58b   : > { %v875_v17 = vsel %vm494_vm0, %v1452_v16, 0.0 }
 0x58c   : > { %876 = vadd.xlane.f32.xlu2 %v875_v17 }
 0x58e   : > { %v870_v18 = vpop.f32.mrf.mxu1 }
 0x5ff   : > { %v877_v19 = vpop.xlane.xlu2 %876 }
 0x600   : > { %v878_v20 = vmul.f32 %v877_v19, %v1382_v8 }
 0x602   : > { %v879_v21 = vsub.f32 %v1452_v16, %v878_v20 }
 0x604   : > { %v880_v22 = vmul.f32 %v879_v21, %v879_v21 }
 0x606   : > { %v881_v23 = vsel %vm494_vm0, %v880_v22, 0.0 }
 0x607   : > { %882 = vadd.xlane.f32.xlu0 %v881_v23 }
 0x67a   : > { %v883_v26 = vpop.xlane.xlu0 %882 }
 0x67b   : > { %v884_v27 = vmul.f32 %v883_v26, %v1382_v8 }
 0x67d   : > { %v885_v29 = vadd.f32 1e-06, %v884_v27 }
 0x67f   : > { %1258 = vrsqrt.f32 %v885_v29  ;;  %vm892_vm14 = vweird.f32 %v885_v29 }
 0x685   : > { %v1259_v30 = vpop.eup %1258 }
 0x686   : > { %v887_v31 = vmul.f32 %v1259_v30, %v885_v29  ;;  %vm893_vm13 = vweird.f32 %v1259_v30 }
 0x687   : > { %vm894_vm15 = vmor %vm892_vm14, %vm893_vm13 }
 0x688   : > { %v888_v32 = vmul.f32 %v1259_v30, %v887_v31 }
 0x68a   : > { %v889_v33 = vmul.f32 0.5, %v888_v32 }
 0x68c   : > { %v890_v34 = vsub.f32 1.5, %v889_v33 }
 0x68e   : > { %v891_v35 = vmul.f32 %v1259_v30, %v890_v34 }
 0x690   : > { %v895_v37 = vsel %vm894_vm15, %v1259_v30, %v891_v35 }
 0x691   : > { %v896_v38 = vmul.f32 %v895_v37, %v879_v21  ;;  %v1236_v21 = vld [vmem:[%s1536_s13] ss:$0 sm:$0xff] }
 0x693   : > { %v900_v40 = vmul.f32 %v1232_v36, %v896_v38 }
 0x695   : > { %v904_v41 = vadd.f32 %v1233_v39, %v900_v40 }
 0x697   : > { %v905_v42 = vpack.c.bf16 %v904_v41, %v904_v41 }
 0x699   : > { %1161 = vmatmul.msk.bf16.vlgmr.msra.gmra.mxu2 %vm553_vm5, %v905_v42 }
 0x71c   : > { %v938_v50 = vpop.f32.mrf.mxu2 }
 0x71d   : > { %v939_v51 = vadd.f32 %v1234_v49, %v938_v50 }
 0x71f   : > { %v943_v52 = vmul.f32 0.044715, %v939_v51  ;;  %v942_v59 = vmul.f32 0.5, %v939_v51 }
 0x721   : > { %v944_v53 = vmul.f32 %v943_v52, %v939_v51 }
 0x723   : > { %v945_v54 = vmul.f32 %v944_v53, %v939_v51 }
 0x724   : > { %v940_v55 = vpop.f32.mrf.mxu2 }
 0x725   : > { %v946_v56 = vadd.f32 %v945_v54, %v939_v51 }
 0x727   : > { %v947_v57 = vmul.f32 0.7978846, %v946_v56 }
 0x729   : > { %1260 = vtanh.f32 %v947_v57 }
 0x72f   : > { %v1261_v58 = vpop.eup %1260 }
 0x730   : > { %v949_v60 = vadd.f32 1.0, %v1261_v58 }
 0x732   : > { %v950_v61 = vmul.f32 %v949_v60, %v942_v59 }
 0x734   : > { %v951_v62 = vpack.c.bf16 %v950_v61, %v950_v61 }
 0x736   : > { %1028 = vmatmul.bf16.vlgmr.msra.gmra.mxu3 %v951_v62 }
 0x7b9   : > { %v1029_v1 = vpop.f32.mrf.mxu3 }
 0x7ba   : > { %v1030_v2 = vadd.f32 %v1235_v63, %v1029_v1 }
 0x7bc   : > { %v1033_v3 = vadd.f32 %v1030_v2, %v1452_v16 }
 0x7be   : > { %v1036_v4 = vsel %vm494_vm0, %v1033_v3, 0.0 }
 0x7bf   : > { %1037 = vadd.xlane.f32.xlu1 %v1036_v4 }
 0x7c1   : > { %v1031_v5 = vpop.f32.mrf.mxu3 }
 0x832   : > { %v1038_v6 = vpop.xlane.xlu1 %1037 }
 0x833   : > { %v1039_v7 = vmul.f32 %v1038_v6, %v1382_v8 }
 0x835   : > { %v1040_v9 = vsub.f32 %v1033_v3, %v1039_v7 }
 0x837   : > { %v1041_v10 = vmul.f32 %v1040_v9, %v1040_v9 }
 0x839   : > { %v1042_v11 = vsel %vm494_vm0, %v1041_v10, 0.0 }
 0x83a   : > { %1043 = vadd.xlane.f32.xlu1 %v1042_v11 }
 0x8ad   : > { %v1044_v12 = vpop.xlane.xlu1 %1043 }
 0x8ae   : > { %v1045_v13 = vmul.f32 %v1044_v12, %v1382_v8  ;;  %v1237_v8 = vld [vmem:[%s1537_s14] ss:$0 sm:$0xff] }
 0x8b0   : > { %v1046_v14 = vadd.f32 1e-06, %v1045_v13 }
 0x8b2   : > { %1262 = vrsqrt.f32 %v1046_v14  ;;  %vm1053_vm2 = vweird.f32 %v1046_v14 }
 0x8b8   : > { %v1263_v15 = vpop.eup %1262 }
 0x8b9   : > { %v1048_v16 = vmul.f32 %v1263_v15, %v1046_v14  ;;  %vm1054_vm1 = vweird.f32 %v1263_v15 }
 0x8ba   : > { %vm1055_vm3 = vmor %vm1053_vm2, %vm1054_vm1 }
 0x8bb   : > { %v1049_v17 = vmul.f32 %v1263_v15, %v1048_v16 }
 0x8bd   : > { %v1050_v18 = vmul.f32 0.5, %v1049_v17 }
 0x8bf   : > { %v1051_v19 = vsub.f32 1.5, %v1050_v18 }
 0x8c1   : > { %v1052_v20 = vmul.f32 %v1263_v15, %v1051_v19 }
 0x8c3   : > { %v1056_v22 = vsel %vm1055_vm3, %v1263_v15, %v1052_v20 }
 0x8c4   : > { %v1057_v23 = vmul.f32 %v1056_v22, %v1040_v9 }
 0x8c6   : > { %v1061_v24 = vmul.f32 %v1236_v21, %v1057_v23 }
 0x8c8   : > { %v1065_v0 = vadd.f32 %v1237_v8, %v1061_v24 }
 0x8ca   : > { %1066 = vst.msk [vmem:[%s489_s22] sm:$0x1f] %vm494_vm0, %v1065_v0 }
 0x8cb PF: > { %s25_s18 = sadd.s32 1, %s1270_s18  }
 0x8cc   : > { %p22_p4 = scmp.ge.s32.totalorder %s25_s18, 4  }
 0x8ce   :  { %24 = sbr.rel (!%p22_p4) target bundleno = 1 (0x1), region = 110 }

// kernel: _lambda_.8
= control target key start
LH: loop header
LB: loop body
LE: loop exit
PB: predicated region body
PF: predicated region fallthrough
CT: control target
= control target key end

     0   :  { %s3333_s0 = inlined_call_operand.vmem [shape: f32[2,8,32], index: 0, kind: input, shape index: {}]   ;;  %s3334_s1 = inlined_call_operand.vmem [shape: f32[2,5,32], index: 1, kind: input, shape index: {}]   ;;  %s3335_s2 = inlined_call_operand.vmem [shape: f32[2,1,8], index: 2, kind: input, shape index: {}]   ;;  %s3336_s3 = inlined_call_operand.vmem [shape: bf16[32,96], index: 3, kind: input, shape index: {}]   ;;  %s3337_s4 = inlined_call_operand.hbm [shape: f32[1,96], index: 4, kind: input, shape index: {}]   ;;  %s3338_s5 = inlined_call_operand.vmem [shape: bf16[32,32], index: 5, kind: input, shape index: {}]   ;;  %s3339_s6 = inlined_call_operand.hbm [shape: f32[1,32], index: 6, kind: input, shape index: {}]   ;;  %s3340_s7 = inlined_call_operand.hbm [shape: f32[1,32], index: 7, kind: input, shape index: {}]   ;;  %s3341_s8 = inlined_call_operand.hbm [shape: f32[1,32], index: 8, kind: input, shape index: {}]   ;;  %s3342_s9 = inlined_call_operand.vmem [shape: bf16[32,32], index: 9, kind: input, shape index: {}]   ;;  %s3343_s10 = inlined_call_operand.hbm [shape: f32[1,32], index: 10, kind: input, shape index: {}]   ;;  %s3344_s11 = inlined_call_operand.vmem [shape: bf16[32,64], index: 11, kind: input, shape index: {}]   ;;  %s3345_s12 = inlined_call_operand.hbm [shape: f32[1,64], index: 12, kind: input, shape index: {}]   ;;  %s3346_s13 = inlined_call_operand.vmem [shape: bf16[32,32], index: 13, kind: input, shape index: {}]   ;;  %s3347_s14 = inlined_call_operand.hbm [shape: f32[1,32], index: 14, kind: input, shape index: {}]   ;;  %s3348_s15 = inlined_call_operand.hbm [shape: f32[1,32], index: 15, kind: input, shape index: {}]   ;;  %s3349_s16 = inlined_call_operand.hbm [shape: f32[1,32], index: 16, kind: input, shape index: {}]   ;;  %s3350_s17 = inlined_call_operand.vmem [shape: bf16[32,128], index: 17, kind: input, shape index: {}]   ;;  %s3351_s18 = inlined_call_operand.hbm [shape: f32[1,128], index: 18, kind: input, shape index: {}]   ;;  %s3352_s19 = inlined_call_operand.vmem [shape: bf16[128,32], index: 19, kind: input, shape index: {}]   ;;  %s3353_s20 = inlined_call_operand.hbm [shape: f32[1,32], index: 20, kind: input, shape index: {}]   ;;  %s3354_s21 = inlined_call_operand.hbm [shape: f32[1,32], index: 21, kind: input, shape index: {}]   ;;  %s3355_s22 = inlined_call_operand.hbm [shape: f32[1,32], index: 22, kind: input, shape index: {}]   ;;  %s3356_s23 = inlined_call_operand.vmem [shape: f32[2,8,32], index: 23, kind: output, shape index: {}]  }
   0x1   :  { %3360 = sst [smem:[#allocation30_spill]] %s3333_s0 }
   0x2   :  { %3361 = sst [smem:[#allocation31_spill]] %s3334_s1 }
   0x3   :  { %3362 = sst [smem:[#allocation32_spill]] %s3335_s2 }
   0x4   :  { %3363 = sst [smem:[#allocation33_spill]] %s3336_s3 }
   0x5   :  { %3364 = sst [smem:[#allocation34_spill]] %s3337_s4 }
   0x6   :  { %3365 = sst [smem:[#allocation35_spill]] %s3338_s5 }
   0x7   :  { %3366 = sst [smem:[#allocation36_spill]] %s3339_s6 }
   0x8   :  { %3367 = sst [smem:[#allocation37_spill]] %s3340_s7 }
   0x9   :  { %3368 = sst [smem:[#allocation38_spill]] %s3341_s8 }
   0xa   :  { %3369 = sst [smem:[#allocation39_spill]] %s3345_s12 }
   0xb   :  { %3370 = sst [smem:[#allocation40_spill]] %s3348_s15 }
   0xc   :  { %28 = vsyncpa [#allocation3], 0 }
   0xd   :  { %29 = vsyncpa [#allocation5], 0 }
   0xe   :  { %30 = vsyncpa [#allocation8], 0 }
   0xf   :  { %31 = vsyncpa [#allocation11], 0 }
  0x10   :  { %32 = vsyncpa [#allocation14], 0 }
  0x11   :  { %33 = vsyncpa [#allocation17], 0 }
  0x12   :  { %34 = vsyncpa [#allocation20], 0  ;;  %s2999_s4 = smov 0  }
  0x13 LB: > { %3371 = sst [smem:[#allocation29_spill]] %s2854_s4  ;;  %s3008_s1 = sadd.s32 4294967295, %s2854_s4   ;;  %s2854_s4 = sphi %s2999_s4, %s40_s4  }
  0x14   : > { %s3372_s25 = sld [smem:[#allocation36_spill]]  ;;  %p2069_p0 = scmp.ge.s32.totalorder %s2854_s4, 1 }
  0x15   : > { %p569_p1 = scmp.lt.s32.totalorder %s2854_s4, 3  ;;  %p2317_p2 = scmp.eq.s32.totalorder %s3008_s1, 0 }
  0x16   : > { %s2856_s2 = smov [#allocation4]   ;;  %s3374_s8 = sld [smem:[#allocation38_spill]] }
  0x17   : > { %p3013_p3 = pnand %p2069_p0, %p569_p1  ;;  %s601_s6 = sshll.u32 %s2856_s2, 4  ;;  %s602_s6 = int_to_ptr.vmem [resolvable:$true] %s601_s6 }
  0x18   : > { %s3375_s12 = sld [smem:[#allocation39_spill]]  ;;  %s2857_s24 = smov [#allocation7]  }
  0x19   : > { %p2277_p4 = pneg %p3013_p3  ;;  %s2858_s2 = smov [#allocation10]  }
  0x1a   : > { %s599_s5 = sshll.u32 %s3372_s25, 4  ;;  %s625_s25 = sshll.u32 %s2857_s24, 4  ;;  %s600_s5 = int_to_ptr.hbm [resolvable:$true] %s599_s5  ;;  %s626_s25 = int_to_ptr.vmem [resolvable:$true] %s625_s25 }
  0x1b   : > { %p3027_p5 = pnand %p2317_p2, %p2277_p4  ;;  %s655_s27 = sshll.u32 %s2858_s2, 4  ;;  %s656_s27 = int_to_ptr.vmem [resolvable:$true] %s655_s27 }
  0x1c   : > { %s623_s28 = sshll.u32 %s3374_s8, 4  ;;  %s3377_s15 = sld [smem:[#allocation40_spill]]  ;;  %s624_s28 = int_to_ptr.hbm [resolvable:$true] %s623_s28 }
  0x1d   : > { %2283 = dma.hbm_to_vmem [thread:$0]  (!%p3027_p5), %s600_s5, 16, %s602_s6, [#allocation5]  }
  0x1e   : > { %s653_s0 = sshll.u32 %s3375_s12, 4  ;;  %s707_s12 = sshll.u32 %s3351_s18, 4  ;;  %s654_s0 = int_to_ptr.hbm [resolvable:$true] %s653_s0  ;;  %s708_s12 = int_to_ptr.hbm [resolvable:$true] %s707_s12 }
  0x1f   : > { %2289 = dma.hbm_to_vmem [thread:$0]  (!%p3027_p5), %s624_s28, 16, %s626_s25, [#allocation8]  }
  0x20   : > { %2295 = dma.hbm_to_vmem [thread:$0]  (!%p3027_p5), %s654_s0, 16, %s656_s27, [#allocation11]  }
  0x21   : > { %s2859_s4 = smov [#allocation13]   ;;  %s2860_s6 = smov [#allocation16]  }
  0x22   : > { %s680_s3 = sshll.u32 %s3377_s15, 4  ;;  %s682_s5 = sshll.u32 %s2859_s4, 4  ;;  %s681_s3 = int_to_ptr.hbm [resolvable:$true] %s680_s3  ;;  %s683_s5 = int_to_ptr.vmem [resolvable:$true] %s682_s5 }
  0x23   : > { %2301 = dma.hbm_to_vmem [thread:$0]  (!%p3027_p5), %s681_s3, 16, %s683_s5, [#allocation14]  }
  0x24   : > { %s709_s28 = sshll.u32 %s2860_s6, 4  ;;  %s734_s7 = sshll.u32 %s3354_s21, 4  ;;  %s710_s28 = int_to_ptr.vmem [resolvable:$true] %s709_s28  ;;  %s735_s7 = int_to_ptr.hbm [resolvable:$true] %s734_s7 }
  0x25   : > { %2307 = dma.hbm_to_vmem [thread:$0]  (!%p3027_p5), %s708_s12, 16, %s710_s28, [#allocation17]  }
  0x26   : > { %s3378_s27 = sld [smem:[#allocation34_spill]]  ;;  %s2861_s4 = smov [#allocation19]  }
  0x27   : > { %s736_s24 = sshll.u32 %s2861_s4, 4  ;;  %s2862_s3 = smov [#allocation2]   ;;  %s737_s24 = int_to_ptr.vmem [resolvable:$true] %s736_s24 }
  0x28   : > { %2313 = dma.hbm_to_vmem [thread:$0]  (!%p3027_p5), %s735_s7, 16, %s737_s24, [#allocation20]  }
  0x29   : > { %s586_s5 = sshll.u32 %s2862_s3, 4  ;;  %s3379_s2 = sld [smem:[#allocation37_spill]]  ;;  %s587_s5 = int_to_ptr.vmem [resolvable:$true] %s586_s5 }
  0x2a   : > { %s638_s8 = sshll.u32 %s3343_s10, 4  ;;  %s2863_s0 = smov [#allocation6]   ;;  %s639_s8 = int_to_ptr.hbm [resolvable:$true] %s638_s8 }
  0x2b   : > { %s2864_s7 = smov [#allocation9]   ;;  %s668_s6 = sshll.u32 %s3347_s14, 4  ;;  %s669_s6 = int_to_ptr.hbm [resolvable:$true] %s668_s6 }
  0x2c   : > { %s584_s29 = sshll.u32 %s3378_s27, 4  ;;  %s613_s27 = sshll.u32 %s2863_s0, 4  ;;  %s585_s29 = int_to_ptr.hbm [resolvable:$true] %s584_s29  ;;  %s614_s27 = int_to_ptr.vmem [resolvable:$true] %s613_s27 }
  0x2d   : > { %2280 = dma.hbm_to_vmem [thread:$0]  (!%p3027_p5), %s585_s29, 16, %s587_s5, [#allocation3]  }
  0x2e   : > { %s640_s4 = sshll.u32 %s2864_s7, 4  ;;  %s692_s25 = sshll.u32 %s3349_s16, 4  ;;  %s641_s4 = int_to_ptr.vmem [resolvable:$true] %s640_s4  ;;  %s693_s25 = int_to_ptr.hbm [resolvable:$true] %s692_s25 }
  0x2f   : > { %s611_s15 = sshll.u32 %s3379_s2, 4  ;;  %s2865_s2 = smov [#allocation12]   ;;  %s612_s15 = int_to_ptr.hbm [resolvable:$true] %s611_s15 }
  0x30   : > { %2286 = dma.hbm_to_vmem [thread:$0]  (!%p3027_p5), %s612_s15, 16, %s614_s27, [#allocation5]  }
  0x31   : > { %2292 = dma.hbm_to_vmem [thread:$0]  (!%p3027_p5), %s639_s8, 16, %s641_s4, [#allocation8]  }
  0x32   : > { %s670_s12 = sshll.u32 %s2865_s2, 4  ;;  %s2866_s15 = smov [#allocation15]   ;;  %s671_s12 = int_to_ptr.vmem [resolvable:$true] %s670_s12 }
  0x33   : > { %2298 = dma.hbm_to_vmem [thread:$0]  (!%p3027_p5), %s669_s6, 16, %s671_s12, [#allocation11]  }
  0x34   : > { %s694_s28 = sshll.u32 %s2866_s15, 4  ;;  %s722_s7 = sshll.u32 %s3353_s20, 4  ;;  %s695_s28 = int_to_ptr.vmem [resolvable:$true] %s694_s28  ;;  %s723_s7 = int_to_ptr.hbm [resolvable:$true] %s722_s7 }
  0x35   : > { %2304 = dma.hbm_to_vmem [thread:$0]  (!%p3027_p5), %s693_s25, 16, %s695_s28, [#allocation14]  }
  0x36   : > { %s746_s24 = sshll.u32 %s3355_s22, 4  ;;  %s2867_s3 = smov [#allocation18]   ;;  %s747_s24 = int_to_ptr.hbm [resolvable:$true] %s746_s24 }
  0x37   : > { %s724_s29 = sshll.u32 %s2867_s3, 4  ;;  %s2868_s6 = smov [#allocation21]   ;;  %s725_s29 = int_to_ptr.vmem [resolvable:$true] %s724_s29 }
  0x38   : > { %2310 = dma.hbm_to_vmem [thread:$0]  (!%p3027_p5), %s723_s7, 16, %s725_s29, [#allocation17]  }
  0x39   : > { %s748_s5 = sshll.u32 %s2868_s6, 4  ;;  %781 = sbr.rel (%p3013_p3) target bundleno = 3398 (0xd46), region = 112  ;;  %s749_s5 = int_to_ptr.vmem [resolvable:$true] %s748_s5 }
  0x3a   : > { %2316 = dma.hbm_to_vmem [thread:$0]  (!%p3027_p5), %s747_s24, 16, %s749_s5, [#allocation20]  }
  0x3e   : > { %2825 = dma.done.wait (%p2317_p2), [#allocation3], 16  }
  0x3f   : > { %2827 = vsyncadd (%p2317_p2), [#allocation3], 4294967280 }
  0x40   : > { %2829 = dma.done.wait (%p2317_p2), [#allocation5], 32  }
  0x41   : > { %2831 = vsyncadd (%p2317_p2), [#allocation5], 4294967264 }
  0x42   : > { %2833 = dma.done.wait (%p2317_p2), [#allocation8], 32  }
  0x43   : > { %2835 = vsyncadd (%p2317_p2), [#allocation8], 4294967264 }
  0x44   : > { %2837 = dma.done.wait (%p2317_p2), [#allocation11], 32  }
  0x45   : > { %2839 = vsyncadd (%p2317_p2), [#allocation11], 4294967264 }
  0x46   : > { %2841 = dma.done.wait (%p2317_p2), [#allocation14], 32  }
  0x47   : > { %2843 = vsyncadd (%p2317_p2), [#allocation14], 4294967264 }
  0x48   : > { %2845 = dma.done.wait (%p2317_p2), [#allocation17], 32  }
  0x49   : > { %2847 = vsyncadd (%p2317_p2), [#allocation17], 4294967264 }
  0x4a   : > { %2849 = dma.done.wait (%p2317_p2), [#allocation20], 32  }
  0x4b   : > { %2851 = vsyncadd (%p2317_p2), [#allocation20], 4294967264  ;;  %p911_p6 = scmp.lt.s32.totalorder %s3008_s1, 1  ;;  %s3380_s2 = sld [smem:[#allocation30_spill]]  ;;  %vm950_vm0 = vcmask 261120   ;;  %vm992_vm1 = vcmask 64512  }
  0x4c   : > { %s3381_s0 = sld [smem:[#allocation33_spill]]  ;;  %v2374_v4 = vld [vmem:[#allocation2] ss:$0 sm:$0xff]  ;;  %s2869_s8 = smov 104   ;;  %vm1134_vm2 = vcmask 1043456   ;;  %vm1227_vm3 = vcmask 130048  }
  0x4d   : > { %s3387_s1 = smov (!%p911_p6, %s3008_s1), 1  ;;  %s2870_s4 = smov 120   ;;  %vm1229_vm4 = vcmask 195584   ;;  %vm1475_vm9 = vcmask 39936   ;;  %vm1531_vm10 = vcmask 1041408   ;;  %vm1532_vm11 = vcmask 1042432  }
  0x4e   : > { %s3122_s26 = sshll.u32 %s3387_s1, 3  ;;  %s2871_s24 = smov 112  }
  0x4f   : > { %s2872_s3 = smov 96   ;;  %s3382_s5 = sld [smem:[#allocation32_spill]] }
  0x50   : > { %s2874_s25 = smov 8   ;;  %s3383_s27 = sld [smem:[#allocation35_spill]] }
  0x51   : > { %s914_s12 = scalar_lea.vmem %s3380_s2, %s3122_s26  ;;  %s2875_s2 = smov 16  }
  0x52   : > { %v2206_v0 = vld [vmem:[%s3381_s0 + $0x8] sm:$0xff]  ;;  %v2205_v1 = vld [vmem:[%s3381_s0] sm:$0xff]  ;;  %s925_s6 = scalar_lea.vmem %s3356_s23, %s3122_s26 }
  0x53   : > { %v3134_v2 = vld [vmem:[%s914_s12] sm:$0xff]  ;;  %960 = vmatpush.bf16.msra.mxu0 %v2206_v0  ;;  %s2876_s12 = smov 24  }
  0x54   : > { %v929_v3 = vpack.c.bf16 %v3134_v2, %v3134_v2 }
  0x55   : > { %s921_s30 = scalar_lea.vmem %s3382_s5, %s3387_s1  ;;  %s2873_s1 = smov 64  }
  0x56   : > { %v2375_v35 = vld [vmem:[%s921_s30] ss:$0 sm:$0xff]  ;;  %s3384_s30 = sld [smem:[#allocation31_spill]] }
  0x57   : > { %961 = vmatpush.bf16.msra.mxu0 %v2205_v1 }
  0x5a   : > { %2109 = vmatmul.msk.bf16.vlgmr.msra.gmra.mxu0 %vm950_vm0, %v929_v3 }
  0xd7   : > { %v963_v5 = vpop.f32.mrf.mxu0 }
  0xd8   : > { %v964_v6 = vadd.f32 %v2374_v4, %v963_v5 }
  0xda   : > { %v968_v7 = vmul.f32 0.35355338, %v964_v6  ;;  %v970_v8 = vpack.c.bf16 %v964_v6, %v964_v6 }
  0xdc   : > { %v969_v9 = vpack.c.bf16 %v968_v7, %v968_v7  ;;  %983 = vrot.lane.b32.xlu1 %v970_v8, %s2869_s8  ;;  %979 = vrot.lane.b32.xlu0 %v970_v8, %s2870_s4  ;;  %v988_v11 = vunpack.c.l.b16 %v970_v8 }
  0xde   : > { %972 = vrot.lane.b32.xlu2 %v969_v9, %s2870_s4  ;;  %v3144_v12 = vpack.c.b16 %v988_v11, %v988_v11 }
  0xdf   : > { %v965_v10 = vpop.f32.mrf.mxu0 }
  0xe4   : > { %981 = vrot.lane.b32.xlu0 %v970_v8, %s2871_s24 }
  0xec   : > { %974 = vrot.lane.b32.xlu0 %v969_v9, %s2871_s24 }
  0xf4   : > { %990 = vrot.lane.b32.xlu0 %v3144_v12, %s2872_s3 }
 0x138   : > { %v973_v25 = vpop.permute.xlu2 %972 }
 0x14e   : > { %v980_v13 = vpop.permute.xlu0 %979  ;;  %v984_v16 = vpop.permute.xlu1 %983 }
 0x14f   : > { %v1012_v14 = vunpack.c.l.b16 %v980_v13  ;;  %v1058_v17 = vunpack.c.l.b16 %v984_v16 }
 0x151   : > { %v3148_v15 = vpack.c.b16 %v1012_v14, %v1012_v14  ;;  %v3152_v20 = vpack.c.b16 %v1058_v17, %v1058_v17 }
 0x153   : > { %1014 = vrot.lane.b32.xlu1 %v3148_v15, %s2872_s3 }
 0x156   : > { %v982_v18 = vpop.permute.xlu0 %981 }
 0x157   : > { %v1035_v19 = vunpack.c.l.b16 %v982_v18 }
 0x159   : > { %v3154_v21 = vpack.c.b16 %v1035_v19, %v1035_v19 }
 0x15b   : > { %1060 = vrot.lane.b32.xlu1 %v3152_v20, %s2872_s3  ;;  %1037 = vrot.lane.b32.xlu2 %v3154_v21, %s2872_s3 }
 0x15e   : > { %v975_v22 = vpop.permute.xlu0 %974 }
 0x163   : > { %976 = vrot.lane.b32.xlu2 %v969_v9, %s2869_s8 }
 0x166   : > { %v991_v23 = vpop.permute.xlu0 %990 }
 0x167   : > { %v997_v24 = vsel %vm992_vm1, %v991_v23, 0 }
 0x168   : > { %1006 = vmatpush.bf16.xpose.msra.mxu1 %v997_v24 }
 0x16f   : > { %2110 = vmatmul.msk.bf16.vlgmr.msra.gmra.mxu1 %vm992_vm1, %v969_v9 }
 0x1b5   : > { %v1038_v26 = vpop.permute.xlu2 %1037 }
 0x1b6   : > { %v1043_v29 = vsel %vm992_vm1, %v1038_v26, 0 }
 0x1bd   : > { %v977_v32 = vpop.permute.xlu2 %976 }
 0x1c5   : > { %v1015_v27 = vpop.permute.xlu1 %1014 }
 0x1c6   : > { %v1020_v28 = vsel %vm992_vm1, %v1015_v27, 0 }
 0x1c7   : > { %1029 = vmatpush.bf16.xpose.msra.mxu3 %v1020_v28 }
 0x1cd   : > { %v1061_v30 = vpop.permute.xlu1 %1060 }
 0x1ce   : > { %2111 = vmatmul.msk.bf16.vlgmr.msra.gmra.mxu3 %vm992_vm1, %v973_v25  ;;  %v1066_v31 = vsel %vm992_vm1, %v1061_v30, 0 }
 0x1cf   : > { %1052 = vmatpush.bf16.xpose.msrb.mxu3 %v1043_v29  ;;  %1075 = vmatpush.bf16.xpose.msrb.mxu0 %v1066_v31 }
 0x1d6   : > { %2113 = vmatmul.msk.bf16.vlgmr.msrb.gmra.mxu0 %vm992_vm1, %v977_v32 }
 0x1de   : > { %2112 = vmatmul.msk.bf16.vlgmr.msrb.gmra.mxu3 %vm992_vm1, %v975_v22 }
 0x1ec   : > { %v1008_v33 = vpop.f32.mrf.mxu1 }
 0x1ed   : > { %v1009_v47 = vadd.f32 %v2375_v35, %v1008_v33 }
 0x1ef   : > { %v1081_v49 = vsel %vm992_vm1, %v1009_v47, -inf }
 0x1f4   : > { %v1010_v34 = vpop.f32.mrf.mxu1 }
 0x251   : > { %v1031_v36 = vpop.f32.mrf.mxu3 }
 0x252   : > { %v1032_v37 = vadd.f32 %v2375_v35, %v1031_v36 }
 0x253   : > { %v1077_v38 = vpop.f32.mrf.mxu0 }
 0x254   : > { %v1078_v39 = vadd.f32 %v2375_v35, %v1077_v38  ;;  %v1084_v40 = vsel %vm992_vm1, %v1032_v37, -inf }
 0x255   : > { %1085 = vmax.xlane.f32.xlu1 %v1084_v40  ;;  %v2207_v40 = vld [vmem:[%s3383_s27] sm:$0xff] }
 0x256   : > { %v1090_v41 = vsel %vm992_vm1, %v1078_v39, -inf }
 0x257   : > { %1091 = vmax.xlane.f32.xlu0 %v1090_v41 }
 0x259   : > { %v1033_v42 = vpop.f32.mrf.mxu3 }
 0x25b   : > { %v1079_v43 = vpop.f32.mrf.mxu0 }
 0x261   : > { %v1054_v44 = vpop.f32.mrf.mxu3 }
 0x262   : > { %v1055_v45 = vadd.f32 %v2375_v35, %v1054_v44 }
 0x264   : > { %v1087_v46 = vsel %vm992_vm1, %v1055_v45, -inf }
 0x265   : > { %1088 = vmax.xlane.f32.xlu2 %v1087_v46 }
 0x269   : > { %v1056_v48 = vpop.f32.mrf.mxu3 }
 0x26a   : > { %v2376_v48 = vld [vmem:[#allocation4] ss:$0 sm:$0xff] }
 0x26d   : > { %1082 = vmax.xlane.f32.xlu2 %v1081_v49 }
 0x2c8   : > { %v1086_v50 = vpop.xlane.xlu1 %1085 }
 0x2c9   : > { %v1094_v51 = vsub.f32 %v1032_v37, %v1086_v50 }
 0x2ca   : > { %v1092_v52 = vpop.xlane.xlu0 %1091 }
 0x2cb   : > { %v1099_v53 = vmul.f32 1.442695, %v1094_v51  ;;  %v1096_v54 = vsub.f32 %v1078_v39, %v1092_v52  ;;  %v2208_v39 = vld [vmem:[%s3383_s27 + $0x8] sm:$0xff] }
 0x2cd   : > { %2388 = vpow2.f32 %v1099_v53  ;;  %v1103_v55 = vmul.f32 1.442695, %v1096_v54  ;;  %v2877_v54 = vmov 32.0  }
 0x2cf   : > { %2390 = vpow2.f32 %v1103_v55  ;;  %v2212_v55 = vld [vmem:[%s3344_s11 + $0x8] sm:$0xff] }
 0x2d3   : > { %v2389_v56 = vpop.eup %2388 }
 0x2d4   : > { %v1108_v57 = vsel %vm992_vm1, %v2389_v56, 0.0 }
 0x2d5   : > { %v2391_v58 = vpop.eup %2390  ;;  %1109 = vadd.xlane.f32.xlu1 %v1108_v57 }
 0x2d6   : > { %v1114_v59 = vsel %vm992_vm1, %v2391_v58, 0.0 }
 0x2d7   : > { %1115 = vadd.xlane.f32.xlu0 %v1114_v59 }
 0x2d8   : > { %v1089_v60 = vpop.xlane.xlu2 %1088 }
 0x2d9   : > { %v1095_v61 = vsub.f32 %v1055_v45, %v1089_v60 }
 0x2db   : > { %v1101_v62 = vmul.f32 1.442695, %v1095_v61 }
 0x2dd   : > { %2392 = vpow2.f32 %v1101_v62 }
 0x2e0   : > { %v1083_v1 = vpop.xlane.xlu2 %1082 }
 0x2e1   : > { %v1093_v3 = vsub.f32 %v1009_v47, %v1083_v1 }
 0x2e3   : > { %v2393_v63 = vpop.eup %2392  ;;  %v1097_v4 = vmul.f32 1.442695, %v1093_v3 }
 0x2e4   : > { %v1111_v0 = vsel %vm992_vm1, %v2393_v63, 0.0 }
 0x2e5   : > { %1112 = vadd.xlane.f32.xlu2 %v1111_v0  ;;  %2394 = vpow2.f32 %v1097_v4 }
 0x2eb   : > { %1193 = vrot.lane.b32.xlu0 %v3152_v20, %s2873_s1  ;;  %v2395_v5 = vpop.eup %2394 }
 0x2ec   : > { %v1105_v6 = vsel %vm992_vm1, %v2395_v5, 0.0 }
 0x2ee   : > { %1151 = vrot.lane.b32.xlu1 %v3148_v15, %s2873_s1 }
 0x2f3   : > { %1129 = vrot.lane.b32.xlu0 %v3144_v12, %s2873_s1 }
 0x2fd   : > { %1172 = vrot.lane.b32.xlu2 %v3154_v21, %s2873_s1  ;;  %s918_s1 = scalar_lea.vmem %s3384_s30, %s3122_s26 }
 0x318   : > { %1106 = vadd.xlane.f32.xlu1 %v1105_v6  ;;  %v2210_v6 = vld [vmem:[%s3342_s9 + $0x8] sm:$0xff] }
 0x348   : > { %v1110_v8 = vpop.xlane.xlu1 %1109 }
 0x34a   : > { %v1116_v7 = vpop.xlane.xlu0 %1115 }
 0x34b   : > { %2396 = vrcp.f32 %v1116_v7  ;;  %v2209_v7 = vld [vmem:[%s3342_s9] sm:$0xff] }
 0x34c   : > { %2398 = vrcp.f32 %v1110_v8  ;;  %v2379_v8 = vld [vmem:[#allocation10] ss:$0 sm:$0xff] }
 0x351   : > { %v2397_v10 = vpop.eup %2396 }
 0x352   : > { %v2399_v11 = vpop.eup %2398  ;;  %v1124_v12 = vmul.f32 %v2397_v10, %v2391_v58 }
 0x353   : > { %v1122_v16 = vmul.f32 %v2399_v11, %v2389_v56  ;;  %v928_v56 = vld [vmem:[%s918_s1] sm:$0x1f] }
 0x354   : > { %v1128_v20 = vpack.c.bf16 %v1124_v12, %v1124_v12  ;;  %v1345_v58 = vpack.c.bf16 %v928_v56, %v928_v56 }
 0x355   : > { %v1126_v24 = vpack.c.bf16 %v1122_v16, %v1122_v16 }
 0x358   : > { %v1113_v9 = vpop.xlane.xlu2 %1112 }
 0x359   : > { %2400 = vrcp.f32 %v1113_v9 }
 0x35d   : > { %v1194_v13 = vpop.permute.xlu0 %1193 }
 0x35e   : > { %v1199_v14 = vsel %vm1134_vm2, %v1194_v13, 0 }
 0x35f   : > { %v2401_v15 = vpop.eup %2400  ;;  %1208 = vmatpush.bf16.msra.mxu0 %v1199_v14 }
 0x360   : > { %v1123_v17 = vmul.f32 %v2401_v15, %v2393_v63  ;;  %v1152_v18 = vpop.permute.xlu1 %1151  ;;  %v1173_v19 = vpop.permute.xlu2 %1172 }
 0x361   : > { %v1178_v21 = vsel %vm1134_vm2, %v1173_v19, 0  ;;  %v1157_v22 = vsel %vm1134_vm2, %v1152_v18, 0 }
 0x362   : > { %v1127_v23 = vpack.c.bf16 %v1123_v17, %v1123_v17  ;;  %1166 = vmatpush.bf16.msra.mxu2 %v1157_v22  ;;  %1187 = vmatpush.bf16.msra.mxu3 %v1178_v21  ;;  %v2377_v22 = vld [vmem:[#allocation6] ss:$0 sm:$0xff] }
 0x363   : > { %2117 = vmatmul.msk.bf16.vlgmr.msra.gmra.mxu0 %vm992_vm1, %v1128_v20 }
 0x365   : > { %2115 = vmatmul.msk.bf16.vlgmr.msra.gmra.mxu2 %vm992_vm1, %v1126_v24  ;;  %v1130_v25 = vpop.permute.xlu0 %1129  ;;  %2116 = vmatmul.msk.bf16.vlgmr.msra.gmra.mxu3 %vm992_vm1, %v1127_v23 }
 0x366   : > { %v1136_v26 = vsel %vm1134_vm2, %v1130_v25, 0  ;;  %1375 = vmatpush.bf16.msrb.mxu3 %v2212_v55  ;;  %1338 = vmatpush.bf16.msrb.mxu2 %v2210_v6  ;;  %v2378_v25 = vld [vmem:[#allocation7] ss:$0 sm:$0xff] }
 0x367   : > { %1145 = vmatpush.bf16.msrb.mxu1 %v1136_v26 }
 0x36a   : > { %1339 = vmatpush.bf16.msrb.mxu2 %v2209_v7 }
 0x36b   : > { %1261 = vmatpush.bf16.msra.mxu1 %v2208_v39 }
 0x36f   : > { %1262 = vmatpush.bf16.msra.mxu1 %v2207_v40 }
 0x38b   : > { %v1107_v27 = vpop.xlane.xlu1 %1106 }
 0x38c   : > { %2402 = vrcp.f32 %v1107_v27 }
 0x38d   : > { %2404 = vrcp.f32 %v2877_v54 }
 0x392   : > { %v2403_v28 = vpop.eup %2402 }
 0x393   : > { %v1121_v29 = vmul.f32 %v2403_v28, %v2395_v5  ;;  %v2405_v57 = vpop.eup %2404 }
 0x394   : > { %v1275_v59 = vmul.f32 32.0, %v2405_v57  ;;  %vm1279_vm5 = vweird.f32 %v2405_v57 }
 0x395   : > { %v1125_v30 = vpack.c.bf16 %v1121_v29, %v1121_v29 }
 0x396   : > { %v1276_v60 = vsub.f32 1.0, %v1275_v59 }
 0x397   : > { %2114 = vmatmul.msk.bf16.vlgmr.msrb.gmra.mxu1 %vm992_vm1, %v1125_v30 }
 0x398   : > { %v1277_v61 = vmul.f32 %v2405_v57, %v1276_v60 }
 0x39a   : > { %v1278_v62 = vadd.f32 %v2405_v57, %v1277_v61 }
 0x39c   : > { %v3219_v63 = vsel %vm1279_vm5, %v2405_v57, %v1278_v62 }
 0x3e0   : > { %v1210_v31 = vpop.f32.mrf.mxu0 }
 0x3e8   : > { %v1212_v32 = vpop.f32.mrf.mxu0  ;;  %v1168_v33 = vpop.f32.mrf.mxu2 }
 0x3e9   : > { %v1189_v34 = vpop.f32.mrf.mxu3  ;;  %1215 = vrot.lane.b32.xlu2 %v1168_v33, %s2874_s25  ;;  %v2380_v32 = vld [vmem:[#allocation9] ss:$0 sm:$0xff] }
 0x3ea   : > { %1219 = vrot.lane.b32.xlu0 %v1189_v34, %s2875_s2 }
 0x3f0   : > { %v1170_v35 = vpop.f32.mrf.mxu2 }
 0x3f1   : > { %v1191_v36 = vpop.f32.mrf.mxu3  ;;  %1223 = vrot.lane.b32.xlu2 %v1210_v31, %s2876_s12 }
 0x414   : > { %v1147_v37 = vpop.f32.mrf.mxu1 }
 0x41c   : > { %v1149_v38 = vpop.f32.mrf.mxu1 }
 0x443   : > { %v1216_v41 = vpop.permute.xlu2 %1215 }
 0x444   : > { %v1226_v42 = vsel %vm992_vm1, %v1147_v37, %v1216_v41 }
 0x44b   : > { %v1224_v44 = vpop.permute.xlu2 %1223 }
 0x45c   : > { %v1220_v43 = vpop.permute.xlu0 %1219 }
 0x45d   : > { %v1228_v45 = vsel %vm1227_vm3, %v1226_v42, %v1220_v43 }
 0x45e   : > { %v1230_v46 = vsel %vm1229_vm4, %v1228_v45, %v1224_v44 }
 0x45f   : > { %v1231_v47 = vpack.c.bf16 %v1230_v46, %v1230_v46 }
 0x461   : > { %2126 = vmatmul.msk.bf16.vlgmr.msra.gmra.mxu1 %vm950_vm0, %v1231_v47 }
 0x4de   : > { %v1264_v49 = vpop.f32.mrf.mxu1 }
 0x4df   : > { %v1265_v50 = vadd.f32 %v2376_v48, %v1264_v49 }
 0x4e1   : > { %v1268_v51 = vadd.f32 %v1265_v50, %v3134_v2  ;;  %v2211_v2 = vld [vmem:[%s3344_s11] sm:$0xff] }
 0x4e2   : > { %1376 = vmatpush.bf16.msrb.mxu3 %v2211_v2 }
 0x4e3   : > { %v1271_v52 = vsel %vm950_vm0, %v1268_v51, 0.0 }
 0x4e4   : > { %1272 = vadd.xlane.f32.xlu0 %v1271_v52 }
 0x4e5   : > { %2144 = vmatmul.msk.bf16.vlgmr.msrb.gmra.mxu3 %vm950_vm0, %v1345_v58 }
 0x4e6   : > { %v1266_v53 = vpop.f32.mrf.mxu1 }
 0x557   : > { %v1273_v0 = vpop.xlane.xlu0 %1272 }
 0x558   : > { %v1281_v1 = vmul.f32 %v3219_v63, %v1273_v0 }
 0x55a   : > { %v1282_v3 = vsub.f32 %v1268_v51, %v1281_v1 }
 0x55c   : > { %v1283_v4 = vmul.f32 %v1282_v3, %v1282_v3 }
 0x55e   : > { %v1284_v5 = vsel %vm950_vm0, %v1283_v4, 0.0 }
 0x55f   : > { %1285 = vadd.xlane.f32.xlu2 %v1284_v5 }
 0x568   : > { %v1378_v9 = vpop.f32.mrf.mxu3 }
 0x569   : > { %v1379_v12 = vadd.f32 %v2379_v8, %v1378_v9 }
 0x56b   : > { %v3230_v14 = vpack.c.bf16 %v1379_v12, %v1379_v12 }
 0x56d   : > { %1395 = vrot.lane.b32.xlu1 %v3230_v14, %s2871_s24  ;;  %1397 = vrot.lane.b32.xlu0 %v3230_v14, %s2869_s8  ;;  %v1403_v29 = vsel %vm992_vm1, %v3230_v14, 0  ;;  %v1524_v9 = vunpack.c.l.b16 %v3230_v14 }
 0x56e   : > { %1412 = vmatpush.bf16.xpose.msrb.mxu0 %v1403_v29 }
 0x570   : > { %v1380_v15 = vpop.f32.mrf.mxu3 }
 0x5d2   : > { %v1286_v10 = vpop.xlane.xlu2 %1285 }
 0x5d3   : > { %v1287_v11 = vmul.f32 %v1286_v10, %v3219_v63  ;;  %v1525_v10 = vpack.c.b16 %v1524_v9, %v1524_v9 }
 0x5d5   : > { %v1288_v13 = vadd.f32 1e-12, %v1287_v11 }
 0x5d7   : > { %2406 = vrsqrt.f32 %v1288_v13  ;;  %vm1295_vm7 = vweird.f32 %v1288_v13 }
 0x5dd   : > { %v2407_v16 = vpop.eup %2406 }
 0x5de   : > { %v1290_v17 = vmul.f32 %v2407_v16, %v1288_v13  ;;  %vm1296_vm6 = vweird.f32 %v2407_v16 }
 0x5df   : > { %vm1297_vm8 = vmor %vm1295_vm7, %vm1296_vm6  ;;  %v1396_v30 = vpop.permute.xlu1 %1395  ;;  %v1398_v38 = vpop.permute.xlu0 %1397 }
 0x5e0   : > { %v1291_v18 = vmul.f32 %v2407_v16, %v1290_v17  ;;  %v1441_v31 = vsel %vm992_vm1, %v1396_v30, 0  ;;  %v1460_v39 = vsel %vm992_vm1, %v1398_v38, 0  ;;  %v1574_v1 = vunpack.c.l.b16 %v1396_v30 }
 0x5e1   : > { %1450 = vmatpush.bf16.xpose.msra.mxu2 %v1441_v31  ;;  %1469 = vmatpush.bf16.xpose.msra.mxu3 %v1460_v39  ;;  %v1597_v13 = vunpack.c.l.b16 %v1398_v38 }
 0x5e2   : > { %v1292_v19 = vmul.f32 0.5, %v1291_v18  ;;  %v1575_v6 = vpack.c.b16 %v1574_v1, %v1574_v1 }
 0x5e3   : > { %v1598_v15 = vpack.c.b16 %v1597_v13, %v1597_v13 }
 0x5e4   : > { %v1293_v20 = vsub.f32 1.5, %v1292_v19 }
 0x5e6   : > { %v1294_v21 = vmul.f32 %v2407_v16, %v1293_v20 }
 0x5e8   : > { %v1298_v23 = vsel %vm1297_vm8, %v2407_v16, %v1294_v21 }
 0x5e9   : > { %v1299_v24 = vmul.f32 %v1298_v23, %v1282_v3  ;;  %v2878_v23 = vmov 65535  }
 0x5eb   : > { %v1303_v26 = vmul.f32 %v2377_v22, %v1299_v24  ;;  %v1533_v24 = vsel %vm1531_vm10, 4294967295, %v2878_v23 }
 0x5ed   : > { %v3236_v27 = vadd.f32 %v2378_v25, %v1303_v26  ;;  %v1534_v25 = vsel %vm1532_vm11, %v1533_v24, 0 }
 0x5ef   : > { %v1308_v28 = vpack.c.bf16 %v3236_v27, %v3236_v27 }
 0x5f1   : > { %2135 = vmatmul.msk.bf16.vlgmr.msrb.gmra.mxu2 %vm950_vm0, %v1308_v28 }
 0x674   : > { %v1341_v33 = vpop.f32.mrf.mxu2 }
 0x675   : > { %v1342_v34 = vadd.f32 %v2380_v32, %v1341_v33 }
 0x677   : > { %v1382_v35 = vmul.f32 0.35355338, %v1342_v34 }
 0x679   : > { %v1383_v36 = vpack.c.bf16 %v1382_v35, %v1382_v35 }
 0x67b   : > { %1386 = vrot.lane.b32.xlu0 %v1383_v36, %s2870_s4  ;;  %1390 = vrot.lane.b32.xlu1 %v1383_v36, %s2869_s8 }
 0x67c   : > { %1388 = vrot.lane.b32.xlu2 %v1383_v36, %s2871_s24  ;;  %2145 = vmatmul.msk.bf16.vlgmr.msrb.gmra.mxu0 %vm992_vm1, %v1383_v36  ;;  %v1343_v37 = vpop.f32.mrf.mxu2 }
 0x683   : > { %1393 = vrot.lane.b32.xlu1 %v3230_v14, %s2870_s4 }
 0x6d6   : > { %v1389_v40 = vpop.permute.xlu2 %1388 }
 0x6d7   : > { %2147 = vmatmul.msk.bf16.vlgmr.msra.gmra.mxu2 %vm992_vm1, %v1389_v40 }
 0x6ed   : > { %v1391_v41 = vpop.permute.xlu1 %1390  ;;  %v1387_v45 = vpop.permute.xlu0 %1386 }
 0x6ee   : > { %2148 = vmatmul.msk.bf16.vlgmr.msra.gmra.mxu3 %vm992_vm1, %v1391_v41 }
 0x6f5   : > { %v1394_v42 = vpop.permute.xlu1 %1393 }
 0x6f6   : > { %v1422_v43 = vsel %vm992_vm1, %v1394_v42, 0  ;;  %v1551_v16 = vunpack.c.l.b16 %v1394_v42 }
 0x6f7   : > { %1431 = vmatpush.bf16.xpose.msrb.mxu1 %v1422_v43 }
 0x6f8   : > { %v1552_v17 = vpack.c.b16 %v1551_v16, %v1551_v16  ;;  %v2216_v16 = vld [vmem:[%s3350_s17 + $0x8] sm:$0xff] }
 0x6f9   : > { %v1414_v44 = vpop.f32.mrf.mxu0 }
 0x6fa   : > { %v1476_v50 = vsel %vm1475_vm9, %v1414_v44, -inf }
 0x6fe   : > { %2146 = vmatmul.msk.bf16.vlgmr.msrb.gmra.mxu1 %vm992_vm1, %v1387_v45 }
 0x701   : > { %v1416_v46 = vpop.f32.mrf.mxu0 }
 0x75a   : > { %v1452_v47 = vpop.f32.mrf.mxu2 }
 0x75b   : > { %v1482_v48 = vsel %vm1475_vm9, %v1452_v47, -inf }
 0x75c   : > { %1483 = vmax.xlane.f32.xlu1 %v1482_v48 }
 0x762   : > { %v1454_v49 = vpop.f32.mrf.mxu2 }
 0x764   : > { %1477 = vmax.xlane.f32.xlu1 %v1476_v50 }
 0x771   : > { %v1471_v51 = vpop.f32.mrf.mxu3 }
 0x772   : > { %v1485_v52 = vsel %vm1475_vm9, %v1471_v51, -inf }
 0x773   : > { %1486 = vmax.xlane.f32.xlu2 %v1485_v52 }
 0x779   : > { %v1473_v53 = vpop.f32.mrf.mxu3 }
 0x77b   : > { %v1433_v54 = vpop.f32.mrf.mxu1 }
 0x77c   : > { %v1479_v55 = vsel %vm1475_vm9, %v1433_v54, -inf }
 0x77d   : > { %1480 = vmax.xlane.f32.xlu0 %v1479_v55 }
 0x783   : > { %v1435_v56 = vpop.f32.mrf.mxu1 }
 0x7cf   : > { %v1484_v2 = vpop.xlane.xlu1 %1483 }
 0x7d0   : > { %v1490_v57 = vsub.f32 %v1452_v47, %v1484_v2 }
 0x7d2   : > { %v1496_v58 = vmul.f32 1.442695, %v1490_v57  ;;  %v2214_v57 = vld [vmem:[%s3346_s13 + $0x8] sm:$0xff] }
 0x7d4   : > { %2408 = vpow2.f32 %v1496_v58  ;;  %v2213_v58 = vld [vmem:[%s3346_s13] sm:$0xff] }
 0x7d7   : > { %v1478_v18 = vpop.xlane.xlu1 %1477 }
 0x7d8   : > { %v1488_v19 = vsub.f32 %v1414_v44, %v1478_v18 }
 0x7da   : > { %v2409_v59 = vpop.eup %2408  ;;  %v1492_v20 = vmul.f32 1.442695, %v1488_v19 }
 0x7db   : > { %v1506_v60 = vsel %vm1475_vm9, %v2409_v59, 0.0 }
 0x7dc   : > { %1507 = vadd.xlane.f32.xlu2 %v1506_v60 }
 0x7e6   : > { %v1487_v61 = vpop.xlane.xlu2 %1486 }
 0x7e7   : > { %v1491_v62 = vsub.f32 %v1471_v51, %v1487_v61 }
 0x7e9   : > { %v1498_v0 = vmul.f32 1.442695, %v1491_v62 }
 0x7eb   : > { %2410 = vpow2.f32 %v1498_v0 }
 0x7f0   : > { %v1481_v3 = vpop.xlane.xlu0 %1480 }
 0x7f1   : > { %v2411_v4 = vpop.eup %2410  ;;  %v1489_v5 = vsub.f32 %v1433_v54, %v1481_v3 }
 0x7f2   : > { %v1509_v7 = vsel %vm1475_vm9, %v2411_v4, 0.0 }
 0x7f3   : > { %v1494_v8 = vmul.f32 1.442695, %v1489_v5  ;;  %1510 = vadd.xlane.f32.xlu0 %v1509_v7 }
 0x7f4   : > { %1576 = vrot.lane.b32.xlu2 %v1575_v6, %s2872_s3 }
 0x7f5   : > { %2412 = vpow2.f32 %v1494_v8 }
 0x7f6   : > { %2414 = vpow2.f32 %v1492_v20  ;;  %v2223_v20 = vld [vmem:[%s3352_s19 + $0x30] sm:$0xff] }
 0x7fb   : > { %v2413_v11 = vpop.eup %2412 }
 0x7fc   : > { %1526 = vrot.lane.b32.xlu2 %v1525_v10, %s2872_s3  ;;  %v1503_v12 = vsel %vm1475_vm9, %v2413_v11, 0.0  ;;  %v2415_v14 = vpop.eup %2414 }
 0x7fd   : > { %1504 = vadd.xlane.f32.xlu1 %v1503_v12  ;;  %v1500_v21 = vsel %vm1475_vm9, %v2415_v14, 0.0 }
 0x807   : > { %1599 = vrot.lane.b32.xlu0 %v1598_v15, %s2872_s3 }
 0x816   : > { %1553 = vrot.lane.b32.xlu1 %v1552_v17, %s2872_s3  ;;  %v2224_v17 = vld [vmem:[%s3352_s19 + $0x38] sm:$0xff] }
 0x831   : > { %1501 = vadd.xlane.f32.xlu0 %v1500_v21 }
 0x84f   : > { %v1508_v22 = vpop.xlane.xlu2 %1507 }
 0x850   : > { %2416 = vrcp.f32 %v1508_v22 }
 0x856   : > { %v2417_v26 = vpop.eup %2416 }
 0x857   : > { %v1518_v28 = vmul.f32 %v2417_v26, %v2409_v59  ;;  %v1577_v29 = vpop.permute.xlu2 %1576 }
 0x858   : > { %v1582_v30 = vand.u32 %v1577_v29, %v1534_v25 }
 0x859   : > { %v1522_v31 = vpack.c.bf16 %v1518_v28, %v1518_v28  ;;  %v2382_v28 = vld [vmem:[#allocation13] ss:$0 sm:$0xff] }
 0x85a   : > { %1591 = vmatpush.bf16.msrb.mxu2 %v1582_v30  ;;  %v2383_v30 = vld [vmem:[#allocation15] ss:$0 sm:$0xff] }
 0x85d   : > { %2151 = vmatmul.msk.bf16.vlgmr.msrb.gmra.mxu2 %vm1475_vm9, %v1522_v31 }
 0x85e   : > { %1820 = vmatpush.bf16.msra.mxu2 %v2224_v17 }
 0x85f   : > { %v1527_v32 = vpop.permute.xlu2 %1526 }
 0x860   : > { %v1536_v33 = vand.u32 %v1534_v25, %v1527_v32 }
 0x862   : > { %1545 = vmatpush.bf16.msra.mxu0 %v1536_v33  ;;  %1821 = vmatpush.bf16.msra.mxu2 %v2223_v20 }
 0x866   : > { %v1511_v34 = vpop.xlane.xlu0 %1510  ;;  %1665 = vmatpush.bf16.msrb.mxu0 %v2214_v57 }
 0x867   : > { %2418 = vrcp.f32 %v1511_v34 }
 0x86a   : > { %1666 = vmatpush.bf16.msrb.mxu0 %v2213_v58 }
 0x86d   : > { %v2419_v35 = vpop.eup %2418 }
 0x86e   : > { %v1519_v36 = vmul.f32 %v2419_v35, %v2411_v4  ;;  %v2381_v4 = vld [vmem:[#allocation12] ss:$0 sm:$0xff] }
 0x86f   : > { %v2222_v35 = vld [vmem:[%s3352_s19 + $0x28] sm:$0xff] }
 0x870   : > { %v1505_v39 = vpop.xlane.xlu1 %1504  ;;  %v1523_v40 = vpack.c.bf16 %v1519_v36, %v1519_v36  ;;  %1822 = vmatpush.bf16.msra.mxu2 %v2222_v35  ;;  %v2221_v36 = vld [vmem:[%s3352_s19 + $0x20] sm:$0xff] }
 0x871   : > { %2420 = vrcp.f32 %v1505_v39  ;;  %v2218_v39 = vld [vmem:[%s3352_s19 + $0x8] sm:$0xff] }
 0x874   : > { %1823 = vmatpush.bf16.msra.mxu2 %v2221_v36 }
 0x877   : > { %v2421_v41 = vpop.eup %2420 }
 0x878   : > { %v1517_v42 = vmul.f32 %v2421_v41, %v2413_v11  ;;  %v2384_v41 = vld [vmem:[#allocation16] ss:$0 sm:$0xff] }
 0x879   : > { %v1600_v37 = vpop.permute.xlu0 %1599 }
 0x87a   : > { %v1605_v38 = vand.u32 %v1600_v37, %v1534_v25  ;;  %v1521_v45 = vpack.c.bf16 %v1517_v42, %v1517_v42  ;;  %v2220_v37 = vld [vmem:[%s3352_s19 + $0x18] sm:$0xff] }
 0x87b   : > { %1824 = vmatpush.bf16.msra.mxu2 %v2220_v37 }
 0x87c   : > { %1614 = vmatpush.bf16.msrb.mxu3 %v1605_v38  ;;  %v2219_v38 = vld [vmem:[%s3352_s19 + $0x10] sm:$0xff] }
 0x87f   : > { %2152 = vmatmul.msk.bf16.vlgmr.msrb.gmra.mxu3 %vm1475_vm9, %v1523_v40  ;;  %1825 = vmatpush.bf16.msra.mxu2 %v2219_v38  ;;  %v2217_v40 = vld [vmem:[%s3352_s19] sm:$0xff] }
 0x883   : > { %1826 = vmatpush.bf16.msra.mxu2 %v2218_v39 }
 0x887   : > { %1827 = vmatpush.bf16.msra.mxu2 %v2217_v40 }
 0x888   : > { %v1554_v43 = vpop.permute.xlu1 %1553 }
 0x889   : > { %v1559_v44 = vand.u32 %v1554_v43, %v1534_v25 }
 0x88b   : > { %1568 = vmatpush.bf16.msra.mxu1 %v1559_v44 }
 0x88e   : > { %2150 = vmatmul.msk.bf16.vlgmr.msra.gmra.mxu1 %vm1475_vm9, %v1521_v45 }
 0x88f   : > { %1735 = vmatpush.bf16.msrb.mxu1 %v2216_v16 }
 0x8a4   : > { %v1502_v46 = vpop.xlane.xlu0 %1501 }
 0x8a5   : > { %2422 = vrcp.f32 %v1502_v46 }
 0x8ab   : > { %v2423_v47 = vpop.eup %2422 }
 0x8ac   : > { %v1516_v48 = vmul.f32 %v2423_v47, %v2415_v14 }
 0x8ae   : > { %v1520_v49 = vpack.c.bf16 %v1516_v48, %v1516_v48 }
 0x8b0   : > { %2149 = vmatmul.msk.bf16.vlgmr.msra.gmra.mxu0 %vm1475_vm9, %v1520_v49 }
 0x8e0   : > { %v1593_v50 = vpop.f32.mrf.mxu2 }
 0x8e1   : > { %1625 = vrot.lane.b32.xlu2 %v1593_v50, %s2875_s2 }
 0x8e8   : > { %v1595_v51 = vpop.f32.mrf.mxu2 }
 0x902   : > { %v1616_v52 = vpop.f32.mrf.mxu3 }
 0x90a   : > { %v1618_v53 = vpop.f32.mrf.mxu3 }
 0x90b   : > { %v1570_v54 = vpop.f32.mrf.mxu1 }
 0x90c   : > { %1621 = vrot.lane.b32.xlu1 %v1570_v54, %s2874_s25 }
 0x913   : > { %v1572_v55 = vpop.f32.mrf.mxu1 }
 0x914   : > { %1629 = vrot.lane.b32.xlu1 %v1616_v52, %s2876_s12  ;;  %v2385_v55 = vld [vmem:[#allocation18] ss:$0 sm:$0xff] }
 0x92d   : > { %v1547_v56 = vpop.f32.mrf.mxu0 }
 0x935   : > { %v1549_v2 = vpop.f32.mrf.mxu0 }
 0x93b   : > { %v1626_v61 = vpop.permute.xlu2 %1625 }
 0x97e   : > { %v1622_v59 = vpop.permute.xlu1 %1621 }
 0x97f   : > { %v1632_v60 = vsel %vm992_vm1, %v1547_v56, %v1622_v59 }
 0x980   : > { %v1633_v62 = vsel %vm1227_vm3, %v1632_v60, %v1626_v61 }
 0x986   : > { %v1630_v0 = vpop.permute.xlu1 %1629 }
 0x987   : > { %v1634_v1 = vsel %vm1229_vm4, %v1633_v62, %v1630_v0 }
 0x988   : > { %v1635_v3 = vpack.c.bf16 %v1634_v1, %v1634_v1 }
 0x98a   : > { %2161 = vmatmul.msk.bf16.vlgmr.msrb.gmra.mxu0 %vm950_vm0, %v1635_v3 }
 0xa07   : > { %v1668_v5 = vpop.f32.mrf.mxu0 }
 0xa08   : > { %v1669_v6 = vadd.f32 %v2381_v4, %v1668_v5 }
 0xa0a   : > { %v1672_v7 = vadd.f32 %v1669_v6, %v3236_v27  ;;  %v2215_v27 = vld [vmem:[%s3350_s17] sm:$0xff] }
 0xa0b   : > { %1736 = vmatpush.bf16.msrb.mxu1 %v2215_v27 }
 0xa0c   : > { %v1675_v8 = vsel %vm950_vm0, %v1672_v7, 0.0 }
 0xa0d   : > { %1676 = vadd.xlane.f32.xlu2 %v1675_v8 }
 0xa0f   : > { %v1670_v9 = vpop.f32.mrf.mxu0 }
 0xa80   : > { %v1677_v10 = vpop.xlane.xlu2 %1676 }
 0xa81   : > { %v1678_v11 = vmul.f32 %v1677_v10, %v3219_v63 }
 0xa83   : > { %v1679_v12 = vsub.f32 %v1672_v7, %v1678_v11 }
 0xa85   : > { %v1680_v13 = vmul.f32 %v1679_v12, %v1679_v12 }
 0xa87   : > { %v1681_v15 = vsel %vm950_vm0, %v1680_v13, 0.0 }
 0xa88   : > { %1682 = vadd.xlane.f32.xlu1 %v1681_v15  ;;  %v2387_v15 = vld [vmem:[#allocation21] ss:$0 sm:$0xff] }
 0xafb   : > { %v1683_v18 = vpop.xlane.xlu1 %1682 }
 0xafc   : > { %v1684_v19 = vmul.f32 %v1683_v18, %v3219_v63 }
 0xafe   : > { %v1685_v14 = vadd.f32 1e-12, %v1684_v19 }
 0xb00   : > { %2424 = vrsqrt.f32 %v1685_v14  ;;  %vm1692_vm13 = vweird.f32 %v1685_v14 }
 0xb06   : > { %v2425_v21 = vpop.eup %2424 }
 0xb07   : > { %v1687_v22 = vmul.f32 %v2425_v21, %v1685_v14  ;;  %vm1693_vm12 = vweird.f32 %v2425_v21 }
 0xb08   : > { %vm1694_vm14 = vmor %vm1692_vm13, %vm1693_vm12 }
 0xb09   : > { %v1688_v23 = vmul.f32 %v2425_v21, %v1687_v22 }
 0xb0b   : > { %v1689_v24 = vmul.f32 0.5, %v1688_v23 }
 0xb0d   : > { %v1690_v25 = vsub.f32 1.5, %v1689_v24 }
 0xb0f   : > { %v1691_v26 = vmul.f32 %v2425_v21, %v1690_v25 }
 0xb11   : > { %v1695_v29 = vsel %vm1694_vm14, %v2425_v21, %v1691_v26 }
 0xb12   : > { %v1696_v31 = vmul.f32 %v1695_v29, %v1679_v12  ;;  %v2386_v12 = vld [vmem:[#allocation19] ss:$0 sm:$0xff] }
 0xb14   : > { %v1700_v32 = vmul.f32 %v2382_v28, %v1696_v31 }
 0xb16   : > { %v1704_v33 = vadd.f32 %v2383_v30, %v1700_v32 }
 0xb18   : > { %v1705_v34 = vpack.c.bf16 %v1704_v33, %v1704_v33 }
 0xb1a   : > { %2170 = vmatmul.msk.bf16.vlgmr.msrb.gmra.mxu1 %vm950_vm0, %v1705_v34 }
 0xb97   : > { %v1738_v42 = vpop.f32.mrf.mxu1 }
 0xb98   : > { %v1739_v43 = vadd.f32 %v2384_v41, %v1738_v42 }
 0xb9a   : > { %v1743_v44 = vmul.f32 0.044715, %v1739_v43  ;;  %v1742_v51 = vmul.f32 0.5, %v1739_v43 }
 0xb9c   : > { %v1744_v45 = vmul.f32 %v1743_v44, %v1739_v43 }
 0xb9e   : > { %v1745_v46 = vmul.f32 %v1744_v45, %v1739_v43 }
 0xb9f   : > { %v1740_v47 = vpop.f32.mrf.mxu1 }
 0xba0   : > { %v1746_v48 = vadd.f32 %v1745_v46, %v1739_v43 }
 0xba2   : > { %v1747_v49 = vmul.f32 0.7978846, %v1746_v48 }
 0xba4   : > { %2426 = vtanh.f32 %v1747_v49 }
 0xbaa   : > { %v2427_v50 = vpop.eup %2426 }
 0xbab   : > { %v1749_v52 = vadd.f32 1.0, %v2427_v50 }
 0xbad   : > { %v1750_v53 = vmul.f32 %v1749_v52, %v1742_v51 }
 0xbaf   : > { %v1751_v54 = vpack.c.bf16 %v1750_v53, %v1750_v53 }
 0xbb1   : > { %1828 = vmatmul.bf16.vlgmr.msra.gmra.mxu2 %v1751_v54 }
 0xc34   : > { %v1829_v56 = vpop.f32.mrf.mxu2 }
 0xc35   : > { %v1830_v2 = vadd.f32 %v2385_v55, %v1829_v56 }
 0xc37   : > { %v1833_v57 = vadd.f32 %v1830_v2, %v1704_v33 }
 0xc39   : > { %v1836_v58 = vsel %vm950_vm0, %v1833_v57, 0.0 }
 0xc3a   : > { %1837 = vadd.xlane.f32.xlu0 %v1836_v58 }
 0xc3c   : > { %v1831_v59 = vpop.f32.mrf.mxu2 }
 0xcad   : > { %v1838_v60 = vpop.xlane.xlu0 %1837 }
 0xcae   : > { %v1839_v61 = vmul.f32 %v1838_v60, %v3219_v63 }
 0xcb0   : > { %v1840_v62 = vsub.f32 %v1833_v57, %v1839_v61 }
 0xcb2   : > { %v1841_v0 = vmul.f32 %v1840_v62, %v1840_v62 }
 0xcb4   : > { %v1842_v1 = vsel %vm950_vm0, %v1841_v0, 0.0 }
 0xcb5   : > { %1843 = vadd.xlane.f32.xlu0 %v1842_v1 }
 0xd28   : > { %v1844_v3 = vpop.xlane.xlu0 %1843 }
 0xd29   : > { %v1845_v4 = vmul.f32 %v1844_v3, %v3219_v63 }
 0xd2b   : > { %v1846_v5 = vadd.f32 1e-12, %v1845_v4 }
 0xd2d   : > { %2428 = vrsqrt.f32 %v1846_v5  ;;  %vm1853_vm1 = vweird.f32 %v1846_v5 }
 0xd33   : > { %v2429_v6 = vpop.eup %2428 }
 0xd34   : > { %v1848_v7 = vmul.f32 %v2429_v6, %v1846_v5  ;;  %vm1854_vm15 = vweird.f32 %v2429_v6 }
 0xd35   : > { %vm1855_vm2 = vmor %vm1853_vm1, %vm1854_vm15 }
 0xd36   : > { %v1849_v8 = vmul.f32 %v2429_v6, %v1848_v7 }
 0xd38   : > { %v1850_v9 = vmul.f32 0.5, %v1849_v8 }
 0xd3a   : > { %v1851_v10 = vsub.f32 1.5, %v1850_v9 }
 0xd3c   : > { %v1852_v11 = vmul.f32 %v2429_v6, %v1851_v10 }
 0xd3e   : > { %v1856_v13 = vsel %vm1855_vm2, %v2429_v6, %v1852_v11 }
 0xd3f   : > { %v1857_v16 = vmul.f32 %v1856_v13, %v1840_v62 }
 0xd41   : > { %v1861_v27 = vmul.f32 %v2386_v12, %v1857_v16 }
 0xd43   : > { %v1865_v63 = vadd.f32 %v2387_v15, %v1861_v27 }
 0xd45   : > { %1866 = vst.msk [vmem:[%s925_s6] sm:$0xff] %vm950_vm0, %v1865_v63 }
 0xd46 PF: > { %s3385_s5 = sld [smem:[#allocation29_spill]] }
 0xd4c   : > { %s40_s4 = sadd.s32 1, %s3385_s5  }
 0xd4d   : > { %p37_p7 = scmp.ge.s32.totalorder %s40_s4, 4  }
 0xd4f   :  { %39 = sbr.rel (!%p37_p7) target bundleno = 19 (0x13), region = 201 }
 0xd54   :  { %1886 = vsyncpa [#allocation3], 1 }
 0xd55   :  { %1888 = vsyncpa [#allocation3 + $0x1], 1 }
 0xd56   :  { %1889 = vsyncpa [#allocation5], 1 }
 0xd57   :  { %1890 = vsyncpa [#allocation8], 1 }
 0xd58   :  { %1891 = vsyncpa [#allocation11], 1 }
 0xd59   :  { %1892 = vsyncpa [#allocation14], 1 }
 0xd5a   :  { %1893 = vsyncpa [#allocation17], 1 }
 0xd5b   :  { %1894 = vsyncpa [#allocation20], 1 }

</bundles_post_ra>
